<compile_context>
chip_gen: v6e
topology: v6e:2x2x1
jax: 0.10.0
libtpu: 0.0.40
codegen_flags: <defaults>
</compile_context>

<pallas_src>
import jax
import jax.numpy as jnp
from jax.experimental import pallas as pl
from jax.experimental.pallas import tpu as pltpu


def _basic_block_kernel(x_ref, w1_ref, w2_ref, s1_ref, b1_ref, s2_ref, b2_ref,
                        out_ref, pad_ref, col_ref):
    # x_ref   : (1, H, W, C)   f32  current image tile
    # w1_ref  : (9*C, C)       bf16 conv1 weights, rows ordered (kh, kw, cin)
    # w2_ref  : (9*C, C)       bf16 conv2 weights
    # s*/b*   : (1, C)         f32  folded BN scale / bias
    # out_ref : (1, H, W, C)   f32
    # pad_ref : (H+2, W+2, C)  f32  VMEM scratch, zero halo for both convs
    # col_ref : (H*W, 9*C)     f32  VMEM scratch, im2col patch matrix
    _, H, W, C = out_ref.shape

    # Zero once: the 1-pixel halo ring stays zero for both convolutions
    # (only the interior is overwritten below).
    pad_ref[...] = jnp.zeros_like(pad_ref)

    def im2col(src_hwc):
        # Place the tile in the padded scratch, then gather the 9 shifted taps
        # into one [H*W, 9*C] patch matrix -> a single deep-K MXU matmul.
        pad_ref[1:H + 1, 1:W + 1, :] = src_hwc
        for kh in range(3):
            for kw in range(3):
                k = kh * 3 + kw
                tap = pad_ref[kh:kh + H, kw:kw + W, :]        # (H, W, C)
                col_ref[:, k * C:(k + 1) * C] = tap.reshape(H * W, C)

    def conv_bn(w_ref, s_ref, b_ref):
        # [H*W, 9*C] x [9*C, C] -> [H*W, C]; bf16 operands, f32 accumulation.
        acc = jnp.dot(col_ref[...].astype(jnp.bfloat16), w_ref[...],
                      preferred_element_type=jnp.float32)
        return acc * s_ref[...] + b_ref[...]

    x = x_ref[0]                                              # (H, W, C) f32

    # conv1 + bn1 + relu   (intermediate `h` never leaves VMEM)
    im2col(x)
    h = jnp.maximum(conv_bn(w1_ref, s1_ref, b1_ref), 0.0)     # (H*W, C) f32

    # conv2 + bn2 + residual + relu
    im2col(h.reshape(H, W, C))
    y = conv_bn(w2_ref, s2_ref, b2_ref) + x.reshape(H * W, C)
    out_ref[...] = jnp.maximum(y, 0.0).reshape(1, H, W, C).astype(out_ref.dtype)


def _fold_bn(gamma, beta, mean, var, eps=1e-5):
    scale = gamma / jnp.sqrt(var + eps)
    bias = beta - mean * scale
    return scale, bias


def basic_block_forward(x_nchw, params):
    """Fused BasicBlock forward (stride=1, downsample=None). x: (N, C, H, W) f32."""
    N, C, H, W = x_nchw.shape
    x = jnp.transpose(x_nchw, (0, 2, 3, 1))                   # NCHW -> NHWC

    s1, b1 = _fold_bn(params["bn1_gamma"], params["bn1_beta"],
                      params["bn1_mean"], params["bn1_var"])
    s2, b2 = _fold_bn(params["bn2_gamma"], params["bn2_beta"],
                      params["bn2_mean"], params["bn2_var"])

    # HWIO (3,3,C,C) -> (9*C, C), row order (kh, kw, cin) matching the im2col
    # column order; bf16 for full-rate MXU.
    w1 = params["w1"].reshape(9 * C, C).astype(jnp.bfloat16)
    w2 = params["w2"].reshape(9 * C, C).astype(jnp.bfloat16)

    img_spec = pl.BlockSpec((1, H, W, C), lambda n: (n, 0, 0, 0))
    w_spec = pl.BlockSpec((9 * C, C), lambda n: (0, 0))        # resident
    v_spec = pl.BlockSpec((1, C), lambda n: (0, 0))            # resident

    out = pl.pallas_call(
        _basic_block_kernel,
        out_shape=jax.ShapeDtypeStruct((N, H, W, C), jnp.float32),
        grid_spec=pltpu.PrefetchScalarGridSpec(
            num_scalar_prefetch=0,
            grid=(N,),
            in_specs=[img_spec, w_spec, w_spec,
                      v_spec, v_spec, v_spec, v_spec],
            out_specs=img_spec,
            scratch_shapes=[
                pltpu.VMEM((H + 2, W + 2, C), jnp.float32),    # pad scratch
                pltpu.VMEM((H * W, 9 * C), jnp.float32),       # im2col scratch
            ]),
        compiler_params=pltpu.CompilerParams(
            dimension_semantics=("parallel",),                 # megacore on v7x
            vmem_limit_bytes=32 * 1024 * 1024),                # fits v5e/v6e/v7x
    )(x, w1, w2,
      s1.reshape(1, C), b1.reshape(1, C),
      s2.reshape(1, C), b2.reshape(1, C))

    return jnp.transpose(out, (0, 3, 1, 2))                    # NHWC -> NCHW


def _reference_forward(x_nchw, params):
    """Pure-JAX reference. Conv operands cast to bf16 exactly like the kernel's
    MXU path (f32 accumulation); everything else in f32."""
    x = jnp.transpose(x_nchw, (0, 2, 3, 1))

    def conv(h, w):
        return jax.lax.conv_general_dilated(
            h.astype(jnp.bfloat16), w.astype(jnp.bfloat16),
            window_strides=(1, 1), padding="SAME",
            dimension_numbers=("NHWC", "HWIO", "NHWC"),
            preferred_element_type=jnp.float32)

    s1, b1 = _fold_bn(params["bn1_gamma"], params["bn1_beta"],
                      params["bn1_mean"], params["bn1_var"])
    s2, b2 = _fold_bn(params["bn2_gamma"], params["bn2_beta"],
                      params["bn2_mean"], params["bn2_var"])
    h = jnp.maximum(conv(x, params["w1"]) * s1 + b1, 0.0)
    out = jnp.maximum(conv(h, params["w2"]) * s2 + b2 + x, 0.0)
    return jnp.transpose(out, (0, 3, 1, 2))


if __name__ == "__main__":
    key = jax.random.PRNGKey(0)
    N, C, H, W = 2, 4, 16, 16          # inplanes = planes = 4, stride = 1
    inplanes = planes = C

    ks = jax.random.split(key, 11)
    x = jax.random.normal(ks[0], (N, C, H, W), jnp.float32)

    params = {
        # conv weights in HWIO layout: (3, 3, Cin, Cout)
        "w1": jax.random.normal(ks[1], (3, 3, inplanes, planes), jnp.float32) * 0.1,
        "w2": jax.random.normal(ks[2], (3, 3, planes, planes), jnp.float32) * 0.1,
        "bn1_gamma": jax.random.uniform(ks[3], (planes,), jnp.float32, 0.5, 1.5),
        "bn1_beta":  jax.random.normal(ks[4], (planes,), jnp.float32) * 0.1,
        "bn1_mean":  jax.random.normal(ks[5], (planes,), jnp.float32) * 0.1,
        "bn1_var":   jax.random.uniform(ks[6], (planes,), jnp.float32, 0.5, 1.5),
        "bn2_gamma": jax.random.uniform(ks[7], (planes,), jnp.float32, 0.5, 1.5),
        "bn2_beta":  jax.random.normal(ks[8], (planes,), jnp.float32) * 0.1,
        "bn2_mean":  jax.random.normal(ks[9], (planes,), jnp.float32) * 0.1,
        "bn2_var":   jax.random.uniform(ks[10], (planes,), jnp.float32, 0.5, 1.5),
    }

    out = jax.jit(basic_block_forward)(x, params)
    out = jax.block_until_ready(out)

    ref = _reference_forward(x, params)
    assert out.shape == (N, C, H, W)
    # Kernel and reference both use bf16 matmul operands with f32 accumulation;
    # remaining differences are only f32 summation-order noise.
    assert jnp.allclose(out, ref, atol=2e-3, rtol=2e-3), "mismatch vs reference"

    print("KERNEL_OK")
</pallas_src>

<mosaic_0001>
module attributes {stable_mosaic.version = 11 : i64} {
  func.func @_basic_block_kernel(%arg0: i32, %arg1: memref<1x16x16x4xf32, #tpu.memory_space<vmem>>, %arg2: memref<36x4xbf16, #tpu.memory_space<vmem>>, %arg3: memref<36x4xbf16, #tpu.memory_space<vmem>>, %arg4: memref<1x4xf32, #tpu.memory_space<vmem>>, %arg5: memref<1x4xf32, #tpu.memory_space<vmem>>, %arg6: memref<1x4xf32, #tpu.memory_space<vmem>>, %arg7: memref<1x4xf32, #tpu.memory_space<vmem>>, %arg8: memref<1x16x16x4xf32, #tpu.memory_space<vmem>>, %arg9: memref<18x18x4xf32, #tpu.memory_space<vmem>>, %arg10: memref<256x36xf32, #tpu.memory_space<vmem>>) attributes {dimension_semantics = [#tpu.dimension_semantics<parallel>], iteration_bounds = array<i64: 2>, scalar_prefetch = 0 : i64, scratch_operands = 2 : i64, tpu.core_type = #tpu.core_type<tc>, window_params = [{transform_indices = @transform_0, window_bounds = array<i64: 1, 16, 16, 4>}, {pipeline_mode = #tpu.pipeline_mode<synchronous>, transform_indices = @transform_1, window_bounds = array<i64: 36, 4>}, {pipeline_mode = #tpu.pipeline_mode<synchronous>, transform_indices = @transform_2, window_bounds = array<i64: 36, 4>}, {pipeline_mode = #tpu.pipeline_mode<synchronous>, transform_indices = @transform_3, window_bounds = array<i64: 1, 4>}, {pipeline_mode = #tpu.pipeline_mode<synchronous>, transform_indices = @transform_4, window_bounds = array<i64: 1, 4>}, {pipeline_mode = #tpu.pipeline_mode<synchronous>, transform_indices = @transform_5, window_bounds = array<i64: 1, 4>}, {pipeline_mode = #tpu.pipeline_mode<synchronous>, transform_indices = @transform_6, window_bounds = array<i64: 1, 4>}, {transform_indices = @transform_7, window_bounds = array<i64: 1, 16, 16, 4>}]} {
    %cst = arith.constant 0.000000e+00 : f32
    %0 = vector.broadcast %cst : f32 to vector<18x18x4xf32>
    %c0 = arith.constant 0 : index
    %c0_0 = arith.constant 0 : index
    %c0_1 = arith.constant 0 : index
    %1 = vector.load %arg9[%c0, %c0_0, %c0_1] : memref<18x18x4xf32, #tpu.memory_space<vmem>>, vector<18x18x4xf32>
    tpu.vector_store %arg9[%c0, %c0_0, %c0_1], %0 {strides = array<i32>} : memref<18x18x4xf32, #tpu.memory_space<vmem>>, vector<18x18x4xf32>,
    %c0_2 = arith.constant 0 : index
    %c0_3 = arith.constant 0 : index
    %c0_4 = arith.constant 0 : index
    %c0_5 = arith.constant 0 : index
    %2 = vector.load %arg1[%c0_2, %c0_3, %c0_4, %c0_5] : memref<1x16x16x4xf32, #tpu.memory_space<vmem>>, vector<1x16x16x4xf32>
    %3 = vector.shape_cast %2 : vector<1x16x16x4xf32> to vector<16x16x4xf32>
    %c1 = arith.constant 1 : index
    %c1_6 = arith.constant 1 : index
    %c0_7 = arith.constant 0 : index
    %4 = vector.load %arg9[%c1, %c1_6, %c0_7] : memref<18x18x4xf32, #tpu.memory_space<vmem>>, vector<16x16x4xf32>
    tpu.vector_store %arg9[%c1, %c1_6, %c0_7], %3 {strides = array<i32>} : memref<18x18x4xf32, #tpu.memory_space<vmem>>, vector<16x16x4xf32>,
    %c0_8 = arith.constant 0 : index
    %c0_9 = arith.constant 0 : index
    %c0_10 = arith.constant 0 : index
    %5 = vector.load %arg9[%c0_8, %c0_9, %c0_10] : memref<18x18x4xf32, #tpu.memory_space<vmem>>, vector<16x16x4xf32>
    %6 = vector.shape_cast %5 : vector<16x16x4xf32> to vector<256x4xf32>
    %c0_11 = arith.constant 0 : index
    %c0_12 = arith.constant 0 : index
    %7 = vector.load %arg10[%c0_11, %c0_12] : memref<256x36xf32, #tpu.memory_space<vmem>>, vector<256x4xf32>
    tpu.vector_store %arg10[%c0_11, %c0_12], %6 {strides = array<i32>} : memref<256x36xf32, #tpu.memory_space<vmem>>, vector<256x4xf32>,
    %c0_13 = arith.constant 0 : index
    %c1_14 = arith.constant 1 : index
    %c0_15 = arith.constant 0 : index
    %8 = vector.load %arg9[%c0_13, %c1_14, %c0_15] : memref<18x18x4xf32, #tpu.memory_space<vmem>>, vector<16x16x4xf32>
    %9 = vector.shape_cast %8 : vector<16x16x4xf32> to vector<256x4xf32>
    %c0_16 = arith.constant 0 : index
    %c4 = arith.constant 4 : index
    %10 = vector.load %arg10[%c0_16, %c4] : memref<256x36xf32, #tpu.memory_space<vmem>>, vector<256x4xf32>
    tpu.vector_store %arg10[%c0_16, %c4], %9 {strides = array<i32>} : memref<256x36xf32, #tpu.memory_space<vmem>>, vector<256x4xf32>,
    %c0_17 = arith.constant 0 : index
    %c2 = arith.constant 2 : index
    %c0_18 = arith.constant 0 : index
    %11 = vector.load %arg9[%c0_17, %c2, %c0_18] : memref<18x18x4xf32, #tpu.memory_space<vmem>>, vector<16x16x4xf32>
    %12 = vector.shape_cast %11 : vector<16x16x4xf32> to vector<256x4xf32>
    %c0_19 = arith.constant 0 : index
    %c8 = arith.constant 8 : index
    %13 = vector.load %arg10[%c0_19, %c8] : memref<256x36xf32, #tpu.memory_space<vmem>>, vector<256x4xf32>
    tpu.vector_store %arg10[%c0_19, %c8], %12 {strides = array<i32>} : memref<256x36xf32, #tpu.memory_space<vmem>>, vector<256x4xf32>,
    %c1_20 = arith.constant 1 : index
    %c0_21 = arith.constant 0 : index
    %c0_22 = arith.constant 0 : index
    %14 = vector.load %arg9[%c1_20, %c0_21, %c0_22] : memref<18x18x4xf32, #tpu.memory_space<vmem>>, vector<16x16x4xf32>
    %15 = vector.shape_cast %14 : vector<16x16x4xf32> to vector<256x4xf32>
    %c0_23 = arith.constant 0 : index
    %c12 = arith.constant 12 : index
    %16 = vector.load %arg10[%c0_23, %c12] : memref<256x36xf32, #tpu.memory_space<vmem>>, vector<256x4xf32>
    tpu.vector_store %arg10[%c0_23, %c12], %15 {strides = array<i32>} : memref<256x36xf32, #tpu.memory_space<vmem>>, vector<256x4xf32>,
    %c1_24 = arith.constant 1 : index
    %c1_25 = arith.constant 1 : index
    %c0_26 = arith.constant 0 : index
    %17 = vector.load %arg9[%c1_24, %c1_25, %c0_26] : memref<18x18x4xf32, #tpu.memory_space<vmem>>, vector<16x16x4xf32>
    %18 = vector.shape_cast %17 : vector<16x16x4xf32> to vector<256x4xf32>
    %c0_27 = arith.constant 0 : index
    %c16 = arith.constant 16 : index
    %19 = vector.load %arg10[%c0_27, %c16] : memref<256x36xf32, #tpu.memory_space<vmem>>, vector<256x4xf32>
    tpu.vector_store %arg10[%c0_27, %c16], %18 {strides = array<i32>} : memref<256x36xf32, #tpu.memory_space<vmem>>, vector<256x4xf32>,
    %c1_28 = arith.constant 1 : index
    %c2_29 = arith.constant 2 : index
    %c0_30 = arith.constant 0 : index
    %20 = vector.load %arg9[%c1_28, %c2_29, %c0_30] : memref<18x18x4xf32, #tpu.memory_space<vmem>>, vector<16x16x4xf32>
    %21 = vector.shape_cast %20 : vector<16x16x4xf32> to vector<256x4xf32>
    %c0_31 = arith.constant 0 : index
    %c20 = arith.constant 20 : index
    %22 = vector.load %arg10[%c0_31, %c20] : memref<256x36xf32, #tpu.memory_space<vmem>>, vector<256x4xf32>
    tpu.vector_store %arg10[%c0_31, %c20], %21 {strides = array<i32>} : memref<256x36xf32, #tpu.memory_space<vmem>>, vector<256x4xf32>,
    %c2_32 = arith.constant 2 : index
    %c0_33 = arith.constant 0 : index
    %c0_34 = arith.constant 0 : index
    %23 = vector.load %arg9[%c2_32, %c0_33, %c0_34] : memref<18x18x4xf32, #tpu.memory_space<vmem>>, vector<16x16x4xf32>
    %24 = vector.shape_cast %23 : vector<16x16x4xf32> to vector<256x4xf32>
    %c0_35 = arith.constant 0 : index
    %c24 = arith.constant 24 : index
    %25 = vector.load %arg10[%c0_35, %c24] : memref<256x36xf32, #tpu.memory_space<vmem>>, vector<256x4xf32>
    tpu.vector_store %arg10[%c0_35, %c24], %24 {strides = array<i32>} : memref<256x36xf32, #tpu.memory_space<vmem>>, vector<256x4xf32>,
    %c2_36 = arith.constant 2 : index
    %c1_37 = arith.constant 1 : index
    %c0_38 = arith.constant 0 : index
    %26 = vector.load %arg9[%c2_36, %c1_37, %c0_38] : memref<18x18x4xf32, #tpu.memory_space<vmem>>, vector<16x16x4xf32>
    %27 = vector.shape_cast %26 : vector<16x16x4xf32> to vector<256x4xf32>
    %c0_39 = arith.constant 0 : index
    %c28 = arith.constant 28 : index
    %28 = vector.load %arg10[%c0_39, %c28] : memref<256x36xf32, #tpu.memory_space<vmem>>, vector<256x4xf32>
    tpu.vector_store %arg10[%c0_39, %c28], %27 {strides = array<i32>} : memref<256x36xf32, #tpu.memory_space<vmem>>, vector<256x4xf32>,
    %c2_40 = arith.constant 2 : index
    %c2_41 = arith.constant 2 : index
    %c0_42 = arith.constant 0 : index
    %29 = vector.load %arg9[%c2_40, %c2_41, %c0_42] : memref<18x18x4xf32, #tpu.memory_space<vmem>>, vector<16x16x4xf32>
    %30 = vector.shape_cast %29 : vector<16x16x4xf32> to vector<256x4xf32>
    %c0_43 = arith.constant 0 : index
    %c32 = arith.constant 32 : index
    %31 = vector.load %arg10[%c0_43, %c32] : memref<256x36xf32, #tpu.memory_space<vmem>>, vector<256x4xf32>
    tpu.vector_store %arg10[%c0_43, %c32], %30 {strides = array<i32>} : memref<256x36xf32, #tpu.memory_space<vmem>>, vector<256x4xf32>,
    %c0_44 = arith.constant 0 : index
    %c0_45 = arith.constant 0 : index
    %32 = vector.load %arg10[%c0_44, %c0_45] : memref<256x36xf32, #tpu.memory_space<vmem>>, vector<256x36xf32>
    %33 = arith.truncf %32 : vector<256x36xf32> to vector<256x36xbf16>
    %c0_46 = arith.constant 0 : index
    %c0_47 = arith.constant 0 : index
    %34 = vector.load %arg2[%c0_46, %c0_47] : memref<36x4xbf16, #tpu.memory_space<vmem>>, vector<36x4xbf16>
    %cst_48 = arith.constant dense<0.000000e+00> : vector<256x4xf32>
    %35 = tpu.matmul %33, %34, %cst_48 {dimension_numbers = #tpu.dot_dimension_numbers<[1], [0], [0], [1], [0, 0, 1, 1], [], []>} : vector<256x36xbf16>, vector<36x4xbf16>, vector<256x4xf32> -> vector<256x4xf32>
    %c0_49 = arith.constant 0 : index
    %c0_50 = arith.constant 0 : index
    %36 = vector.load %arg4[%c0_49, %c0_50] : memref<1x4xf32, #tpu.memory_space<vmem>>, vector<1x4xf32>
    %37 = vector.broadcast %36 : vector<1x4xf32> to vector<256x4xf32>
    %38 = arith.mulf %35, %37 : vector<256x4xf32>
    %c0_51 = arith.constant 0 : index
    %c0_52 = arith.constant 0 : index
    %39 = vector.load %arg5[%c0_51, %c0_52] : memref<1x4xf32, #tpu.memory_space<vmem>>, vector<1x4xf32>
    %40 = vector.broadcast %39 : vector<1x4xf32> to vector<256x4xf32>
    %41 = arith.addf %38, %40 : vector<256x4xf32>
    %cst_53 = arith.constant 0.000000e+00 : f32
    %42 = vector.broadcast %cst_53 : f32 to vector<256x4xf32>
    %43 = arith.maximumf %41, %42 : vector<256x4xf32>
    %44 = vector.shape_cast %43 : vector<256x4xf32> to vector<16x16x4xf32>
    %c1_54 = arith.constant 1 : index
    %c1_55 = arith.constant 1 : index
    %c0_56 = arith.constant 0 : index
    %45 = vector.load %arg9[%c1_54, %c1_55, %c0_56] : memref<18x18x4xf32, #tpu.memory_space<vmem>>, vector<16x16x4xf32>
    tpu.vector_store %arg9[%c1_54, %c1_55, %c0_56], %44 {strides = array<i32>} : memref<18x18x4xf32, #tpu.memory_space<vmem>>, vector<16x16x4xf32>,
    %c0_57 = arith.constant 0 : index
    %c0_58 = arith.constant 0 : index
    %c0_59 = arith.constant 0 : index
    %46 = vector.load %arg9[%c0_57, %c0_58, %c0_59] : memref<18x18x4xf32, #tpu.memory_space<vmem>>, vector<16x16x4xf32>
    %47 = vector.shape_cast %46 : vector<16x16x4xf32> to vector<256x4xf32>
    %c0_60 = arith.constant 0 : index
    %c0_61 = arith.constant 0 : index
    %48 = vector.load %arg10[%c0_60, %c0_61] : memref<256x36xf32, #tpu.memory_space<vmem>>, vector<256x4xf32>
    tpu.vector_store %arg10[%c0_60, %c0_61], %47 {strides = array<i32>} : memref<256x36xf32, #tpu.memory_space<vmem>>, vector<256x4xf32>,
    %c0_62 = arith.constant 0 : index
    %c1_63 = arith.constant 1 : index
    %c0_64 = arith.constant 0 : index
    %49 = vector.load %arg9[%c0_62, %c1_63, %c0_64] : memref<18x18x4xf32, #tpu.memory_space<vmem>>, vector<16x16x4xf32>
    %50 = vector.shape_cast %49 : vector<16x16x4xf32> to vector<256x4xf32>
    %c0_65 = arith.constant 0 : index
    %c4_66 = arith.constant 4 : index
    %51 = vector.load %arg10[%c0_65, %c4_66] : memref<256x36xf32, #tpu.memory_space<vmem>>, vector<256x4xf32>
    tpu.vector_store %arg10[%c0_65, %c4_66], %50 {strides = array<i32>} : memref<256x36xf32, #tpu.memory_space<vmem>>, vector<256x4xf32>,
    %c0_67 = arith.constant 0 : index
    %c2_68 = arith.constant 2 : index
    %c0_69 = arith.constant 0 : index
    %52 = vector.load %arg9[%c0_67, %c2_68, %c0_69] : memref<18x18x4xf32, #tpu.memory_space<vmem>>, vector<16x16x4xf32>
    %53 = vector.shape_cast %52 : vector<16x16x4xf32> to vector<256x4xf32>
    %c0_70 = arith.constant 0 : index
    %c8_71 = arith.constant 8 : index
    %54 = vector.load %arg10[%c0_70, %c8_71] : memref<256x36xf32, #tpu.memory_space<vmem>>, vector<256x4xf32>
    tpu.vector_store %arg10[%c0_70, %c8_71], %53 {strides = array<i32>} : memref<256x36xf32, #tpu.memory_space<vmem>>, vector<256x4xf32>,
    %c1_72 = arith.constant 1 : index
    %c0_73 = arith.constant 0 : index
    %c0_74 = arith.constant 0 : index
    %55 = vector.load %arg9[%c1_72, %c0_73, %c0_74] : memref<18x18x4xf32, #tpu.memory_space<vmem>>, vector<16x16x4xf32>
    %56 = vector.shape_cast %55 : vector<16x16x4xf32> to vector<256x4xf32>
    %c0_75 = arith.constant 0 : index
    %c12_76 = arith.constant 12 : index
    %57 = vector.load %arg10[%c0_75, %c12_76] : memref<256x36xf32, #tpu.memory_space<vmem>>, vector<256x4xf32>
    tpu.vector_store %arg10[%c0_75, %c12_76], %56 {strides = array<i32>} : memref<256x36xf32, #tpu.memory_space<vmem>>, vector<256x4xf32>,
    %c1_77 = arith.constant 1 : index
    %c1_78 = arith.constant 1 : index
    %c0_79 = arith.constant 0 : index
    %58 = vector.load %arg9[%c1_77, %c1_78, %c0_79] : memref<18x18x4xf32, #tpu.memory_space<vmem>>, vector<16x16x4xf32>
    %59 = vector.shape_cast %58 : vector<16x16x4xf32> to vector<256x4xf32>
    %c0_80 = arith.constant 0 : index
    %c16_81 = arith.constant 16 : index
    %60 = vector.load %arg10[%c0_80, %c16_81] : memref<256x36xf32, #tpu.memory_space<vmem>>, vector<256x4xf32>
    tpu.vector_store %arg10[%c0_80, %c16_81], %59 {strides = array<i32>} : memref<256x36xf32, #tpu.memory_space<vmem>>, vector<256x4xf32>,
    %c1_82 = arith.constant 1 : index
    %c2_83 = arith.constant 2 : index
    %c0_84 = arith.constant 0 : index
    %61 = vector.load %arg9[%c1_82, %c2_83, %c0_84] : memref<18x18x4xf32, #tpu.memory_space<vmem>>, vector<16x16x4xf32>
    %62 = vector.shape_cast %61 : vector<16x16x4xf32> to vector<256x4xf32>
    %c0_85 = arith.constant 0 : index
    %c20_86 = arith.constant 20 : index
    %63 = vector.load %arg10[%c0_85, %c20_86] : memref<256x36xf32, #tpu.memory_space<vmem>>, vector<256x4xf32>
    tpu.vector_store %arg10[%c0_85, %c20_86], %62 {strides = array<i32>} : memref<256x36xf32, #tpu.memory_space<vmem>>, vector<256x4xf32>,
    %c2_87 = arith.constant 2 : index
    %c0_88 = arith.constant 0 : index
    %c0_89 = arith.constant 0 : index
    %64 = vector.load %arg9[%c2_87, %c0_88, %c0_89] : memref<18x18x4xf32, #tpu.memory_space<vmem>>, vector<16x16x4xf32>
    %65 = vector.shape_cast %64 : vector<16x16x4xf32> to vector<256x4xf32>
    %c0_90 = arith.constant 0 : index
    %c24_91 = arith.constant 24 : index
    %66 = vector.load %arg10[%c0_90, %c24_91] : memref<256x36xf32, #tpu.memory_space<vmem>>, vector<256x4xf32>
    tpu.vector_store %arg10[%c0_90, %c24_91], %65 {strides = array<i32>} : memref<256x36xf32, #tpu.memory_space<vmem>>, vector<256x4xf32>,
    %c2_92 = arith.constant 2 : index
    %c1_93 = arith.constant 1 : index
    %c0_94 = arith.constant 0 : index
    %67 = vector.load %arg9[%c2_92, %c1_93, %c0_94] : memref<18x18x4xf32, #tpu.memory_space<vmem>>, vector<16x16x4xf32>
    %68 = vector.shape_cast %67 : vector<16x16x4xf32> to vector<256x4xf32>
    %c0_95 = arith.constant 0 : index
    %c28_96 = arith.constant 28 : index
    %69 = vector.load %arg10[%c0_95, %c28_96] : memref<256x36xf32, #tpu.memory_space<vmem>>, vector<256x4xf32>
    tpu.vector_store %arg10[%c0_95, %c28_96], %68 {strides = array<i32>} : memref<256x36xf32, #tpu.memory_space<vmem>>, vector<256x4xf32>,
    %c2_97 = arith.constant 2 : index
    %c2_98 = arith.constant 2 : index
    %c0_99 = arith.constant 0 : index
    %70 = vector.load %arg9[%c2_97, %c2_98, %c0_99] : memref<18x18x4xf32, #tpu.memory_space<vmem>>, vector<16x16x4xf32>
    %71 = vector.shape_cast %70 : vector<16x16x4xf32> to vector<256x4xf32>
    %c0_100 = arith.constant 0 : index
    %c32_101 = arith.constant 32 : index
    %72 = vector.load %arg10[%c0_100, %c32_101] : memref<256x36xf32, #tpu.memory_space<vmem>>, vector<256x4xf32>
    tpu.vector_store %arg10[%c0_100, %c32_101], %71 {strides = array<i32>} : memref<256x36xf32, #tpu.memory_space<vmem>>, vector<256x4xf32>,
    %c0_102 = arith.constant 0 : index
    %c0_103 = arith.constant 0 : index
    %73 = vector.load %arg10[%c0_102, %c0_103] : memref<256x36xf32, #tpu.memory_space<vmem>>, vector<256x36xf32>
    %74 = arith.truncf %73 : vector<256x36xf32> to vector<256x36xbf16>
    %c0_104 = arith.constant 0 : index
    %c0_105 = arith.constant 0 : index
    %75 = vector.load %arg3[%c0_104, %c0_105] : memref<36x4xbf16, #tpu.memory_space<vmem>>, vector<36x4xbf16>
    %cst_106 = arith.constant dense<0.000000e+00> : vector<256x4xf32>
    %76 = tpu.matmul %74, %75, %cst_106 {dimension_numbers = #tpu.dot_dimension_numbers<[1], [0], [0], [1], [0, 0, 1, 1], [], []>} : vector<256x36xbf16>, vector<36x4xbf16>, vector<256x4xf32> -> vector<256x4xf32>
    %c0_107 = arith.constant 0 : index
    %c0_108 = arith.constant 0 : index
    %77 = vector.load %arg6[%c0_107, %c0_108] : memref<1x4xf32, #tpu.memory_space<vmem>>, vector<1x4xf32>
    %78 = vector.broadcast %77 : vector<1x4xf32> to vector<256x4xf32>
    %79 = arith.mulf %76, %78 : vector<256x4xf32>
    %c0_109 = arith.constant 0 : index
    %c0_110 = arith.constant 0 : index
    %80 = vector.load %arg7[%c0_109, %c0_110] : memref<1x4xf32, #tpu.memory_space<vmem>>, vector<1x4xf32>
    %81 = vector.broadcast %80 : vector<1x4xf32> to vector<256x4xf32>
    %82 = arith.addf %79, %81 : vector<256x4xf32>
    %83 = vector.shape_cast %3 : vector<16x16x4xf32> to vector<256x4xf32>
    %84 = arith.addf %82, %83 : vector<256x4xf32>
    %cst_111 = arith.constant 0.000000e+00 : f32
    %85 = vector.broadcast %cst_111 : f32 to vector<256x4xf32>
    %86 = arith.maximumf %84, %85 : vector<256x4xf32>
    %87 = vector.shape_cast %86 : vector<256x4xf32> to vector<1x16x16x4xf32>
    %c0_112 = arith.constant 0 : index
    %c0_113 = arith.constant 0 : index
    %c0_114 = arith.constant 0 : index
    %c0_115 = arith.constant 0 : index
    %88 = vector.load %arg8[%c0_112, %c0_113, %c0_114, %c0_115] : memref<1x16x16x4xf32, #tpu.memory_space<vmem>>, vector<1x16x16x4xf32>
    tpu.vector_store %arg8[%c0_112, %c0_113, %c0_114, %c0_115], %87 {strides = array<i32>} : memref<1x16x16x4xf32, #tpu.memory_space<vmem>>, vector<1x16x16x4xf32>,
    return
  }
  func.func @transform_0(%arg0: i32) -> (i32, i32, i32, i32) {
    %c0_i32 = arith.constant 0 : i32
    %c0_i32_0 = arith.constant 0 : i32
    %c0_i32_1 = arith.constant 0 : i32
    %c0_i32_2 = arith.constant 0 : i32
    return %arg0, %c0_i32, %c0_i32_0, %c0_i32_1 : i32, i32, i32, i32
  }
  func.func @transform_1(%arg0: i32) -> (i32, i32) {
    %c0_i32 = arith.constant 0 : i32
    %c0_i32_0 = arith.constant 0 : i32
    %c0_i32_1 = arith.constant 0 : i32
    return %c0_i32, %c0_i32_0 : i32, i32
  }
  func.func @transform_2(%arg0: i32) -> (i32, i32) {
    %c0_i32 = arith.constant 0 : i32
    %c0_i32_0 = arith.constant 0 : i32
    %c0_i32_1 = arith.constant 0 : i32
    return %c0_i32, %c0_i32_0 : i32, i32
  }
  func.func @transform_3(%arg0: i32) -> (i32, i32) {
    %c0_i32 = arith.constant 0 : i32
    %c0_i32_0 = arith.constant 0 : i32
    %c0_i32_1 = arith.constant 0 : i32
    return %c0_i32, %c0_i32_0 : i32, i32
  }
  func.func @transform_4(%arg0: i32) -> (i32, i32) {
    %c0_i32 = arith.constant 0 : i32
    %c0_i32_0 = arith.constant 0 : i32
    %c0_i32_1 = arith.constant 0 : i32
    return %c0_i32, %c0_i32_0 : i32, i32
  }
  func.func @transform_5(%arg0: i32) -> (i32, i32) {
    %c0_i32 = arith.constant 0 : i32
    %c0_i32_0 = arith.constant 0 : i32
    %c0_i32_1 = arith.constant 0 : i32
    return %c0_i32, %c0_i32_0 : i32, i32
  }
  func.func @transform_6(%arg0: i32) -> (i32, i32) {
    %c0_i32 = arith.constant 0 : i32
    %c0_i32_0 = arith.constant 0 : i32
    %c0_i32_1 = arith.constant 0 : i32
    return %c0_i32, %c0_i32_0 : i32, i32
  }
  func.func @transform_7(%arg0: i32) -> (i32, i32, i32, i32) {
    %c0_i32 = arith.constant 0 : i32
    %c0_i32_0 = arith.constant 0 : i32
    %c0_i32_1 = arith.constant 0 : i32
    %c0_i32_2 = arith.constant 0 : i32
    return %arg0, %c0_i32, %c0_i32_0, %c0_i32_1 : i32, i32, i32, i32
  }
}

</mosaic_0001>

<bundles_post_ra>
// kernel: basic_block_forward.1
= control target key start
LH: loop header
LB: loop body
LE: loop exit
PB: predicated region body
PF: predicated region fallthrough
CT: control target
= control target key end

     0   :  { %s4794_s24 = smov 0   ;;  %s7136_s0 = inlined_call_operand.vmem [shape: f32[2,16,16,4], index: 0, kind: input, shape index: {}]   ;;  %s7137_s1 = inlined_call_operand.vmem [shape: bf16[36,4], index: 1, kind: input, shape index: {}]   ;;  %s7138_s2 = inlined_call_operand.vmem [shape: bf16[36,4], index: 2, kind: input, shape index: {}]   ;;  %s7139_s3 = inlined_call_operand.vmem [shape: f32[1,4], index: 3, kind: input, shape index: {}]   ;;  %s7140_s4 = inlined_call_operand.vmem [shape: f32[1,4], index: 4, kind: input, shape index: {}]   ;;  %s7141_s5 = inlined_call_operand.vmem [shape: f32[1,4], index: 5, kind: input, shape index: {}]   ;;  %s7142_s6 = inlined_call_operand.vmem [shape: f32[1,4], index: 6, kind: input, shape index: {}]   ;;  %s7143_s7 = inlined_call_operand.vmem [shape: f32[2,16,16,4], index: 7, kind: output, shape index: {}]  }
   0x1 LB: > { %s4543_s25 = sadd.s32 4294967295, %s4743_s24   ;;  %p4547_p0 = scmp.ge.s32.totalorder %s4743_s24, 1  ;;  %s4743_s24 = sphi %s4794_s24, %s17_s24  }
   0x2   : > { %p237_p1 = scmp.lt.s32.totalorder %s4743_s24, 3 }
   0x4   : > { %p238_p2 = pnand %p4547_p0, %p237_p1 }
   0x6   : > { %241 = sbr.rel (%p238_p2) target bundleno = 1676 (0x68c), region = 48 }
   0xb   : > { %vm280_vm0 = vcmask 31744   ;;  %vm283_vm1 = vcmask 25600   ;;  %p4804_p3 = scmp.lt.s32.totalorder %s4543_s25, 1  ;;  %v4745_v0 = vmov 0.0   ;;  %s4746_s8 = smov 4   ;;  %vm625_vm2 = vcmask 64544  }
   0xc   : > { %281 = vst.msk [vmem:[#allocation2] sm:$0xff] %vm280_vm0, %v4745_v0  ;;  %282 = vst.msk [vmem:[#allocation2 + $0x8] sm:$0xff] %vm280_vm0, %v4745_v0  ;;  %s4747_s9 = smov 8   ;;  %s4748_s10 = smov 12   ;;  %vm818_vm3 = vcmask 97344   ;;  %vm1011_vm4 = vcmask 130144  }
   0xd   : > { %285 = vst.msk [vmem:[#allocation2 + $0x18] sm:$0xff] %vm280_vm0, %v4745_v0  ;;  %286 = vst.msk [vmem:[#allocation2 + $0x20] sm:$0xff] %vm280_vm0, %v4745_v0  ;;  %s7332_s25 = smov (!%p4804_p3, %s4543_s25), 1  ;;  %s4749_s11 = smov 16   ;;  %vm1204_vm5 = vcmask 162944   ;;  %vm1397_vm6 = vcmask 195744  }
   0xe   : > { %288 = vst.msk [vmem:[#allocation2 + $0x30] sm:$0xff] %vm280_vm0, %v4745_v0  ;;  %289 = vst.msk [vmem:[#allocation2 + $0x38] sm:$0xff] %vm280_vm0, %v4745_v0  ;;  %s4596_s27 = sshll.u32 %s7332_s25, 8  ;;  %s4750_s12 = smov 20   ;;  %vm2127_vm7 = vcmask 1041408   ;;  %vm1591_vm8 = vcmask 228544  }
   0xf   : > { %291 = vst.msk [vmem:[#allocation2 + $0x48] sm:$0xff] %vm280_vm0, %v4745_v0  ;;  %292 = vst.msk [vmem:[#allocation2 + $0x50] sm:$0xff] %vm280_vm0, %v4745_v0  ;;  %s4874_s30 = scalar_lea.vmem %s7136_s0, %s4596_s27  ;;  %s4751_s13 = smov 24   ;;  %vm1784_vm9 = vcmask 261344   ;;  %vm1977_vm10 = vcmask 294144   ;;  %vm2078_vm11 = vcmask 293888  }
  0x10   : > { %294 = vst.msk [vmem:[#allocation2 + $0x60] sm:$0xff] %vm280_vm0, %v4745_v0  ;;  %295 = vst.msk [vmem:[#allocation2 + $0x68] sm:$0xff] %vm280_vm0, %v4745_v0  ;;  %v4877_v1 = vld [vmem:[%s4874_s30] sm:$0xff]  ;;  %v4880_v2 = vld [vmem:[%s4874_s30 + $0x10] sm:$0xff]  ;;  %s4752_s14 = smov 28   ;;  %s4753_s21 = smov 32  }
  0x11   : > { %297 = vst.msk [vmem:[#allocation2 + $0x78] sm:$0xff] %vm280_vm0, %v4745_v0  ;;  %298 = vst.msk [vmem:[#allocation2 + $0x80] sm:$0xff] %vm280_vm0, %v4745_v0  ;;  %v4883_v3 = vld [vmem:[%s4874_s30 + $0x8] sm:$0xff]  ;;  %v4892_v4 = vld [vmem:[%s4874_s30 + $0x20] sm:$0xff]  ;;  %s6927_s18 = scalar_lea.vmem %s7143_s7, %s4596_s27 }
  0x12   : > { %300 = vst.msk [vmem:[#allocation2 + $0x90] sm:$0xff] %vm280_vm0, %v4745_v0  ;;  %301 = vst.msk [vmem:[#allocation2 + $0x98] sm:$0xff] %vm280_vm0, %v4745_v0  ;;  %v4895_v5 = vld [vmem:[%s4874_s30 + $0x18] sm:$0xff]  ;;  %v4898_v6 = vld [vmem:[%s4874_s30 + $0x30] sm:$0xff] }
  0x13   : > { %303 = vst.msk [vmem:[#allocation2 + $0xa8] sm:$0xff] %vm280_vm0, %v4745_v0  ;;  %304 = vst.msk [vmem:[#allocation2 + $0xb0] sm:$0xff] %vm280_vm0, %v4745_v0  ;;  %v465_v7 = vld [vmem:[#allocation2 + $0x1] sm:$0xff]  ;;  %v4916_v11 = vld [vmem:[%s4874_s30 + $0x38] sm:$0xff] }
  0x14   : > { %306 = vst.msk [vmem:[#allocation2 + $0xc0] sm:$0xff] %vm280_vm0, %v4745_v0  ;;  %307 = vst.msk [vmem:[#allocation2 + $0xc8] sm:$0xff] %vm280_vm0, %v4745_v0  ;;  %v4907_v9 = vld [vmem:[%s4874_s30 + $0x28] sm:$0xff]  ;;  %529 = vrot.lane.b32.xlu0 %v465_v7, %s4746_s8  ;;  %v4913_v10 = vld [vmem:[%s4874_s30 + $0x40] sm:$0xff] }
  0x15   : > { %309 = vst.msk [vmem:[#allocation2 + $0xd8] sm:$0xff] %vm280_vm0, %v4745_v0  ;;  %310 = vst.msk [vmem:[#allocation2 + $0xe0] sm:$0xff] %vm280_vm0, %v4745_v0  ;;  %v4919_v12 = vld [vmem:[%s4874_s30 + $0x50] sm:$0xff]  ;;  %v4928_v13 = vld [vmem:[%s4874_s30 + $0x48] sm:$0xff] }
  0x16   : > { %312 = vst.msk [vmem:[#allocation2 + $0xf0] sm:$0xff] %vm280_vm0, %v4745_v0  ;;  %313 = vst.msk [vmem:[#allocation2 + $0xf8] sm:$0xff] %vm280_vm0, %v4745_v0  ;;  %v4931_v14 = vld [vmem:[%s4874_s30 + $0x60] sm:$0xff]  ;;  %v4934_v15 = vld [vmem:[%s4874_s30 + $0x58] sm:$0xff] }
  0x17   : > { %315 = vst.msk [vmem:[#allocation2 + $0x108] sm:$0xff] %vm280_vm0, %v4745_v0  ;;  %316 = vst.msk [vmem:[#allocation2 + $0x110] sm:$0xff] %vm280_vm0, %v4745_v0  ;;  %v4943_v16 = vld [vmem:[%s4874_s30 + $0x70] sm:$0xff]  ;;  %v4946_v17 = vld [vmem:[%s4874_s30 + $0x68] sm:$0xff] }
  0x18   : > { %318 = vst.msk [vmem:[#allocation2 + $0x120] sm:$0xff] %vm280_vm0, %v4745_v0  ;;  %319 = vst.msk [vmem:[#allocation2 + $0x128] sm:$0xff] %vm280_vm0, %v4745_v0  ;;  %v4949_v18 = vld [vmem:[%s4874_s30 + $0x80] sm:$0xff]  ;;  %v4958_v19 = vld [vmem:[%s4874_s30 + $0x78] sm:$0xff] }
  0x19   : > { %321 = vst.msk [vmem:[#allocation2 + $0x138] sm:$0xff] %vm280_vm0, %v4745_v0  ;;  %322 = vst.msk [vmem:[#allocation2 + $0x140] sm:$0xff] %vm280_vm0, %v4745_v0  ;;  %v4961_v20 = vld [vmem:[%s4874_s30 + $0x90] sm:$0xff]  ;;  %v4964_v21 = vld [vmem:[%s4874_s30 + $0x88] sm:$0xff] }
  0x1a   : > { %324 = vst.msk [vmem:[#allocation2 + $0x150] sm:$0xff] %vm280_vm0, %v4745_v0  ;;  %325 = vst.msk [vmem:[#allocation2 + $0x158] sm:$0xff] %vm280_vm0, %v4745_v0  ;;  %v4974_v22 = vld [vmem:[%s4874_s30 + $0xa0] sm:$0xff]  ;;  %v4977_v23 = vld [vmem:[%s4874_s30 + $0x98] sm:$0xff] }
  0x1b   : > { %327 = vst.msk [vmem:[#allocation2 + $0x168] sm:$0xff] %vm280_vm0, %v4745_v0  ;;  %328 = vst.msk [vmem:[#allocation2 + $0x170] sm:$0xff] %vm280_vm0, %v4745_v0  ;;  %v4980_v24 = vld [vmem:[%s4874_s30 + $0xb0] sm:$0xff]  ;;  %v4997_v28 = vld [vmem:[%s4874_s30 + $0xa8] sm:$0xff] }
  0x1c   : > { %330 = vst.msk [vmem:[#allocation2 + $0x180] sm:$0xff] %vm280_vm0, %v4745_v0  ;;  %331 = vst.msk [vmem:[#allocation2 + $0x188] sm:$0xff] %vm280_vm0, %v4745_v0  ;;  %v5000_v29 = vld [vmem:[%s4874_s30 + $0xc0] sm:$0xff]  ;;  %v5019_v33 = vld [vmem:[%s4874_s30 + $0xb8] sm:$0xff] }
  0x1d   : > { %333 = vst.msk [vmem:[#allocation2 + $0x198] sm:$0xff] %vm280_vm0, %v4745_v0  ;;  %334 = vst.msk [vmem:[#allocation2 + $0x1a0] sm:$0xff] %vm280_vm0, %v4745_v0  ;;  %v5022_v34 = vld [vmem:[%s4874_s30 + $0xd0] sm:$0xff]  ;;  %v5025_v35 = vld [vmem:[%s4874_s30 + $0xc8] sm:$0xff] }
  0x1e   : > { %284 = vst.msk [vmem:[#allocation2 + $0x10] sm:$0x3] %vm283_vm1, %v4745_v0  ;;  %287 = vst.msk [vmem:[#allocation2 + $0x28] sm:$0x3] %vm283_vm1, %v4745_v0  ;;  %v5036_v36 = vld [vmem:[%s4874_s30 + $0xe0] sm:$0xff]  ;;  %v5039_v37 = vld [vmem:[%s4874_s30 + $0xd8] sm:$0xff] }
  0x1f   : > { %290 = vst.msk [vmem:[#allocation2 + $0x40] sm:$0x3] %vm283_vm1, %v4745_v0  ;;  %293 = vst.msk [vmem:[#allocation2 + $0x58] sm:$0x3] %vm283_vm1, %v4745_v0  ;;  %v5048_v39 = vld [vmem:[%s4874_s30 + $0xe8] sm:$0xff]  ;;  %v401_v45 = vld [vmem:[#allocation2] sm:$0xff] }
  0x20   : > { %296 = vst.msk [vmem:[#allocation2 + $0x70] sm:$0x3] %vm283_vm1, %v4745_v0  ;;  %299 = vst.msk [vmem:[#allocation2 + $0x88] sm:$0x3] %vm283_vm1, %v4745_v0  ;;  %v402_v47 = vld [vmem:[#allocation2 + $0x8] sm:$0xff] }
  0x21   : > { %302 = vst.msk [vmem:[#allocation2 + $0xa0] sm:$0x3] %vm283_vm1, %v4745_v0  ;;  %305 = vst.msk [vmem:[#allocation2 + $0xb8] sm:$0x3] %vm283_vm1, %v4745_v0 }
  0x22   : > { %308 = vst.msk [vmem:[#allocation2 + $0xd0] sm:$0x3] %vm283_vm1, %v4745_v0  ;;  %311 = vst.msk [vmem:[#allocation2 + $0xe8] sm:$0x3] %vm283_vm1, %v4745_v0 }
  0x23   : > { %314 = vst.msk [vmem:[#allocation2 + $0x100] sm:$0x3] %vm283_vm1, %v4745_v0  ;;  %317 = vst.msk [vmem:[#allocation2 + $0x118] sm:$0x3] %vm283_vm1, %v4745_v0 }
  0x24   : > { %320 = vst.msk [vmem:[#allocation2 + $0x130] sm:$0x3] %vm283_vm1, %v4745_v0  ;;  %323 = vst.msk [vmem:[#allocation2 + $0x148] sm:$0x3] %vm283_vm1, %v4745_v0 }
  0x25   : > { %326 = vst.msk [vmem:[#allocation2 + $0x160] sm:$0x3] %vm283_vm1, %v4745_v0  ;;  %329 = vst.msk [vmem:[#allocation2 + $0x178] sm:$0x3] %vm283_vm1, %v4745_v0  ;;  %v466_v8 = vld [vmem:[#allocation2 + $0x9] sm:$0xff] }
  0x26   : > { %332 = vst.msk [vmem:[#allocation2 + $0x190] sm:$0x3] %vm283_vm1, %v4745_v0  ;;  %335 = vst.msk [vmem:[#allocation2 + $0x1a8] sm:$0x3] %vm283_vm1, %v4745_v0  ;;  %531 = vrot.lane.b32.xlu0 %v466_v8, %s4746_s8 }
  0x27   : > { %7207 = vst [vmem:[#allocation4_spill] sm:$0xff] %v4877_v1  ;;  %7208 = vst [vmem:[#allocation5_spill] sm:$0xff] %v4880_v2 }
  0x28   : > { %7209 = vst [vmem:[#allocation6_spill] sm:$0xff] %v4883_v3  ;;  %369 = vst.msk [vmem:[#allocation2 + $0x19] sm:$0xff] %vm280_vm0, %v4877_v1 }
  0x29   : > { %371 = vst.msk [vmem:[#allocation2 + $0x31] sm:$0xff] %vm280_vm0, %v4880_v2  ;;  %370 = vst.msk [vmem:[#allocation2 + $0x21] sm:$0xff] %vm280_vm0, %v4883_v3 }
  0x2a   : > { %7210 = vst [vmem:[#allocation7_spill] sm:$0xff] %v4892_v4  ;;  %7211 = vst [vmem:[#allocation8_spill] sm:$0xff] %v4895_v5 }
  0x2b   : > { %7212 = vst [vmem:[#allocation9_spill] sm:$0xff] %v4898_v6  ;;  %373 = vst.msk [vmem:[#allocation2 + $0x49] sm:$0xff] %vm280_vm0, %v4892_v4 }
  0x2c   : > { %372 = vst.msk [vmem:[#allocation2 + $0x39] sm:$0xff] %vm280_vm0, %v4895_v5  ;;  %375 = vst.msk [vmem:[#allocation2 + $0x61] sm:$0xff] %vm280_vm0, %v4898_v6  ;;  %v5264_v6 = vld [vmem:[%s4874_s30 + $0xf8] sm:$0xff] }
  0x2d   : > { %7213 = vst [vmem:[#allocation10_spill] sm:$0xff] %v4907_v9  ;;  %374 = vst.msk [vmem:[#allocation2 + $0x51] sm:$0xff] %vm280_vm0, %v4907_v9  ;;  %v5251_v9 = vld [vmem:[%s4874_s30 + $0xf0] sm:$0xff] }
  0x2e   : > { %7214 = vst [vmem:[#allocation11_spill] sm:$0xff] %v4913_v10  ;;  %7215 = vst [vmem:[#allocation12_spill] sm:$0xff] %v4916_v11 }
  0x2f   : > { %7216 = vst [vmem:[#allocation13_spill] sm:$0xff] %v4919_v12  ;;  %377 = vst.msk [vmem:[#allocation2 + $0x79] sm:$0xff] %vm280_vm0, %v4913_v10  ;;  %v4982_v25 = vld [vmem:[#allocation2 + $0x19] sm:$0xff] }
  0x30   : > { %376 = vst.msk [vmem:[#allocation2 + $0x69] sm:$0xff] %vm280_vm0, %v4916_v11  ;;  %379 = vst.msk [vmem:[#allocation2 + $0x91] sm:$0xff] %vm280_vm0, %v4919_v12  ;;  %v4984_v26 = vld [vmem:[#allocation2 + $0x31] sm:$0xff]  ;;  %533 = vrot.lane.b32.xlu1 %v4982_v25, %s4746_s8  ;;  %v4994_v27 = vld [vmem:[#allocation2 + $0x21] sm:$0xff] }
  0x31   : > { %7217 = vst [vmem:[#allocation14_spill] sm:$0xff] %v4928_v13  ;;  %7218 = vst [vmem:[#allocation15_spill] sm:$0xff] %v4931_v14  ;;  %537 = vrot.lane.b32.xlu0 %v4984_v26, %s4746_s8  ;;  %v5077_v48 = vld [vmem:[#allocation2 + $0x18] sm:$0xff]  ;;  %v5084_v49 = vld [vmem:[#allocation2 + $0x30] sm:$0xff] }
  0x32   : > { %7219 = vst [vmem:[#allocation16_spill] sm:$0xff] %v4934_v15  ;;  %378 = vst.msk [vmem:[#allocation2 + $0x81] sm:$0xff] %vm280_vm0, %v4928_v13  ;;  %v5008_v30 = vld [vmem:[#allocation2 + $0x49] sm:$0xff]  ;;  %v5086_v50 = vld [vmem:[#allocation2 + $0x20] sm:$0xff] }
  0x33   : > { %381 = vst.msk [vmem:[#allocation2 + $0xa9] sm:$0xff] %vm280_vm0, %v4931_v14  ;;  %380 = vst.msk [vmem:[#allocation2 + $0x99] sm:$0xff] %vm280_vm0, %v4934_v15  ;;  %v5012_v31 = vld [vmem:[#allocation2 + $0x39] sm:$0xff]  ;;  %v5016_v32 = vld [vmem:[#allocation2 + $0x61] sm:$0xff] }
  0x34   : > { %7220 = vst [vmem:[#allocation17_spill] sm:$0xff] %v4943_v16  ;;  %7221 = vst [vmem:[#allocation18_spill] sm:$0xff] %v4946_v17  ;;  %535 = vrot.lane.b32.xlu1 %v4994_v27, %s4746_s8  ;;  %v5041_v38 = vld [vmem:[#allocation2 + $0x51] sm:$0xff]  ;;  %v5094_v52 = vld [vmem:[#allocation2 + $0x48] sm:$0xff] }
  0x35   : > { %7222 = vst [vmem:[#allocation19_spill] sm:$0xff] %v4949_v18  ;;  %383 = vst.msk [vmem:[#allocation2 + $0xc1] sm:$0xff] %vm280_vm0, %v4943_v16  ;;  %541 = vrot.lane.b32.xlu0 %v5008_v30, %s4746_s8  ;;  %v5102_v54 = vld [vmem:[#allocation2 + $0x38] sm:$0xff]  ;;  %v5104_v55 = vld [vmem:[#allocation2 + $0x60] sm:$0xff] }
  0x36   : > { %382 = vst.msk [vmem:[#allocation2 + $0xb1] sm:$0xff] %vm280_vm0, %v4946_v17  ;;  %385 = vst.msk [vmem:[#allocation2 + $0xd9] sm:$0xff] %vm280_vm0, %v4949_v18  ;;  %v5054_v40 = vld [vmem:[#allocation2 + $0x79] sm:$0xff]  ;;  %v5112_v57 = vld [vmem:[#allocation2 + $0x50] sm:$0xff] }
  0x37   : > { %7223 = vst [vmem:[#allocation20_spill] sm:$0xff] %v4958_v19  ;;  %7224 = vst [vmem:[#allocation21_spill] sm:$0xff] %v4961_v20  ;;  %v5058_v41 = vld [vmem:[#allocation2 + $0x69] sm:$0xff]  ;;  %v5062_v42 = vld [vmem:[#allocation2 + $0x91] sm:$0xff] }
  0x38   : > { %7225 = vst [vmem:[#allocation22_spill] sm:$0xff] %v4964_v21  ;;  %384 = vst.msk [vmem:[#allocation2 + $0xc9] sm:$0xff] %vm280_vm0, %v4958_v19  ;;  %539 = vrot.lane.b32.xlu1 %v5012_v31, %s4746_s8  ;;  %v5114_v58 = vld [vmem:[#allocation2 + $0x78] sm:$0xff]  ;;  %v5116_v59 = vld [vmem:[#allocation2 + $0x68] sm:$0xff] }
  0x39   : > { %387 = vst.msk [vmem:[#allocation2 + $0xf1] sm:$0xff] %vm280_vm0, %v4961_v20  ;;  %386 = vst.msk [vmem:[#allocation2 + $0xe1] sm:$0xff] %vm280_vm0, %v4964_v21  ;;  %545 = vrot.lane.b32.xlu0 %v5016_v32, %s4746_s8  ;;  %v5066_v43 = vld [vmem:[#allocation2 + $0x81] sm:$0xff]  ;;  %v5126_v60 = vld [vmem:[#allocation2 + $0x90] sm:$0xff] }
  0x3a   : > { %7226 = vst [vmem:[#allocation23_spill] sm:$0xff] %v4974_v22  ;;  %7227 = vst [vmem:[#allocation24_spill] sm:$0xff] %v4977_v23  ;;  %v5070_v44 = vld [vmem:[#allocation2 + $0xa9] sm:$0xff]  ;;  %v5074_v46 = vld [vmem:[#allocation2 + $0x99] sm:$0xff] }
  0x3b   : > { %7228 = vst [vmem:[#allocation25_spill] sm:$0xff] %v4980_v24  ;;  %389 = vst.msk [vmem:[#allocation2 + $0x109] sm:$0xff] %vm280_vm0, %v4974_v22  ;;  %v5128_v61 = vld [vmem:[#allocation2 + $0x80] sm:$0xff]  ;;  %v5130_v62 = vld [vmem:[#allocation2 + $0xa8] sm:$0xff] }
  0x3c   : > { %388 = vst.msk [vmem:[#allocation2 + $0xf9] sm:$0xff] %vm280_vm0, %v4977_v23  ;;  %391 = vst.msk [vmem:[#allocation2 + $0x121] sm:$0xff] %vm280_vm0, %v4980_v24  ;;  %543 = vrot.lane.b32.xlu1 %v5041_v38, %s4746_s8  ;;  %v5088_v51 = vld [vmem:[#allocation2 + $0xc1] sm:$0xff]  ;;  %v5140_v0 = vld [vmem:[#allocation2 + $0x98] sm:$0xff] }
  0x3d   : > { %7229 = vst [vmem:[#allocation26_spill] sm:$0xff] %v4997_v28  ;;  %7230 = vst [vmem:[#allocation27_spill] sm:$0xff] %v5000_v29  ;;  %549 = vrot.lane.b32.xlu0 %v5054_v40, %s4746_s8  ;;  %v5098_v53 = vld [vmem:[#allocation2 + $0xb1] sm:$0xff]  ;;  %v5106_v56 = vld [vmem:[#allocation2 + $0xd9] sm:$0xff] }
  0x3e   : > { %390 = vst.msk [vmem:[#allocation2 + $0x111] sm:$0xff] %vm280_vm0, %v4997_v28  ;;  %393 = vst.msk [vmem:[#allocation2 + $0x139] sm:$0xff] %vm280_vm0, %v5000_v29  ;;  %v5142_v7 = vld [vmem:[#allocation2 + $0xc0] sm:$0xff]  ;;  %v5144_v8 = vld [vmem:[#allocation2 + $0xb0] sm:$0xff] }
  0x3f   : > { %7231 = vst [vmem:[#allocation28_spill] sm:$0xff] %v5019_v33  ;;  %7232 = vst [vmem:[#allocation29_spill] sm:$0xff] %v5022_v34  ;;  %v5132_v63 = vld [vmem:[#allocation2 + $0xc9] sm:$0xff]  ;;  %v5279_v1 = vld [vmem:[#allocation2 + $0x1a] sm:$0xff] }
  0x40   : > { %7233 = vst [vmem:[#allocation30_spill] sm:$0xff] %v5025_v35  ;;  %392 = vst.msk [vmem:[#allocation2 + $0x129] sm:$0xff] %vm280_vm0, %v5019_v33  ;;  %547 = vrot.lane.b32.xlu1 %v5058_v41, %s4746_s8  ;;  %v5184_v28 = vld [vmem:[#allocation2 + $0xf1] sm:$0xff]  ;;  %v5194_v22 = vld [vmem:[#allocation2 + $0xe1] sm:$0xff] }
  0x41   : > { %395 = vst.msk [vmem:[#allocation2 + $0x151] sm:$0xff] %vm280_vm0, %v5022_v34  ;;  %394 = vst.msk [vmem:[#allocation2 + $0x141] sm:$0xff] %vm280_vm0, %v5025_v35  ;;  %553 = vrot.lane.b32.xlu0 %v5062_v42, %s4746_s8  ;;  %v5285_v2 = vld [vmem:[#allocation2 + $0x32] sm:$0xff] }
  0x42   : > { %7234 = vst [vmem:[#allocation31_spill] sm:$0xff] %v5036_v36  ;;  %7235 = vst [vmem:[#allocation32_spill] sm:$0xff] %v5039_v37  ;;  %v5168_v35 = vld [vmem:[#allocation2 + $0x108] sm:$0xff] }
  0x43   : > { %397 = vst.msk [vmem:[#allocation2 + $0x169] sm:$0xff] %vm280_vm0, %v5036_v36  ;;  %396 = vst.msk [vmem:[#allocation2 + $0x159] sm:$0xff] %vm280_vm0, %v5039_v37  ;;  %v5166_v36 = vld [vmem:[#allocation2 + $0xe0] sm:$0xff]  ;;  %v5170_v37 = vld [vmem:[#allocation2 + $0xf8] sm:$0xff] }
  0x44   : > { %7236 = vst [vmem:[#allocation33_spill] sm:$0xff] %v5048_v39  ;;  %398 = vst.msk [vmem:[#allocation2 + $0x171] sm:$0xff] %vm280_vm0, %v5048_v39  ;;  %551 = vrot.lane.b32.xlu1 %v5066_v43, %s4746_s8  ;;  %v5158_v39 = vld [vmem:[#allocation2 + $0xf0] sm:$0xff]  ;;  %v5180_v29 = vld [vmem:[#allocation2 + $0x120] sm:$0xff] }
  0x45   : > { %433 = vst.msk [vmem:[#allocation3] sm:$0xff] %vm280_vm0, %v401_v45  ;;  %557 = vrot.lane.b32.xlu0 %v5070_v44, %s4746_s8  ;;  %434 = vst.msk [vmem:[#allocation3 + $0x8] sm:$0xff] %vm280_vm0, %v402_v47  ;;  %v5154_v45 = vld [vmem:[#allocation2 + $0xd8] sm:$0xff]  ;;  %v5156_v47 = vld [vmem:[#allocation2 + $0xc8] sm:$0xff] }
  0x46   : > { %435 = vst.msk [vmem:[#allocation3 + $0x10] sm:$0xff] %vm280_vm0, %v5077_v48  ;;  %437 = vst.msk [vmem:[#allocation3 + $0x20] sm:$0xff] %vm280_vm0, %v5084_v49  ;;  %v5182_v34 = vld [vmem:[#allocation2 + $0x110] sm:$0xff]  ;;  %v5192_v33 = vld [vmem:[#allocation2 + $0x138] sm:$0xff] }
  0x47   : > { %436 = vst.msk [vmem:[#allocation3 + $0x18] sm:$0xff] %vm280_vm0, %v5086_v50  ;;  %439 = vst.msk [vmem:[#allocation3 + $0x30] sm:$0xff] %vm280_vm0, %v5094_v52  ;;  %v5198_v24 = vld [vmem:[#allocation2 + $0x128] sm:$0xff]  ;;  %v5210_v18 = vld [vmem:[#allocation2 + $0xf9] sm:$0xff] }
  0x48   : > { %555 = vrot.lane.b32.xlu1 %v5074_v46, %s4746_s8  ;;  %438 = vst.msk [vmem:[#allocation3 + $0x28] sm:$0xff] %vm280_vm0, %v5102_v54  ;;  %441 = vst.msk [vmem:[#allocation3 + $0x40] sm:$0xff] %vm280_vm0, %v5104_v55  ;;  %v5204_v21 = vld [vmem:[#allocation2 + $0x109] sm:$0xff]  ;;  %v5214_v20 = vld [vmem:[#allocation2 + $0x140] sm:$0xff] }
  0x49   : > { %561 = vrot.lane.b32.xlu0 %v5088_v51, %s4746_s8  ;;  %440 = vst.msk [vmem:[#allocation3 + $0x38] sm:$0xff] %vm280_vm0, %v5112_v57  ;;  %443 = vst.msk [vmem:[#allocation3 + $0x50] sm:$0xff] %vm280_vm0, %v5114_v58  ;;  %v5208_v23 = vld [vmem:[#allocation2 + $0x150] sm:$0xff]  ;;  %v5220_v17 = vld [vmem:[#allocation2 + $0x121] sm:$0xff] }
  0x4a   : > { %442 = vst.msk [vmem:[#allocation3 + $0x48] sm:$0xff] %vm280_vm0, %v5116_v59  ;;  %445 = vst.msk [vmem:[#allocation3 + $0x60] sm:$0xff] %vm280_vm0, %v5126_v60  ;;  %v5224_v19 = vld [vmem:[#allocation2 + $0x168] sm:$0xff]  ;;  %v5226_v14 = vld [vmem:[#allocation2 + $0x111] sm:$0xff] }
  0x4b   : > { %444 = vst.msk [vmem:[#allocation3 + $0x58] sm:$0xff] %vm280_vm0, %v5128_v61  ;;  %447 = vst.msk [vmem:[#allocation3 + $0x70] sm:$0xff] %vm280_vm0, %v5130_v62  ;;  %v5230_v16 = vld [vmem:[#allocation2 + $0x158] sm:$0xff]  ;;  %v5240_v15 = vld [vmem:[#allocation2 + $0x129] sm:$0xff] }
  0x4c   : > { %559 = vrot.lane.b32.xlu1 %v5098_v53, %s4746_s8  ;;  %446 = vst.msk [vmem:[#allocation3 + $0x68] sm:$0xff] %vm280_vm0, %v5140_v0  ;;  %449 = vst.msk [vmem:[#allocation3 + $0x80] sm:$0xff] %vm280_vm0, %v5142_v7  ;;  %v5236_v13 = vld [vmem:[#allocation2 + $0x139] sm:$0xff]  ;;  %v5242_v10 = vld [vmem:[#allocation2 + $0x170] sm:$0xff] }
  0x4d   : > { %448 = vst.msk [vmem:[#allocation3 + $0x78] sm:$0xff] %vm280_vm0, %v5144_v8  ;;  %451 = vst.msk [vmem:[#allocation3 + $0x90] sm:$0xff] %vm280_vm0, %v5154_v45  ;;  %565 = vrot.lane.b32.xlu0 %v5106_v56, %s4746_s8  ;;  %v5248_v12 = vld [vmem:[#allocation2 + $0x151] sm:$0xff]  ;;  %v5257_v11 = vld [vmem:[#allocation2 + $0x141] sm:$0xff] }
  0x4e   : > { %450 = vst.msk [vmem:[#allocation3 + $0x88] sm:$0xff] %vm280_vm0, %v5156_v47  ;;  %453 = vst.msk [vmem:[#allocation3 + $0xa0] sm:$0xff] %vm280_vm0, %v5158_v39  ;;  %v5261_v4 = vld [vmem:[#allocation2 + $0x169] sm:$0xff]  ;;  %v5270_v3 = vld [vmem:[#allocation2 + $0x159] sm:$0xff] }
  0x4f   : > { %452 = vst.msk [vmem:[#allocation3 + $0x98] sm:$0xff] %vm280_vm0, %v5166_v36  ;;  %455 = vst.msk [vmem:[#allocation3 + $0xb0] sm:$0xff] %vm280_vm0, %v5168_v35  ;;  %v5276_v5 = vld [vmem:[#allocation2 + $0x171] sm:$0xff] }
  0x50   : > { %454 = vst.msk [vmem:[#allocation3 + $0xa8] sm:$0xff] %vm280_vm0, %v5170_v37  ;;  %457 = vst.msk [vmem:[#allocation3 + $0xc0] sm:$0xff] %vm280_vm0, %v5180_v29  ;;  %563 = vrot.lane.b32.xlu1 %v5132_v63, %s4746_s8 }
  0x51   : > { %456 = vst.msk [vmem:[#allocation3 + $0xb8] sm:$0xff] %vm280_vm0, %v5182_v34  ;;  %459 = vst.msk [vmem:[#allocation3 + $0xd0] sm:$0xff] %vm280_vm0, %v5192_v33  ;;  %569 = vrot.lane.b32.xlu0 %v5184_v28, %s4746_s8 }
  0x52   : > { %458 = vst.msk [vmem:[#allocation3 + $0xc8] sm:$0xff] %vm280_vm0, %v5198_v24  ;;  %461 = vst.msk [vmem:[#allocation3 + $0xe0] sm:$0xff] %vm280_vm0, %v5208_v23 }
  0x53   : > { %460 = vst.msk [vmem:[#allocation3 + $0xd8] sm:$0xff] %vm280_vm0, %v5214_v20  ;;  %463 = vst.msk [vmem:[#allocation3 + $0xf0] sm:$0xff] %vm280_vm0, %v5224_v19 }
  0x54   : > { %567 = vrot.lane.b32.xlu1 %v5194_v22, %s4746_s8  ;;  %462 = vst.msk [vmem:[#allocation3 + $0xe8] sm:$0xff] %vm280_vm0, %v5230_v16  ;;  %464 = vst.msk [vmem:[#allocation3 + $0xf8] sm:$0xff] %vm280_vm0, %v5242_v10 }
  0x55   : > { %573 = vrot.lane.b32.xlu0 %v5204_v21, %s4746_s8  ;;  %7237 = vst [vmem:[#allocation34_spill] sm:$0xff] %v5251_v9  ;;  %399 = vst.msk [vmem:[#allocation2 + $0x181] sm:$0xff] %vm280_vm0, %v5251_v9  ;;  %v658_v9 = vld [vmem:[#allocation2 + $0x2] sm:$0xff] }
  0x56   : > { %7238 = vst [vmem:[#allocation35_spill] sm:$0xff] %v5257_v11  ;;  %7239 = vst [vmem:[#allocation36_spill] sm:$0xff] %v5261_v4 }
  0x57   : > { %7240 = vst [vmem:[#allocation37_spill] sm:$0xff] %v5264_v6  ;;  %400 = vst.msk [vmem:[#allocation2 + $0x189] sm:$0xff] %vm280_vm0, %v5264_v6  ;;  %v659_v6 = vld [vmem:[#allocation2 + $0xa] sm:$0xff] }
  0x58   : > { %571 = vrot.lane.b32.xlu1 %v5210_v18, %s4746_s8  ;;  %7241 = vst [vmem:[#allocation38_spill] sm:$0xff] %v5270_v3  ;;  %7242 = vst [vmem:[#allocation39_spill] sm:$0xff] %v5276_v5 }
  0x59   : > { %577 = vrot.lane.b32.xlu0 %v5220_v17, %s4746_s8  ;;  %7243 = vst [vmem:[#allocation40_spill] sm:$0xff] %v5279_v1  ;;  %7244 = vst [vmem:[#allocation41_spill] sm:$0xff] %v5285_v2 }
  0x5c   : > { %575 = vrot.lane.b32.xlu1 %v5226_v14, %s4746_s8 }
  0x5d   : > { %581 = vrot.lane.b32.xlu0 %v5236_v13, %s4746_s8 }
  0x60   : > { %579 = vrot.lane.b32.xlu1 %v5240_v15, %s4746_s8 }
  0x61   : > { %585 = vrot.lane.b32.xlu0 %v5248_v12, %s4746_s8 }
  0x64   : > { %583 = vrot.lane.b32.xlu1 %v5257_v11, %s4746_s8 }
  0x65   : > { %589 = vrot.lane.b32.xlu0 %v5261_v4, %s4746_s8  ;;  %v5288_v4 = vld [vmem:[#allocation2 + $0x22] sm:$0xff] }
  0x66   : > { %7245 = vst [vmem:[#allocation42_spill] sm:$0xff] %v5288_v4 }
  0x68   : > { %587 = vrot.lane.b32.xlu1 %v5270_v3, %s4746_s8  ;;  %v5292_v3 = vld [vmem:[#allocation2 + $0x4a] sm:$0xff] }
  0x69   : > { %722 = vrot.lane.b32.xlu0 %v658_v9, %s4747_s9  ;;  %7246 = vst [vmem:[#allocation43_spill] sm:$0xff] %v5292_v3  ;;  %v5296_v9 = vld [vmem:[#allocation2 + $0x3a] sm:$0xff] }
  0x6a   : > { %7247 = vst [vmem:[#allocation44_spill] sm:$0xff] %v5296_v9 }
  0x6c   : > { %591 = vrot.lane.b32.xlu1 %v5276_v5, %s4746_s8  ;;  %v5386_v5 = vld [vmem:[#allocation2 + $0x142] sm:$0xff] }
  0x6d   : > { %726 = vrot.lane.b32.xlu0 %v5279_v1, %s4747_s9  ;;  %v5300_v1 = vld [vmem:[#allocation2 + $0x62] sm:$0xff]  ;;  %7268 = vst [vmem:[#allocation65_spill] sm:$0xff] %v5386_v5 }
  0x6e   : > { %7248 = vst [vmem:[#allocation45_spill] sm:$0xff] %v5300_v1 }
  0x70   : > { %724 = vrot.lane.b32.xlu1 %v659_v6, %s4747_s9  ;;  %v5304_v6 = vld [vmem:[#allocation2 + $0x52] sm:$0xff] }
  0x71   : > { %730 = vrot.lane.b32.xlu0 %v5285_v2, %s4747_s9  ;;  %7249 = vst [vmem:[#allocation46_spill] sm:$0xff] %v5304_v6  ;;  %v5308_v2 = vld [vmem:[#allocation2 + $0x7a] sm:$0xff] }
  0x72   : > { %7250 = vst [vmem:[#allocation47_spill] sm:$0xff] %v5308_v2 }
  0x74   : > { %728 = vrot.lane.b32.xlu1 %v5288_v4, %s4747_s9  ;;  %v5312_v4 = vld [vmem:[#allocation2 + $0x6a] sm:$0xff] }
  0x75   : > { %734 = vrot.lane.b32.xlu0 %v5292_v3, %s4747_s9  ;;  %7251 = vst [vmem:[#allocation48_spill] sm:$0xff] %v5312_v4  ;;  %v5316_v3 = vld [vmem:[#allocation2 + $0x92] sm:$0xff] }
  0x76   : > { %7252 = vst [vmem:[#allocation49_spill] sm:$0xff] %v5316_v3 }
  0x78   : > { %732 = vrot.lane.b32.xlu1 %v5296_v9, %s4747_s9  ;;  %v5320_v9 = vld [vmem:[#allocation2 + $0x82] sm:$0xff] }
  0x79   : > { %738 = vrot.lane.b32.xlu0 %v5300_v1, %s4747_s9  ;;  %7253 = vst [vmem:[#allocation50_spill] sm:$0xff] %v5320_v9  ;;  %v5324_v1 = vld [vmem:[#allocation2 + $0xaa] sm:$0xff] }
  0x7a   : > { %7254 = vst [vmem:[#allocation51_spill] sm:$0xff] %v5324_v1 }
  0x7c   : > { %736 = vrot.lane.b32.xlu1 %v5304_v6, %s4747_s9  ;;  %v5328_v6 = vld [vmem:[#allocation2 + $0x9a] sm:$0xff] }
  0x7d   : > { %742 = vrot.lane.b32.xlu0 %v5308_v2, %s4747_s9  ;;  %7255 = vst [vmem:[#allocation52_spill] sm:$0xff] %v5328_v6  ;;  %v5332_v2 = vld [vmem:[#allocation2 + $0xc2] sm:$0xff] }
  0x7e   : > { %7256 = vst [vmem:[#allocation53_spill] sm:$0xff] %v5332_v2 }
  0x80   : > { %740 = vrot.lane.b32.xlu1 %v5312_v4, %s4747_s9  ;;  %v5336_v4 = vld [vmem:[#allocation2 + $0xb2] sm:$0xff] }
  0x81   : > { %746 = vrot.lane.b32.xlu0 %v5316_v3, %s4747_s9  ;;  %7257 = vst [vmem:[#allocation54_spill] sm:$0xff] %v5336_v4  ;;  %v5340_v3 = vld [vmem:[#allocation2 + $0xda] sm:$0xff] }
  0x82   : > { %7258 = vst [vmem:[#allocation55_spill] sm:$0xff] %v5340_v3 }
  0x84   : > { %744 = vrot.lane.b32.xlu1 %v5320_v9, %s4747_s9  ;;  %v5344_v9 = vld [vmem:[#allocation2 + $0xca] sm:$0xff] }
  0x85   : > { %750 = vrot.lane.b32.xlu0 %v5324_v1, %s4747_s9  ;;  %7259 = vst [vmem:[#allocation56_spill] sm:$0xff] %v5344_v9  ;;  %v5348_v1 = vld [vmem:[#allocation2 + $0xf2] sm:$0xff] }
  0x86   : > { %7260 = vst [vmem:[#allocation57_spill] sm:$0xff] %v5348_v1 }
  0x88   : > { %748 = vrot.lane.b32.xlu1 %v5328_v6, %s4747_s9  ;;  %v5352_v6 = vld [vmem:[#allocation2 + $0xe2] sm:$0xff] }
  0x89   : > { %754 = vrot.lane.b32.xlu0 %v5332_v2, %s4747_s9  ;;  %7261 = vst [vmem:[#allocation58_spill] sm:$0xff] %v5352_v6  ;;  %v5356_v2 = vld [vmem:[#allocation2 + $0x10a] sm:$0xff] }
  0x8a   : > { %7262 = vst [vmem:[#allocation59_spill] sm:$0xff] %v5356_v2 }
  0x8c   : > { %752 = vrot.lane.b32.xlu1 %v5336_v4, %s4747_s9  ;;  %v5360_v4 = vld [vmem:[#allocation2 + $0xfa] sm:$0xff] }
  0x8d   : > { %758 = vrot.lane.b32.xlu0 %v5340_v3, %s4747_s9  ;;  %7263 = vst [vmem:[#allocation60_spill] sm:$0xff] %v5360_v4  ;;  %v5364_v3 = vld [vmem:[#allocation2 + $0x122] sm:$0xff] }
  0x8e   : > { %7264 = vst [vmem:[#allocation61_spill] sm:$0xff] %v5364_v3 }
  0x90   : > { %756 = vrot.lane.b32.xlu1 %v5344_v9, %s4747_s9  ;;  %v5368_v9 = vld [vmem:[#allocation2 + $0x112] sm:$0xff] }
  0x91   : > { %762 = vrot.lane.b32.xlu0 %v5348_v1, %s4747_s9  ;;  %7265 = vst [vmem:[#allocation62_spill] sm:$0xff] %v5368_v9  ;;  %v5372_v1 = vld [vmem:[#allocation2 + $0x13a] sm:$0xff] }
  0x92   : > { %7266 = vst [vmem:[#allocation63_spill] sm:$0xff] %v5372_v1 }
  0x94   : > { %760 = vrot.lane.b32.xlu1 %v5352_v6, %s4747_s9  ;;  %v530_v6 = vpop.permute.xlu0 %529 }
  0x95   : > { %766 = vrot.lane.b32.xlu0 %v5356_v2, %s4747_s9  ;;  %626 = vst.msk [vmem:[#allocation3] sm:$0xff] %vm625_vm2, %v530_v6  ;;  %v5377_v2 = vld [vmem:[#allocation2 + $0x12a] sm:$0xff] }
  0x96   : > { %7267 = vst [vmem:[#allocation64_spill] sm:$0xff] %v5377_v2  ;;  %v5391_v6 = vld [vmem:[#allocation2 + $0x16a] sm:$0xff] }
  0x98   : > { %764 = vrot.lane.b32.xlu1 %v5360_v4, %s4747_s9  ;;  %v5381_v4 = vld [vmem:[#allocation2 + $0x152] sm:$0xff] }
  0x99   : > { %770 = vrot.lane.b32.xlu0 %v5364_v3, %s4747_s9  ;;  %v532_v3 = vpop.permute.xlu0 %531 }
  0x9a   : > { %627 = vst.msk [vmem:[#allocation3 + $0x8] sm:$0xff] %vm625_vm2, %v532_v3 }
  0x9c   : > { %768 = vrot.lane.b32.xlu1 %v5368_v9, %s4747_s9 }
  0x9d   : > { %774 = vrot.lane.b32.xlu0 %v5372_v1, %s4747_s9 }
  0xa0   : > { %772 = vrot.lane.b32.xlu1 %v5377_v2, %s4747_s9  ;;  %v5396_v2 = vld [vmem:[#allocation2 + $0x15a] sm:$0xff] }
  0xa1   : > { %778 = vrot.lane.b32.xlu0 %v5381_v4, %s4747_s9 }
  0xa2   : > { %v534_v11 = vpop.permute.xlu1 %533 }
  0xa3   : > { %628 = vst.msk [vmem:[#allocation3 + $0x10] sm:$0xff] %vm625_vm2, %v534_v11  ;;  %v538_v1 = vpop.permute.xlu0 %537  ;;  %v5404_v11 = vld [vmem:[#allocation2 + $0x172] sm:$0xff] }
  0xa4   : > { %776 = vrot.lane.b32.xlu1 %v5386_v5, %s4747_s9  ;;  %630 = vst.msk [vmem:[#allocation3 + $0x20] sm:$0xff] %vm625_vm2, %v538_v1 }
  0xa5   : > { %782 = vrot.lane.b32.xlu0 %v5391_v6, %s4747_s9 }
  0xa6   : > { %v536_v9 = vpop.permute.xlu1 %535 }
  0xa7   : > { %629 = vst.msk [vmem:[#allocation3 + $0x18] sm:$0xff] %vm625_vm2, %v536_v9  ;;  %v542_v3 = vpop.permute.xlu0 %541 }
  0xa8   : > { %780 = vrot.lane.b32.xlu1 %v5396_v2, %s4747_s9  ;;  %632 = vst.msk [vmem:[#allocation3 + $0x30] sm:$0xff] %vm625_vm2, %v542_v3 }
  0xa9   : > { %915 = vrot.lane.b32.xlu0 %v5077_v48, %s4748_s10 }
  0xaa   : > { %v540_v5 = vpop.permute.xlu1 %539 }
  0xab   : > { %631 = vst.msk [vmem:[#allocation3 + $0x28] sm:$0xff] %vm625_vm2, %v540_v5  ;;  %v546_v1 = vpop.permute.xlu0 %545 }
  0xac   : > { %784 = vrot.lane.b32.xlu1 %v5404_v11, %s4747_s9  ;;  %634 = vst.msk [vmem:[#allocation3 + $0x40] sm:$0xff] %vm625_vm2, %v546_v1 }
  0xad   : > { %919 = vrot.lane.b32.xlu0 %v5084_v49, %s4748_s10 }
  0xae   : > { %v544_v9 = vpop.permute.xlu1 %543 }
  0xaf   : > { %633 = vst.msk [vmem:[#allocation3 + $0x38] sm:$0xff] %vm625_vm2, %v544_v9  ;;  %v550_v3 = vpop.permute.xlu0 %549 }
  0xb0   : > { %917 = vrot.lane.b32.xlu1 %v5086_v50, %s4748_s10  ;;  %636 = vst.msk [vmem:[#allocation3 + $0x50] sm:$0xff] %vm625_vm2, %v550_v3 }
  0xb1   : > { %923 = vrot.lane.b32.xlu0 %v5094_v52, %s4748_s10 }
  0xb2   : > { %v548_v48 = vpop.permute.xlu1 %547 }
  0xb3   : > { %635 = vst.msk [vmem:[#allocation3 + $0x48] sm:$0xff] %vm625_vm2, %v548_v48  ;;  %v554_v5 = vpop.permute.xlu0 %553 }
  0xb4   : > { %921 = vrot.lane.b32.xlu1 %v5102_v54, %s4748_s10  ;;  %638 = vst.msk [vmem:[#allocation3 + $0x60] sm:$0xff] %vm625_vm2, %v554_v5 }
  0xb5   : > { %927 = vrot.lane.b32.xlu0 %v5104_v55, %s4748_s10 }
  0xb6   : > { %v552_v1 = vpop.permute.xlu1 %551 }
  0xb7   : > { %637 = vst.msk [vmem:[#allocation3 + $0x58] sm:$0xff] %vm625_vm2, %v552_v1  ;;  %v558_v50 = vpop.permute.xlu0 %557 }
  0xb8   : > { %925 = vrot.lane.b32.xlu1 %v5112_v57, %s4748_s10  ;;  %640 = vst.msk [vmem:[#allocation3 + $0x70] sm:$0xff] %vm625_vm2, %v558_v50 }
  0xb9   : > { %931 = vrot.lane.b32.xlu0 %v5114_v58, %s4748_s10 }
  0xba   : > { %v556_v9 = vpop.permute.xlu1 %555 }
  0xbb   : > { %639 = vst.msk [vmem:[#allocation3 + $0x68] sm:$0xff] %vm625_vm2, %v556_v9  ;;  %v562_v3 = vpop.permute.xlu0 %561 }
  0xbc   : > { %929 = vrot.lane.b32.xlu1 %v5116_v59, %s4748_s10  ;;  %642 = vst.msk [vmem:[#allocation3 + $0x80] sm:$0xff] %vm625_vm2, %v562_v3 }
  0xbd   : > { %935 = vrot.lane.b32.xlu0 %v5126_v60, %s4748_s10 }
  0xbe   : > { %v560_v48 = vpop.permute.xlu1 %559 }
  0xbf   : > { %641 = vst.msk [vmem:[#allocation3 + $0x78] sm:$0xff] %vm625_vm2, %v560_v48  ;;  %v566_v5 = vpop.permute.xlu0 %565 }
  0xc0   : > { %933 = vrot.lane.b32.xlu1 %v5128_v61, %s4748_s10  ;;  %644 = vst.msk [vmem:[#allocation3 + $0x90] sm:$0xff] %vm625_vm2, %v566_v5 }
  0xc1   : > { %939 = vrot.lane.b32.xlu0 %v5130_v62, %s4748_s10 }
  0xc2   : > { %v564_v1 = vpop.permute.xlu1 %563 }
  0xc3   : > { %643 = vst.msk [vmem:[#allocation3 + $0x88] sm:$0xff] %vm625_vm2, %v564_v1  ;;  %v570_v50 = vpop.permute.xlu0 %569 }
  0xc4   : > { %937 = vrot.lane.b32.xlu1 %v5140_v0, %s4748_s10  ;;  %646 = vst.msk [vmem:[#allocation3 + $0xa0] sm:$0xff] %vm625_vm2, %v570_v50 }
  0xc5   : > { %943 = vrot.lane.b32.xlu0 %v5142_v7, %s4748_s10 }
  0xc6   : > { %v568_v9 = vpop.permute.xlu1 %567 }
  0xc7   : > { %645 = vst.msk [vmem:[#allocation3 + $0x98] sm:$0xff] %vm625_vm2, %v568_v9  ;;  %v574_v3 = vpop.permute.xlu0 %573 }
  0xc8   : > { %941 = vrot.lane.b32.xlu1 %v5144_v8, %s4748_s10  ;;  %648 = vst.msk [vmem:[#allocation3 + $0xb0] sm:$0xff] %vm625_vm2, %v574_v3 }
  0xc9   : > { %947 = vrot.lane.b32.xlu0 %v5154_v45, %s4748_s10 }
  0xca   : > { %v572_v48 = vpop.permute.xlu1 %571 }
  0xcb   : > { %647 = vst.msk [vmem:[#allocation3 + $0xa8] sm:$0xff] %vm625_vm2, %v572_v48  ;;  %v578_v5 = vpop.permute.xlu0 %577 }
  0xcc   : > { %945 = vrot.lane.b32.xlu1 %v5156_v47, %s4748_s10  ;;  %650 = vst.msk [vmem:[#allocation3 + $0xc0] sm:$0xff] %vm625_vm2, %v578_v5 }
  0xcd   : > { %951 = vrot.lane.b32.xlu0 %v5158_v39, %s4748_s10 }
  0xce   : > { %v576_v1 = vpop.permute.xlu1 %575 }
  0xcf   : > { %649 = vst.msk [vmem:[#allocation3 + $0xb8] sm:$0xff] %vm625_vm2, %v576_v1  ;;  %v582_v50 = vpop.permute.xlu0 %581 }
  0xd0   : > { %949 = vrot.lane.b32.xlu1 %v5166_v36, %s4748_s10  ;;  %652 = vst.msk [vmem:[#allocation3 + $0xd0] sm:$0xff] %vm625_vm2, %v582_v50 }
  0xd1   : > { %955 = vrot.lane.b32.xlu0 %v5168_v35, %s4748_s10 }
  0xd2   : > { %v580_v9 = vpop.permute.xlu1 %579 }
  0xd3   : > { %651 = vst.msk [vmem:[#allocation3 + $0xc8] sm:$0xff] %vm625_vm2, %v580_v9  ;;  %v586_v3 = vpop.permute.xlu0 %585 }
  0xd4   : > { %953 = vrot.lane.b32.xlu1 %v5170_v37, %s4748_s10  ;;  %654 = vst.msk [vmem:[#allocation3 + $0xe0] sm:$0xff] %vm625_vm2, %v586_v3 }
  0xd5   : > { %959 = vrot.lane.b32.xlu0 %v5180_v29, %s4748_s10 }
  0xd6   : > { %v584_v48 = vpop.permute.xlu1 %583 }
  0xd7   : > { %653 = vst.msk [vmem:[#allocation3 + $0xd8] sm:$0xff] %vm625_vm2, %v584_v48  ;;  %v590_v5 = vpop.permute.xlu0 %589 }
  0xd8   : > { %957 = vrot.lane.b32.xlu1 %v5182_v34, %s4748_s10  ;;  %656 = vst.msk [vmem:[#allocation3 + $0xf0] sm:$0xff] %vm625_vm2, %v590_v5  ;;  %v5493_v5 = vld [vmem:[#allocation2 + $0x180] sm:$0xff] }
  0xd9   : > { %963 = vrot.lane.b32.xlu0 %v5192_v33, %s4748_s10 }
  0xda   : > { %v588_v1 = vpop.permute.xlu1 %587 }
  0xdb   : > { %655 = vst.msk [vmem:[#allocation3 + $0xe8] sm:$0xff] %vm625_vm2, %v588_v1  ;;  %v723_v50 = vpop.permute.xlu0 %722 }
  0xdc   : > { %961 = vrot.lane.b32.xlu1 %v5198_v24, %s4748_s10  ;;  %819 = vst.msk [vmem:[#allocation3] sm:$0xff] %vm818_vm3, %v723_v50 }
  0xdd   : > { %967 = vrot.lane.b32.xlu0 %v5208_v23, %s4748_s10 }
  0xde   : > { %v592_v9 = vpop.permute.xlu1 %591 }
  0xdf   : > { %657 = vst.msk [vmem:[#allocation3 + $0xf8] sm:$0xff] %vm625_vm2, %v592_v9  ;;  %v727_v3 = vpop.permute.xlu0 %726 }
  0xe0   : > { %965 = vrot.lane.b32.xlu1 %v5214_v20, %s4748_s10  ;;  %821 = vst.msk [vmem:[#allocation3 + $0x10] sm:$0xff] %vm818_vm3, %v727_v3  ;;  %v5504_v3 = vld [vmem:[#allocation2 + $0x188] sm:$0xff] }
  0xe1   : > { %971 = vrot.lane.b32.xlu0 %v5224_v19, %s4748_s10 }
  0xe2   : > { %v725_v48 = vpop.permute.xlu1 %724 }
  0xe3   : > { %820 = vst.msk [vmem:[#allocation3 + $0x8] sm:$0xff] %vm818_vm3, %v725_v48  ;;  %v731_v1 = vpop.permute.xlu0 %730 }
  0xe4   : > { %969 = vrot.lane.b32.xlu1 %v5230_v16, %s4748_s10  ;;  %823 = vst.msk [vmem:[#allocation3 + $0x20] sm:$0xff] %vm818_vm3, %v731_v1 }
  0xe5   : > { %975 = vrot.lane.b32.xlu0 %v5493_v5, %s4748_s10 }
  0xe6   : > { %v729_v50 = vpop.permute.xlu1 %728 }
  0xe7   : > { %822 = vst.msk [vmem:[#allocation3 + $0x18] sm:$0xff] %vm818_vm3, %v729_v50  ;;  %v735_v9 = vpop.permute.xlu0 %734 }
  0xe8   : > { %973 = vrot.lane.b32.xlu1 %v5242_v10, %s4748_s10  ;;  %825 = vst.msk [vmem:[#allocation3 + $0x30] sm:$0xff] %vm818_vm3, %v735_v9 }
  0xe9   : > { %1108 = vrot.lane.b32.xlu0 %v4982_v25, %s4749_s11 }
  0xea   : > { %v733_v48 = vpop.permute.xlu1 %732 }
  0xeb   : > { %824 = vst.msk [vmem:[#allocation3 + $0x28] sm:$0xff] %vm818_vm3, %v733_v48  ;;  %v739_v1 = vpop.permute.xlu0 %738 }
  0xec   : > { %977 = vrot.lane.b32.xlu1 %v5504_v3, %s4748_s10  ;;  %827 = vst.msk [vmem:[#allocation3 + $0x40] sm:$0xff] %vm818_vm3, %v739_v1 }
  0xed   : > { %1112 = vrot.lane.b32.xlu0 %v4984_v26, %s4749_s11 }
  0xee   : > { %v737_v50 = vpop.permute.xlu1 %736 }
  0xef   : > { %826 = vst.msk [vmem:[#allocation3 + $0x38] sm:$0xff] %vm818_vm3, %v737_v50  ;;  %v743_v9 = vpop.permute.xlu0 %742  ;;  %v7270_v50 = vld [vmem:[#allocation36_spill] sm:$0xff] }
  0xf0   : > { %1110 = vrot.lane.b32.xlu1 %v4994_v27, %s4749_s11  ;;  %829 = vst.msk [vmem:[#allocation3 + $0x50] sm:$0xff] %vm818_vm3, %v743_v9  ;;  %v7271_v9 = vld [vmem:[#allocation38_spill] sm:$0xff] }
  0xf1   : > { %1116 = vrot.lane.b32.xlu0 %v5008_v30, %s4749_s11 }
  0xf2   : > { %v741_v25 = vpop.permute.xlu1 %740 }
  0xf3   : > { %828 = vst.msk [vmem:[#allocation3 + $0x48] sm:$0xff] %vm818_vm3, %v741_v25  ;;  %v747_v48 = vpop.permute.xlu0 %746 }
  0xf4   : > { %1114 = vrot.lane.b32.xlu1 %v5012_v31, %s4749_s11  ;;  %831 = vst.msk [vmem:[#allocation3 + $0x60] sm:$0xff] %vm818_vm3, %v747_v48  ;;  %v7272_v48 = vld [vmem:[#allocation39_spill] sm:$0xff] }
  0xf5   : > { %1120 = vrot.lane.b32.xlu0 %v5016_v32, %s4749_s11 }
  0xf6   : > { %v745_v26 = vpop.permute.xlu1 %744 }
  0xf7   : > { %830 = vst.msk [vmem:[#allocation3 + $0x58] sm:$0xff] %vm818_vm3, %v745_v26  ;;  %v751_v27 = vpop.permute.xlu0 %750 }
  0xf8   : > { %1118 = vrot.lane.b32.xlu1 %v5041_v38, %s4749_s11  ;;  %833 = vst.msk [vmem:[#allocation3 + $0x70] sm:$0xff] %vm818_vm3, %v751_v27  ;;  %v5604_v27 = vld [vmem:[#allocation2 + $0x189] sm:$0xff] }
  0xf9   : > { %1124 = vrot.lane.b32.xlu0 %v5054_v40, %s4749_s11 }
  0xfa   : > { %v749_v30 = vpop.permute.xlu1 %748 }
  0xfb   : > { %832 = vst.msk [vmem:[#allocation3 + $0x68] sm:$0xff] %vm818_vm3, %v749_v30  ;;  %v755_v31 = vpop.permute.xlu0 %754 }
  0xfc   : > { %1122 = vrot.lane.b32.xlu1 %v5058_v41, %s4749_s11  ;;  %835 = vst.msk [vmem:[#allocation3 + $0x80] sm:$0xff] %vm818_vm3, %v755_v31  ;;  %v7273_v31 = vld [vmem:[#allocation40_spill] sm:$0xff] }
  0xfd   : > { %1128 = vrot.lane.b32.xlu0 %v5062_v42, %s4749_s11 }
  0xfe   : > { %v753_v32 = vpop.permute.xlu1 %752 }
  0xff   : > { %834 = vst.msk [vmem:[#allocation3 + $0x78] sm:$0xff] %vm818_vm3, %v753_v32  ;;  %v759_v38 = vpop.permute.xlu0 %758 }
 0x100   : > { %1126 = vrot.lane.b32.xlu1 %v5066_v43, %s4749_s11  ;;  %837 = vst.msk [vmem:[#allocation3 + $0x90] sm:$0xff] %vm818_vm3, %v759_v38 }
 0x101   : > { %1132 = vrot.lane.b32.xlu0 %v5070_v44, %s4749_s11 }
 0x102   : > { %v757_v40 = vpop.permute.xlu1 %756 }
 0x103   : > { %836 = vst.msk [vmem:[#allocation3 + $0x88] sm:$0xff] %vm818_vm3, %v757_v40  ;;  %v763_v41 = vpop.permute.xlu0 %762  ;;  %v7274_v40 = vld [vmem:[#allocation41_spill] sm:$0xff] }
 0x104   : > { %1130 = vrot.lane.b32.xlu1 %v5074_v46, %s4749_s11  ;;  %839 = vst.msk [vmem:[#allocation3 + $0xa0] sm:$0xff] %vm818_vm3, %v763_v41  ;;  %v7275_v41 = vld [vmem:[#allocation42_spill] sm:$0xff] }
 0x105   : > { %1136 = vrot.lane.b32.xlu0 %v5088_v51, %s4749_s11 }
 0x106   : > { %v761_v42 = vpop.permute.xlu1 %760 }
 0x107   : > { %838 = vst.msk [vmem:[#allocation3 + $0x98] sm:$0xff] %vm818_vm3, %v761_v42  ;;  %v767_v43 = vpop.permute.xlu0 %766 }
 0x108   : > { %1134 = vrot.lane.b32.xlu1 %v5098_v53, %s4749_s11  ;;  %841 = vst.msk [vmem:[#allocation3 + $0xb0] sm:$0xff] %vm818_vm3, %v767_v43 }
 0x109   : > { %1140 = vrot.lane.b32.xlu0 %v5106_v56, %s4749_s11 }
 0x10a   : > { %v765_v44 = vpop.permute.xlu1 %764 }
 0x10b   : > { %840 = vst.msk [vmem:[#allocation3 + $0xa8] sm:$0xff] %vm818_vm3, %v765_v44  ;;  %v771_v46 = vpop.permute.xlu0 %770  ;;  %v7276_v44 = vld [vmem:[#allocation43_spill] sm:$0xff] }
 0x10c   : > { %1138 = vrot.lane.b32.xlu1 %v5132_v63, %s4749_s11  ;;  %843 = vst.msk [vmem:[#allocation3 + $0xc0] sm:$0xff] %vm818_vm3, %v771_v46  ;;  %v7277_v46 = vld [vmem:[#allocation44_spill] sm:$0xff] }
 0x10d   : > { %1144 = vrot.lane.b32.xlu0 %v5184_v28, %s4749_s11 }
 0x10e   : > { %v769_v51 = vpop.permute.xlu1 %768 }
 0x10f   : > { %842 = vst.msk [vmem:[#allocation3 + $0xb8] sm:$0xff] %vm818_vm3, %v769_v51  ;;  %v775_v53 = vpop.permute.xlu0 %774 }
 0x110   : > { %1142 = vrot.lane.b32.xlu1 %v5194_v22, %s4749_s11  ;;  %845 = vst.msk [vmem:[#allocation3 + $0xd0] sm:$0xff] %vm818_vm3, %v775_v53 }
 0x111   : > { %1148 = vrot.lane.b32.xlu0 %v5204_v21, %s4749_s11 }
 0x112   : > { %v773_v56 = vpop.permute.xlu1 %772 }
 0x113   : > { %844 = vst.msk [vmem:[#allocation3 + $0xc8] sm:$0xff] %vm818_vm3, %v773_v56  ;;  %v779_v63 = vpop.permute.xlu0 %778  ;;  %v7278_v56 = vld [vmem:[#allocation45_spill] sm:$0xff] }
 0x114   : > { %1146 = vrot.lane.b32.xlu1 %v5210_v18, %s4749_s11  ;;  %847 = vst.msk [vmem:[#allocation3 + $0xe0] sm:$0xff] %vm818_vm3, %v779_v63  ;;  %v7279_v63 = vld [vmem:[#allocation46_spill] sm:$0xff] }
 0x115   : > { %1152 = vrot.lane.b32.xlu0 %v5220_v17, %s4749_s11 }
 0x116   : > { %v777_v28 = vpop.permute.xlu1 %776 }
 0x117   : > { %846 = vst.msk [vmem:[#allocation3 + $0xd8] sm:$0xff] %vm818_vm3, %v777_v28  ;;  %v783_v22 = vpop.permute.xlu0 %782 }
 0x118   : > { %1150 = vrot.lane.b32.xlu1 %v5226_v14, %s4749_s11  ;;  %849 = vst.msk [vmem:[#allocation3 + $0xf0] sm:$0xff] %vm818_vm3, %v783_v22  ;;  %v7269_v14 = vld [vmem:[#allocation35_spill] sm:$0xff] }
 0x119   : > { %1156 = vrot.lane.b32.xlu0 %v5236_v13, %s4749_s11 }
 0x11a   : > { %v781_v21 = vpop.permute.xlu1 %780 }
 0x11b   : > { %848 = vst.msk [vmem:[#allocation3 + $0xe8] sm:$0xff] %vm818_vm3, %v781_v21  ;;  %v916_v18 = vpop.permute.xlu0 %915  ;;  %v7280_v21 = vld [vmem:[#allocation47_spill] sm:$0xff] }
 0x11c   : > { %1154 = vrot.lane.b32.xlu1 %v5240_v15, %s4749_s11  ;;  %1012 = vst.msk [vmem:[#allocation3] sm:$0xff] %vm1011_vm4, %v916_v18  ;;  %v5593_v15 = vld [vmem:[#allocation2 + $0x181] sm:$0xff]  ;;  %v7281_v18 = vld [vmem:[#allocation48_spill] sm:$0xff] }
 0x11d   : > { %1160 = vrot.lane.b32.xlu0 %v5248_v12, %s4749_s11 }
 0x11e   : > { %v785_v17 = vpop.permute.xlu1 %784 }
 0x11f   : > { %850 = vst.msk [vmem:[#allocation3 + $0xf8] sm:$0xff] %vm818_vm3, %v785_v17  ;;  %v920_v1 = vpop.permute.xlu0 %919 }
 0x120   : > { %1158 = vrot.lane.b32.xlu1 %v7269_v14, %s4749_s11  ;;  %1014 = vst.msk [vmem:[#allocation3 + $0x10] sm:$0xff] %vm1011_vm4, %v920_v1  ;;  %v7282_v1 = vld [vmem:[#allocation49_spill] sm:$0xff] }
 0x121   : > { %1164 = vrot.lane.b32.xlu0 %v7270_v50, %s4749_s11 }
 0x122   : > { %v918_v13 = vpop.permute.xlu1 %917 }
 0x123   : > { %1013 = vst.msk [vmem:[#allocation3 + $0x8] sm:$0xff] %vm1011_vm4, %v918_v13  ;;  %v924_v12 = vpop.permute.xlu0 %923  ;;  %v7283_v13 = vld [vmem:[#allocation50_spill] sm:$0xff] }
 0x124   : > { %1162 = vrot.lane.b32.xlu1 %v7271_v9, %s4749_s11  ;;  %1016 = vst.msk [vmem:[#allocation3 + $0x20] sm:$0xff] %vm1011_vm4, %v924_v12  ;;  %v7284_v12 = vld [vmem:[#allocation51_spill] sm:$0xff] }
 0x125   : > { %1168 = vrot.lane.b32.xlu0 %v5593_v15, %s4749_s11 }
 0x126   : > { %v922_v25 = vpop.permute.xlu1 %921 }
 0x127   : > { %1015 = vst.msk [vmem:[#allocation3 + $0x18] sm:$0xff] %vm1011_vm4, %v922_v25  ;;  %v928_v26 = vpop.permute.xlu0 %927  ;;  %v7285_v25 = vld [vmem:[#allocation52_spill] sm:$0xff] }
 0x128   : > { %1166 = vrot.lane.b32.xlu1 %v7272_v48, %s4749_s11  ;;  %1018 = vst.msk [vmem:[#allocation3 + $0x30] sm:$0xff] %vm1011_vm4, %v928_v26 }
 0x129   : > { %1301 = vrot.lane.b32.xlu0 %v7273_v31, %s4750_s12  ;;  %v7287_v31 = vld [vmem:[#allocation54_spill] sm:$0xff] }
 0x12a   : > { %v926_v30 = vpop.permute.xlu1 %925 }
 0x12b   : > { %1017 = vst.msk [vmem:[#allocation3 + $0x28] sm:$0xff] %vm1011_vm4, %v926_v30  ;;  %v932_v32 = vpop.permute.xlu0 %931  ;;  %v7286_v30 = vld [vmem:[#allocation53_spill] sm:$0xff] }
 0x12c   : > { %1170 = vrot.lane.b32.xlu1 %v5604_v27, %s4749_s11  ;;  %1020 = vst.msk [vmem:[#allocation3 + $0x40] sm:$0xff] %vm1011_vm4, %v932_v32 }
 0x12d   : > { %1305 = vrot.lane.b32.xlu0 %v7274_v40, %s4750_s12  ;;  %v7288_v40 = vld [vmem:[#allocation55_spill] sm:$0xff] }
 0x12e   : > { %v930_v38 = vpop.permute.xlu1 %929 }
 0x12f   : > { %1019 = vst.msk [vmem:[#allocation3 + $0x38] sm:$0xff] %vm1011_vm4, %v930_v38  ;;  %v936_v42 = vpop.permute.xlu0 %935 }
 0x130   : > { %1303 = vrot.lane.b32.xlu1 %v7275_v41, %s4750_s12  ;;  %1022 = vst.msk [vmem:[#allocation3 + $0x50] sm:$0xff] %vm1011_vm4, %v936_v42  ;;  %v7289_v41 = vld [vmem:[#allocation56_spill] sm:$0xff] }
 0x131   : > { %1309 = vrot.lane.b32.xlu0 %v7276_v44, %s4750_s12  ;;  %v7290_v44 = vld [vmem:[#allocation57_spill] sm:$0xff] }
 0x132   : > { %v934_v43 = vpop.permute.xlu1 %933 }
 0x133   : > { %1021 = vst.msk [vmem:[#allocation3 + $0x48] sm:$0xff] %vm1011_vm4, %v934_v43  ;;  %v940_v51 = vpop.permute.xlu0 %939 }
 0x134   : > { %1307 = vrot.lane.b32.xlu1 %v7277_v46, %s4750_s12  ;;  %1024 = vst.msk [vmem:[#allocation3 + $0x60] sm:$0xff] %vm1011_vm4, %v940_v51  ;;  %v7291_v46 = vld [vmem:[#allocation58_spill] sm:$0xff] }
 0x135   : > { %1313 = vrot.lane.b32.xlu0 %v7278_v56, %s4750_s12  ;;  %v7292_v56 = vld [vmem:[#allocation59_spill] sm:$0xff] }
 0x136   : > { %v938_v53 = vpop.permute.xlu1 %937 }
 0x137   : > { %1023 = vst.msk [vmem:[#allocation3 + $0x58] sm:$0xff] %vm1011_vm4, %v938_v53  ;;  %v944_v28 = vpop.permute.xlu0 %943 }
 0x138   : > { %1311 = vrot.lane.b32.xlu1 %v7279_v63, %s4750_s12  ;;  %1026 = vst.msk [vmem:[#allocation3 + $0x70] sm:$0xff] %vm1011_vm4, %v944_v28  ;;  %v7293_v63 = vld [vmem:[#allocation60_spill] sm:$0xff] }
 0x139   : > { %1317 = vrot.lane.b32.xlu0 %v7280_v21, %s4750_s12  ;;  %v7294_v21 = vld [vmem:[#allocation61_spill] sm:$0xff] }
 0x13a   : > { %v942_v22 = vpop.permute.xlu1 %941 }
 0x13b   : > { %1025 = vst.msk [vmem:[#allocation3 + $0x68] sm:$0xff] %vm1011_vm4, %v942_v22  ;;  %v948_v17 = vpop.permute.xlu0 %947 }
 0x13c   : > { %1315 = vrot.lane.b32.xlu1 %v7281_v18, %s4750_s12  ;;  %1028 = vst.msk [vmem:[#allocation3 + $0x80] sm:$0xff] %vm1011_vm4, %v948_v17  ;;  %v7295_v18 = vld [vmem:[#allocation62_spill] sm:$0xff] }
 0x13d   : > { %1321 = vrot.lane.b32.xlu0 %v7282_v1, %s4750_s12  ;;  %v7296_v1 = vld [vmem:[#allocation63_spill] sm:$0xff] }
 0x13e   : > { %v946_v14 = vpop.permute.xlu1 %945 }
 0x13f   : > { %1027 = vst.msk [vmem:[#allocation3 + $0x78] sm:$0xff] %vm1011_vm4, %v946_v14  ;;  %v952_v50 = vpop.permute.xlu0 %951 }
 0x140   : > { %1319 = vrot.lane.b32.xlu1 %v7283_v13, %s4750_s12  ;;  %1030 = vst.msk [vmem:[#allocation3 + $0x90] sm:$0xff] %vm1011_vm4, %v952_v50  ;;  %v7297_v13 = vld [vmem:[#allocation64_spill] sm:$0xff] }
 0x141   : > { %1325 = vrot.lane.b32.xlu0 %v7284_v12, %s4750_s12  ;;  %v7298_v12 = vld [vmem:[#allocation65_spill] sm:$0xff] }
 0x142   : > { %v950_v9 = vpop.permute.xlu1 %949 }
 0x143   : > { %1029 = vst.msk [vmem:[#allocation3 + $0x88] sm:$0xff] %vm1011_vm4, %v950_v9  ;;  %v956_v48 = vpop.permute.xlu0 %955 }
 0x144   : > { %1323 = vrot.lane.b32.xlu1 %v7285_v25, %s4750_s12  ;;  %1032 = vst.msk [vmem:[#allocation3 + $0xa0] sm:$0xff] %vm1011_vm4, %v956_v48 }
 0x145   : > { %1329 = vrot.lane.b32.xlu0 %v7286_v30, %s4750_s12 }
 0x146   : > { %v954_v26 = vpop.permute.xlu1 %953 }
 0x147   : > { %1031 = vst.msk [vmem:[#allocation3 + $0x98] sm:$0xff] %vm1011_vm4, %v954_v26  ;;  %v960_v32 = vpop.permute.xlu0 %959  ;;  %v5693_v26 = vld [vmem:[#allocation2 + $0x182] sm:$0xff] }
 0x148   : > { %1327 = vrot.lane.b32.xlu1 %v7287_v31, %s4750_s12  ;;  %1034 = vst.msk [vmem:[#allocation3 + $0xb0] sm:$0xff] %vm1011_vm4, %v960_v32  ;;  %v5704_v31 = vld [vmem:[#allocation2 + $0x18a] sm:$0xff] }
 0x149   : > { %1333 = vrot.lane.b32.xlu0 %v7288_v40, %s4750_s12 }
 0x14a   : > { %v958_v38 = vpop.permute.xlu1 %957 }
 0x14b   : > { %1033 = vst.msk [vmem:[#allocation3 + $0xa8] sm:$0xff] %vm1011_vm4, %v958_v38  ;;  %v964_v42 = vpop.permute.xlu0 %963 }
 0x14c   : > { %1331 = vrot.lane.b32.xlu1 %v7289_v41, %s4750_s12  ;;  %1036 = vst.msk [vmem:[#allocation3 + $0xc0] sm:$0xff] %vm1011_vm4, %v964_v42 }
 0x14d   : > { %1337 = vrot.lane.b32.xlu0 %v7290_v44, %s4750_s12 }
 0x14e   : > { %v962_v43 = vpop.permute.xlu1 %961 }
 0x14f   : > { %1035 = vst.msk [vmem:[#allocation3 + $0xb8] sm:$0xff] %vm1011_vm4, %v962_v43  ;;  %v968_v51 = vpop.permute.xlu0 %967 }
 0x150   : > { %1335 = vrot.lane.b32.xlu1 %v7291_v46, %s4750_s12  ;;  %1038 = vst.msk [vmem:[#allocation3 + $0xd0] sm:$0xff] %vm1011_vm4, %v968_v51  ;;  %v1625_v46 = vld [vmem:[#allocation2 + $0x39] sm:$0xff] }
 0x151   : > { %1341 = vrot.lane.b32.xlu0 %v7292_v56, %s4750_s12  ;;  %v1627_v56 = vld [vmem:[#allocation2 + $0x51] sm:$0xff] }
 0x152   : > { %v966_v53 = vpop.permute.xlu1 %965 }
 0x153   : > { %1037 = vst.msk [vmem:[#allocation3 + $0xc8] sm:$0xff] %vm1011_vm4, %v966_v53  ;;  %v972_v28 = vpop.permute.xlu0 %971 }
 0x154   : > { %1339 = vrot.lane.b32.xlu1 %v7293_v63, %s4750_s12  ;;  %1040 = vst.msk [vmem:[#allocation3 + $0xe0] sm:$0xff] %vm1011_vm4, %v972_v28  ;;  %v1630_v28 = vld [vmem:[#allocation2 + $0x79] sm:$0xff] }
 0x155   : > { %1345 = vrot.lane.b32.xlu0 %v7294_v21, %s4750_s12 }
 0x156   : > { %v970_v22 = vpop.permute.xlu1 %969 }
 0x157   : > { %1039 = vst.msk [vmem:[#allocation3 + $0xd8] sm:$0xff] %vm1011_vm4, %v970_v22  ;;  %v976_v17 = vpop.permute.xlu0 %975  ;;  %v4731_v22 = vld [vmem:[%s7137_s1 + $0x10] ss:$0 sps:$4 sm:$0x33]  }
 0x158   : > { %1343 = vrot.lane.b32.xlu1 %v7295_v18, %s4750_s12  ;;  %1042 = vst.msk [vmem:[#allocation3 + $0xf0] sm:$0xff] %vm1011_vm4, %v976_v17  ;;  %v1629_v18 = vld [vmem:[#allocation2 + $0x69] sm:$0xff]  ;;  %4712 = vmatprep.subr.msk.bf16.mxu0 %vm2127_vm7, %v4731_v22  ;;  %v2129_v17 = vsel %vm2127_vm7, %v4731_v22, 0 }
 0x159   : > { %1349 = vrot.lane.b32.xlu0 %v7296_v1, %s4750_s12  ;;  %4637 = vmatpush3.bf16.msra.mxu0 %v2129_v17  ;;  %v1632_v1 = vld [vmem:[#allocation2 + $0x91] sm:$0xff] }
 0x15a   : > { %v974_v14 = vpop.permute.xlu1 %973  ;;  %v1833_v17 = vld [vmem:[#allocation2 + $0xf2] sm:$0xff] }
 0x15b   : > { %1041 = vst.msk [vmem:[#allocation3 + $0xe8] sm:$0xff] %vm1011_vm4, %v974_v14  ;;  %v1109_v50 = vpop.permute.xlu0 %1108 }
 0x15c   : > { %1347 = vrot.lane.b32.xlu1 %v7297_v13, %s4750_s12  ;;  %1205 = vst.msk [vmem:[#allocation3] sm:$0xff] %vm1204_vm5, %v1109_v50  ;;  %v4732_v13 = vld [vmem:[%s7137_s1 + $0x8] sm:$0xff]  }
 0x15d   : > { %1353 = vrot.lane.b32.xlu0 %v5381_v4, %s4750_s12  ;;  %4638 = vmatprep.subr.bf16.mxu0 %v4732_v13 }
 0x15e   : > { %v978_v9 = vpop.permute.xlu1 %977  ;;  %4639 = vmatpush3.bf16.msra.mxu0 %v4732_v13 }
 0x15f   : > { %1043 = vst.msk [vmem:[#allocation3 + $0xf8] sm:$0xff] %vm1011_vm4, %v978_v9  ;;  %v1113_v25 = vpop.permute.xlu0 %1112  ;;  %v1631_v9 = vld [vmem:[#allocation2 + $0x81] sm:$0xff] }
 0x160   : > { %1351 = vrot.lane.b32.xlu1 %v7298_v12, %s4750_s12  ;;  %1207 = vst.msk [vmem:[#allocation3 + $0x10] sm:$0xff] %vm1204_vm5, %v1113_v25  ;;  %v1818_v25 = vld [vmem:[#allocation2 + $0x3a] sm:$0xff] }
 0x161   : > { %1357 = vrot.lane.b32.xlu0 %v5391_v6, %s4750_s12 }
 0x162   : > { %v1111_v48 = vpop.permute.xlu1 %1110 }
 0x163   : > { %1206 = vst.msk [vmem:[#allocation3 + $0x8] sm:$0xff] %vm1204_vm5, %v1111_v48  ;;  %v1117_v4 = vpop.permute.xlu0 %1116  ;;  %v4733_v48 = vld [vmem:[%s7137_s1] sm:$0xff]  }
 0x164   : > { %1355 = vrot.lane.b32.xlu1 %v5396_v2, %s4750_s12  ;;  %1209 = vst.msk [vmem:[#allocation3 + $0x20] sm:$0xff] %vm1204_vm5, %v1117_v4  ;;  %4640 = vmatprep.subr.bf16.mxu0 %v4733_v48 }
 0x165   : > { %1361 = vrot.lane.b32.xlu0 %v5693_v26, %s4750_s12  ;;  %4641 = vmatpush3.bf16.msra.mxu0 %v4733_v48  ;;  %v1644_v48 = vld [vmem:[#allocation2 + $0x121] sm:$0xff] }
 0x166   : > { %v1115_v30 = vpop.permute.xlu1 %1114 }
 0x167   : > { %1208 = vst.msk [vmem:[#allocation3 + $0x18] sm:$0xff] %vm1204_vm5, %v1115_v30  ;;  %v1121_v6 = vpop.permute.xlu0 %1120  ;;  %v1817_v30 = vld [vmem:[#allocation2 + $0x32] sm:$0xff] }
 0x168   : > { %1359 = vrot.lane.b32.xlu1 %v5404_v11, %s4750_s12  ;;  %1211 = vst.msk [vmem:[#allocation3 + $0x30] sm:$0xff] %vm1204_vm5, %v1121_v6 }
 0x169   : > { %1495 = vrot.lane.b32.xlu0 %v5084_v49, %s4751_s13 }
 0x16a   : > { %v1119_v32 = vpop.permute.xlu1 %1118 }
 0x16b   : > { %1210 = vst.msk [vmem:[#allocation3 + $0x28] sm:$0xff] %vm1204_vm5, %v1119_v32  ;;  %v1125_v2 = vpop.permute.xlu0 %1124  ;;  %v1820_v32 = vld [vmem:[#allocation2 + $0x52] sm:$0xff] }
 0x16c   : > { %1363 = vrot.lane.b32.xlu1 %v5704_v31, %s4750_s12  ;;  %1213 = vst.msk [vmem:[#allocation3 + $0x40] sm:$0xff] %vm1204_vm5, %v1125_v2 }
 0x16d   : > { %1499 = vrot.lane.b32.xlu0 %v5094_v52, %s4751_s13 }
 0x16e   : > { %v1123_v38 = vpop.permute.xlu1 %1122 }
 0x16f   : > { %1212 = vst.msk [vmem:[#allocation3 + $0x38] sm:$0xff] %vm1204_vm5, %v1123_v38  ;;  %v1129_v11 = vpop.permute.xlu0 %1128  ;;  %v1819_v38 = vld [vmem:[#allocation2 + $0x4a] sm:$0xff] }
 0x170   : > { %1497 = vrot.lane.b32.xlu1 %v5102_v54, %s4751_s13  ;;  %1215 = vst.msk [vmem:[#allocation3 + $0x50] sm:$0xff] %vm1204_vm5, %v1129_v11 }
 0x171   : > { %1503 = vrot.lane.b32.xlu0 %v5104_v55, %s4751_s13 }
 0x172   : > { %v1127_v49 = vpop.permute.xlu1 %1126 }
 0x173   : > { %1214 = vst.msk [vmem:[#allocation3 + $0x48] sm:$0xff] %vm1204_vm5, %v1127_v49  ;;  %v1133_v40 = vpop.permute.xlu0 %1132  ;;  %v1822_v49 = vld [vmem:[#allocation2 + $0x6a] sm:$0xff] }
 0x174   : > { %1501 = vrot.lane.b32.xlu1 %v5112_v57, %s4751_s13  ;;  %1217 = vst.msk [vmem:[#allocation3 + $0x60] sm:$0xff] %vm1204_vm5, %v1133_v40 }
 0x175   : > { %1507 = vrot.lane.b32.xlu0 %v5114_v58, %s4751_s13 }
 0x176   : > { %v1131_v52 = vpop.permute.xlu1 %1130 }
 0x177   : > { %1216 = vst.msk [vmem:[#allocation3 + $0x58] sm:$0xff] %vm1204_vm5, %v1131_v52  ;;  %v1137_v54 = vpop.permute.xlu0 %1136  ;;  %v1821_v52 = vld [vmem:[#allocation2 + $0x62] sm:$0xff] }
 0x178   : > { %1505 = vrot.lane.b32.xlu1 %v5116_v59, %s4751_s13  ;;  %1219 = vst.msk [vmem:[#allocation3 + $0x70] sm:$0xff] %vm1204_vm5, %v1137_v54 }
 0x179   : > { %1511 = vrot.lane.b32.xlu0 %v5126_v60, %s4751_s13 }
 0x17a   : > { %v1135_v55 = vpop.permute.xlu1 %1134 }
 0x17b   : > { %1218 = vst.msk [vmem:[#allocation3 + $0x68] sm:$0xff] %vm1204_vm5, %v1135_v55  ;;  %v1141_v57 = vpop.permute.xlu0 %1140  ;;  %v1824_v55 = vld [vmem:[#allocation2 + $0x82] sm:$0xff] }
 0x17c   : > { %1509 = vrot.lane.b32.xlu1 %v5128_v61, %s4751_s13  ;;  %1221 = vst.msk [vmem:[#allocation3 + $0x80] sm:$0xff] %vm1204_vm5, %v1141_v57 }
 0x17d   : > { %1515 = vrot.lane.b32.xlu0 %v5130_v62, %s4751_s13 }
 0x17e   : > { %v1139_v58 = vpop.permute.xlu1 %1138 }
 0x17f   : > { %1220 = vst.msk [vmem:[#allocation3 + $0x78] sm:$0xff] %vm1204_vm5, %v1139_v58  ;;  %v1145_v59 = vpop.permute.xlu0 %1144  ;;  %v1823_v58 = vld [vmem:[#allocation2 + $0x7a] sm:$0xff] }
 0x180   : > { %1513 = vrot.lane.b32.xlu1 %v5140_v0, %s4751_s13  ;;  %1223 = vst.msk [vmem:[#allocation3 + $0x90] sm:$0xff] %vm1204_vm5, %v1145_v59 }
 0x181   : > { %1519 = vrot.lane.b32.xlu0 %v5142_v7, %s4751_s13 }
 0x182   : > { %v1143_v60 = vpop.permute.xlu1 %1142 }
 0x183   : > { %1222 = vst.msk [vmem:[#allocation3 + $0x88] sm:$0xff] %vm1204_vm5, %v1143_v60  ;;  %v1149_v61 = vpop.permute.xlu0 %1148  ;;  %v1634_v60 = vld [vmem:[#allocation2 + $0xa9] sm:$0xff] }
 0x184   : > { %1517 = vrot.lane.b32.xlu1 %v5144_v8, %s4751_s13  ;;  %1225 = vst.msk [vmem:[#allocation3 + $0xa0] sm:$0xff] %vm1204_vm5, %v1149_v61 }
 0x185   : > { %1523 = vrot.lane.b32.xlu0 %v5154_v45, %s4751_s13 }
 0x186   : > { %v1147_v62 = vpop.permute.xlu1 %1146 }
 0x187   : > { %1224 = vst.msk [vmem:[#allocation3 + $0x98] sm:$0xff] %vm1204_vm5, %v1147_v62  ;;  %v1153_v0 = vpop.permute.xlu0 %1152  ;;  %v1633_v62 = vld [vmem:[#allocation2 + $0x99] sm:$0xff] }
 0x188   : > { %1521 = vrot.lane.b32.xlu1 %v5156_v47, %s4751_s13  ;;  %1227 = vst.msk [vmem:[#allocation3 + $0xb0] sm:$0xff] %vm1204_vm5, %v1153_v0 }
 0x189   : > { %1527 = vrot.lane.b32.xlu0 %v5158_v39, %s4751_s13 }
 0x18a   : > { %v1151_v7 = vpop.permute.xlu1 %1150 }
 0x18b   : > { %1226 = vst.msk [vmem:[#allocation3 + $0xa8] sm:$0xff] %vm1204_vm5, %v1151_v7  ;;  %v1157_v8 = vpop.permute.xlu0 %1156  ;;  %v1825_v7 = vld [vmem:[#allocation2 + $0x92] sm:$0xff] }
 0x18c   : > { %1525 = vrot.lane.b32.xlu1 %v5166_v36, %s4751_s13  ;;  %1229 = vst.msk [vmem:[#allocation3 + $0xc0] sm:$0xff] %vm1204_vm5, %v1157_v8 }
 0x18d   : > { %1531 = vrot.lane.b32.xlu0 %v5168_v35, %s4751_s13 }
 0x18e   : > { %v1155_v45 = vpop.permute.xlu1 %1154 }
 0x18f   : > { %1228 = vst.msk [vmem:[#allocation3 + $0xb8] sm:$0xff] %vm1204_vm5, %v1155_v45  ;;  %v1161_v47 = vpop.permute.xlu0 %1160  ;;  %v1635_v45 = vld [vmem:[#allocation2 + $0xb1] sm:$0xff] }
 0x190   : > { %1529 = vrot.lane.b32.xlu1 %v5170_v37, %s4751_s13  ;;  %1231 = vst.msk [vmem:[#allocation3 + $0xd0] sm:$0xff] %vm1204_vm5, %v1161_v47 }
 0x191   : > { %1535 = vrot.lane.b32.xlu0 %v5180_v29, %s4751_s13 }
 0x192   : > { %v1159_v39 = vpop.permute.xlu1 %1158 }
 0x193   : > { %1230 = vst.msk [vmem:[#allocation3 + $0xc8] sm:$0xff] %vm1204_vm5, %v1159_v39  ;;  %v1165_v36 = vpop.permute.xlu0 %1164  ;;  %v1827_v39 = vld [vmem:[#allocation2 + $0xaa] sm:$0xff] }
 0x194   : > { %1533 = vrot.lane.b32.xlu1 %v5182_v34, %s4751_s13  ;;  %1233 = vst.msk [vmem:[#allocation3 + $0xe0] sm:$0xff] %vm1204_vm5, %v1165_v36 }
 0x195   : > { %1539 = vrot.lane.b32.xlu0 %v5192_v33, %s4751_s13 }
 0x196   : > { %v1163_v35 = vpop.permute.xlu1 %1162 }
 0x197   : > { %1232 = vst.msk [vmem:[#allocation3 + $0xd8] sm:$0xff] %vm1204_vm5, %v1163_v35  ;;  %v1169_v37 = vpop.permute.xlu0 %1168  ;;  %v1826_v35 = vld [vmem:[#allocation2 + $0x9a] sm:$0xff] }
 0x198   : > { %1537 = vrot.lane.b32.xlu1 %v5198_v24, %s4751_s13  ;;  %1235 = vst.msk [vmem:[#allocation3 + $0xf0] sm:$0xff] %vm1204_vm5, %v1169_v37 }
 0x199   : > { %1543 = vrot.lane.b32.xlu0 %v5208_v23, %s4751_s13 }
 0x19a   : > { %v1167_v29 = vpop.permute.xlu1 %1166 }
 0x19b   : > { %1234 = vst.msk [vmem:[#allocation3 + $0xe8] sm:$0xff] %vm1204_vm5, %v1167_v29  ;;  %v1302_v34 = vpop.permute.xlu0 %1301  ;;  %v1636_v29 = vld [vmem:[#allocation2 + $0xc1] sm:$0xff] }
 0x19c   : > { %1541 = vrot.lane.b32.xlu1 %v5214_v20, %s4751_s13  ;;  %1398 = vst.msk [vmem:[#allocation3] sm:$0xff] %vm1397_vm6, %v1302_v34  ;;  %v1461_v20 = vld [vmem:[#allocation2 + $0x198] sm:$0xff] }
 0x19d   : > { %1547 = vrot.lane.b32.xlu0 %v5224_v19, %s4751_s13 }
 0x19e   : > { %v1171_v33 = vpop.permute.xlu1 %1170 }
 0x19f   : > { %1236 = vst.msk [vmem:[#allocation3 + $0xf8] sm:$0xff] %vm1204_vm5, %v1171_v33  ;;  %v1306_v24 = vpop.permute.xlu0 %1305  ;;  %v1828_v33 = vld [vmem:[#allocation2 + $0xb2] sm:$0xff] }
 0x1a0   : > { %1545 = vrot.lane.b32.xlu1 %v5230_v16, %s4751_s13  ;;  %1400 = vst.msk [vmem:[#allocation3 + $0x10] sm:$0xff] %vm1397_vm6, %v1306_v24  ;;  %v1624_v16 = vld [vmem:[#allocation2 + $0x31] sm:$0xff] }
 0x1a1   : > { %1551 = vrot.lane.b32.xlu0 %v5493_v5, %s4751_s13  ;;  %v1462_v5 = vld [vmem:[#allocation2 + $0x1a0] sm:$0xff] }
 0x1a2   : > { %v1304_v23 = vpop.permute.xlu1 %1303 }
 0x1a3   : > { %1399 = vst.msk [vmem:[#allocation3 + $0x8] sm:$0xff] %vm1397_vm6, %v1304_v23  ;;  %v1310_v41 = vpop.permute.xlu0 %1309  ;;  %v1638_v23 = vld [vmem:[#allocation2 + $0xd9] sm:$0xff] }
 0x1a4   : > { %1549 = vrot.lane.b32.xlu1 %v5242_v10, %s4751_s13  ;;  %1402 = vst.msk [vmem:[#allocation3 + $0x20] sm:$0xff] %vm1397_vm6, %v1310_v41  ;;  %v1626_v10 = vld [vmem:[#allocation2 + $0x49] sm:$0xff] }
 0x1a5   : > { %1555 = vrot.lane.b32.xlu0 %v1461_v20, %s4751_s13  ;;  %v1637_v41 = vld [vmem:[#allocation2 + $0xc9] sm:$0xff] }
 0x1a6   : > { %v1308_v19 = vpop.permute.xlu1 %1307 }
 0x1a7   : > { %1401 = vst.msk [vmem:[#allocation3 + $0x18] sm:$0xff] %vm1397_vm6, %v1308_v19  ;;  %v1314_v42 = vpop.permute.xlu0 %1313 }
 0x1a8   : > { %1553 = vrot.lane.b32.xlu1 %v5504_v3, %s4751_s13  ;;  %1404 = vst.msk [vmem:[#allocation3 + $0x30] sm:$0xff] %vm1397_vm6, %v1314_v42  ;;  %v1628_v3 = vld [vmem:[#allocation2 + $0x61] sm:$0xff] }
 0x1a9   : > { %1688 = vrot.lane.b32.xlu0 %v1624_v16, %s4752_s14  ;;  %v1829_v16 = vld [vmem:[#allocation2 + $0xc2] sm:$0xff] }
 0x1aa   : > { %v1312_v43 = vpop.permute.xlu1 %1311 }
 0x1ab   : > { %1403 = vst.msk [vmem:[#allocation3 + $0x28] sm:$0xff] %vm1397_vm6, %v1312_v43  ;;  %v1318_v44 = vpop.permute.xlu0 %1317 }
 0x1ac   : > { %1557 = vrot.lane.b32.xlu1 %v1462_v5, %s4751_s13  ;;  %1406 = vst.msk [vmem:[#allocation3 + $0x40] sm:$0xff] %vm1397_vm6, %v1318_v44  ;;  %v1639_v5 = vld [vmem:[#allocation2 + $0xe1] sm:$0xff] }
 0x1ad   : > { %1692 = vrot.lane.b32.xlu0 %v1626_v10, %s4752_s14  ;;  %v1831_v10 = vld [vmem:[#allocation2 + $0xda] sm:$0xff] }
 0x1ae   : > { %v1316_v51 = vpop.permute.xlu1 %1315 }
 0x1af   : > { %1405 = vst.msk [vmem:[#allocation3 + $0x38] sm:$0xff] %vm1397_vm6, %v1316_v51  ;;  %v1322_v53 = vpop.permute.xlu0 %1321 }
 0x1b0   : > { %1690 = vrot.lane.b32.xlu1 %v1625_v46, %s4752_s14  ;;  %1408 = vst.msk [vmem:[#allocation3 + $0x50] sm:$0xff] %vm1397_vm6, %v1322_v53  ;;  %v1830_v46 = vld [vmem:[#allocation2 + $0xca] sm:$0xff] }
 0x1b1   : > { %1696 = vrot.lane.b32.xlu0 %v1628_v3, %s4752_s14  ;;  %v1640_v3 = vld [vmem:[#allocation2 + $0xf1] sm:$0xff] }
 0x1b2   : > { %v1320_v63 = vpop.permute.xlu1 %1319 }
 0x1b3   : > { %1407 = vst.msk [vmem:[#allocation3 + $0x48] sm:$0xff] %vm1397_vm6, %v1320_v63  ;;  %v1326_v21 = vpop.permute.xlu0 %1325 }
 0x1b4   : > { %1694 = vrot.lane.b32.xlu1 %v1627_v56, %s4752_s14  ;;  %1410 = vst.msk [vmem:[#allocation3 + $0x60] sm:$0xff] %vm1397_vm6, %v1326_v21  ;;  %v1832_v56 = vld [vmem:[#allocation2 + $0xe2] sm:$0xff]  ;;  %v1641_v21 = vld [vmem:[#allocation2 + $0xf9] sm:$0xff] }
 0x1b5   : > { %1700 = vrot.lane.b32.xlu0 %v1630_v28, %s4752_s14  ;;  %v1642_v28 = vld [vmem:[#allocation2 + $0x109] sm:$0xff] }
 0x1b6   : > { %v1324_v14 = vpop.permute.xlu1 %1323 }
 0x1b7   : > { %1409 = vst.msk [vmem:[#allocation3 + $0x58] sm:$0xff] %vm1397_vm6, %v1324_v14  ;;  %v1330_v50 = vpop.permute.xlu0 %1329 }
 0x1b8   : > { %1698 = vrot.lane.b32.xlu1 %v1629_v18, %s4752_s14  ;;  %1412 = vst.msk [vmem:[#allocation3 + $0x70] sm:$0xff] %vm1397_vm6, %v1330_v50  ;;  %v1835_v50 = vld [vmem:[#allocation2 + $0x10a] sm:$0xff] }
 0x1b9   : > { %1704 = vrot.lane.b32.xlu0 %v1632_v1, %s4752_s14  ;;  %v1643_v1 = vld [vmem:[#allocation2 + $0x111] sm:$0xff] }
 0x1ba   : > { %v1328_v12 = vpop.permute.xlu1 %1327 }
 0x1bb   : > { %1411 = vst.msk [vmem:[#allocation3 + $0x68] sm:$0xff] %vm1397_vm6, %v1328_v12  ;;  %v1334_v4 = vpop.permute.xlu0 %1333  ;;  %v1834_v12 = vld [vmem:[#allocation2 + $0xfa] sm:$0xff] }
 0x1bc   : > { %1702 = vrot.lane.b32.xlu1 %v1631_v9, %s4752_s14  ;;  %1414 = vst.msk [vmem:[#allocation3 + $0x80] sm:$0xff] %vm1397_vm6, %v1334_v4 }
 0x1bd   : > { %1883 = vrot.lane.b32.xlu0 %v1818_v25, %s4753_s21 }
 0x1be   : > { %v1332_v6 = vpop.permute.xlu1 %1331 }
 0x1bf   : > { %1413 = vst.msk [vmem:[#allocation3 + $0x78] sm:$0xff] %vm1397_vm6, %v1332_v6  ;;  %v1338_v2 = vpop.permute.xlu0 %1337 }
 0x1c0   : > { %1881 = vrot.lane.b32.xlu1 %v1817_v30, %s4753_s21  ;;  %1416 = vst.msk [vmem:[#allocation3 + $0x90] sm:$0xff] %vm1397_vm6, %v1338_v2  ;;  %v1836_v30 = vld [vmem:[#allocation2 + $0x112] sm:$0xff] }
 0x1c1   : > { %1887 = vrot.lane.b32.xlu0 %v1820_v32, %s4753_s21  ;;  %v1646_v32 = vld [vmem:[#allocation2 + $0x139] sm:$0xff] }
 0x1c2   : > { %v1336_v11 = vpop.permute.xlu1 %1335 }
 0x1c3   : > { %1415 = vst.msk [vmem:[#allocation3 + $0x88] sm:$0xff] %vm1397_vm6, %v1336_v11  ;;  %v1342_v40 = vpop.permute.xlu0 %1341 }
 0x1c4   : > { %1885 = vrot.lane.b32.xlu1 %v1819_v38, %s4753_s21  ;;  %1418 = vst.msk [vmem:[#allocation3 + $0xa0] sm:$0xff] %vm1397_vm6, %v1342_v40  ;;  %v1645_v38 = vld [vmem:[#allocation2 + $0x129] sm:$0xff] }
 0x1c5   : > { %1891 = vrot.lane.b32.xlu0 %v1822_v49, %s4753_s21  ;;  %v1837_v49 = vld [vmem:[#allocation2 + $0x122] sm:$0xff] }
 0x1c6   : > { %v1340_v54 = vpop.permute.xlu1 %1339 }
 0x1c7   : > { %1417 = vst.msk [vmem:[#allocation3 + $0x98] sm:$0xff] %vm1397_vm6, %v1340_v54  ;;  %v1346_v57 = vpop.permute.xlu0 %1345 }
 0x1c8   : > { %1889 = vrot.lane.b32.xlu1 %v1821_v52, %s4753_s21  ;;  %1420 = vst.msk [vmem:[#allocation3 + $0xb0] sm:$0xff] %vm1397_vm6, %v1346_v57  ;;  %v1647_v52 = vld [vmem:[#allocation2 + $0x141] sm:$0xff] }
 0x1c9   : > { %1895 = vrot.lane.b32.xlu0 %v1824_v55, %s4753_s21  ;;  %v1839_v55 = vld [vmem:[#allocation2 + $0x13a] sm:$0xff] }
 0x1ca   : > { %v1344_v59 = vpop.permute.xlu1 %1343 }
 0x1cb   : > { %1419 = vst.msk [vmem:[#allocation3 + $0xa8] sm:$0xff] %vm1397_vm6, %v1344_v59  ;;  %v1350_v61 = vpop.permute.xlu0 %1349 }
 0x1cc   : > { %1893 = vrot.lane.b32.xlu1 %v1823_v58, %s4753_s21  ;;  %1422 = vst.msk [vmem:[#allocation3 + $0xc0] sm:$0xff] %vm1397_vm6, %v1350_v61  ;;  %v1838_v58 = vld [vmem:[#allocation2 + $0x12a] sm:$0xff] }
 0x1cd   : > { %1708 = vrot.lane.b32.xlu0 %v1634_v60, %s4752_s14  ;;  %v1648_v60 = vld [vmem:[#allocation2 + $0x151] sm:$0xff] }
 0x1ce   : > { %v1348_v0 = vpop.permute.xlu1 %1347 }
 0x1cf   : > { %1421 = vst.msk [vmem:[#allocation3 + $0xb8] sm:$0xff] %vm1397_vm6, %v1348_v0  ;;  %v1354_v8 = vpop.permute.xlu0 %1353 }
 0x1d0   : > { %1706 = vrot.lane.b32.xlu1 %v1633_v62, %s4752_s14  ;;  %1424 = vst.msk [vmem:[#allocation3 + $0xd0] sm:$0xff] %vm1397_vm6, %v1354_v8  ;;  %v1840_v62 = vld [vmem:[#allocation2 + $0x142] sm:$0xff] }
 0x1d1   : > { %1897 = vrot.lane.b32.xlu0 %v1825_v7, %s4753_s21  ;;  %v1650_v7 = vld [vmem:[#allocation2 + $0x169] sm:$0xff] }
 0x1d2   : > { %v1352_v47 = vpop.permute.xlu1 %1351 }
 0x1d3   : > { %1423 = vst.msk [vmem:[#allocation3 + $0xc8] sm:$0xff] %vm1397_vm6, %v1352_v47  ;;  %v1358_v36 = vpop.permute.xlu0 %1357 }
 0x1d4   : > { %1710 = vrot.lane.b32.xlu1 %v1635_v45, %s4752_s14  ;;  %1426 = vst.msk [vmem:[#allocation3 + $0xe0] sm:$0xff] %vm1397_vm6, %v1358_v36  ;;  %v1649_v45 = vld [vmem:[#allocation2 + $0x159] sm:$0xff] }
 0x1d5   : > { %1901 = vrot.lane.b32.xlu0 %v1827_v39, %s4753_s21  ;;  %v1841_v39 = vld [vmem:[#allocation2 + $0x152] sm:$0xff] }
 0x1d6   : > { %v1356_v37 = vpop.permute.xlu1 %1355 }
 0x1d7   : > { %1425 = vst.msk [vmem:[#allocation3 + $0xd8] sm:$0xff] %vm1397_vm6, %v1356_v37  ;;  %v1362_v34 = vpop.permute.xlu0 %1361 }
 0x1d8   : > { %1899 = vrot.lane.b32.xlu1 %v1826_v35, %s4753_s21  ;;  %1428 = vst.msk [vmem:[#allocation3 + $0xf0] sm:$0xff] %vm1397_vm6, %v1362_v34  ;;  %v1651_v35 = vld [vmem:[#allocation2 + $0x171] sm:$0xff] }
 0x1d9   : > { %1712 = vrot.lane.b32.xlu0 %v1636_v29, %s4752_s14  ;;  %v1843_v29 = vld [vmem:[#allocation2 + $0x16a] sm:$0xff] }
 0x1da   : > { %v1360_v24 = vpop.permute.xlu1 %1359 }
 0x1db   : > { %1427 = vst.msk [vmem:[#allocation3 + $0xe8] sm:$0xff] %vm1397_vm6, %v1360_v24  ;;  %v1496_v20 = vpop.permute.xlu0 %1495 }
 0x1dc   : > { %1903 = vrot.lane.b32.xlu1 %v1828_v33, %s4753_s21  ;;  %1592 = vst.msk [vmem:[#allocation3] sm:$0xff] %vm1591_vm8, %v1496_v20  ;;  %v1842_v33 = vld [vmem:[#allocation2 + $0x15a] sm:$0xff]  ;;  %v1844_v20 = vld [vmem:[#allocation2 + $0x172] sm:$0xff] }
 0x1dd   : > { %1716 = vrot.lane.b32.xlu0 %v1638_v23, %s4752_s14 }
 0x1de   : > { %v1364_v19 = vpop.permute.xlu1 %1363 }
 0x1df   : > { %1429 = vst.msk [vmem:[#allocation3 + $0xf8] sm:$0xff] %vm1397_vm6, %v1364_v19  ;;  %v1500_v42 = vpop.permute.xlu0 %1499  ;;  %v1654_v19 = vld [vmem:[#allocation2 + $0x199] sm:$0xff] }
 0x1e0   : > { %1714 = vrot.lane.b32.xlu1 %v1637_v41, %s4752_s14  ;;  %1594 = vst.msk [vmem:[#allocation3 + $0x10] sm:$0xff] %vm1591_vm8, %v1500_v42 }
 0x1e1   : > { %1905 = vrot.lane.b32.xlu0 %v1829_v16, %s4753_s21 }
 0x1e2   : > { %v1498_v43 = vpop.permute.xlu1 %1497 }
 0x1e3   : > { %1593 = vst.msk [vmem:[#allocation3 + $0x8] sm:$0xff] %vm1591_vm8, %v1498_v43  ;;  %v1504_v44 = vpop.permute.xlu0 %1503 }
 0x1e4   : > { %1718 = vrot.lane.b32.xlu1 %v1639_v5, %s4752_s14  ;;  %1596 = vst.msk [vmem:[#allocation3 + $0x20] sm:$0xff] %vm1591_vm8, %v1504_v44 }
 0x1e5   : > { %1909 = vrot.lane.b32.xlu0 %v1831_v10, %s4753_s21  ;;  %v1847_v10 = vld [vmem:[#allocation2 + $0x19a] sm:$0xff] }
 0x1e6   : > { %v1502_v51 = vpop.permute.xlu1 %1501 }
 0x1e7   : > { %1595 = vst.msk [vmem:[#allocation3 + $0x18] sm:$0xff] %vm1591_vm8, %v1502_v51  ;;  %v1508_v53 = vpop.permute.xlu0 %1507 }
 0x1e8   : > { %1907 = vrot.lane.b32.xlu1 %v1830_v46, %s4753_s21  ;;  %1598 = vst.msk [vmem:[#allocation3 + $0x30] sm:$0xff] %vm1591_vm8, %v1508_v53 }
 0x1e9   : > { %1720 = vrot.lane.b32.xlu0 %v1640_v3, %s4752_s14 }
 0x1ea   : > { %v1506_v63 = vpop.permute.xlu1 %1505 }
 0x1eb   : > { %1597 = vst.msk [vmem:[#allocation3 + $0x28] sm:$0xff] %vm1591_vm8, %v1506_v63  ;;  %v1512_v22 = vpop.permute.xlu0 %1511 }
 0x1ec   : > { %1911 = vrot.lane.b32.xlu1 %v1832_v56, %s4753_s21  ;;  %1600 = vst.msk [vmem:[#allocation3 + $0x40] sm:$0xff] %vm1591_vm8, %v1512_v22 }
 0x1ed   : > { %1724 = vrot.lane.b32.xlu0 %v1642_v28, %s4752_s14 }
 0x1ee   : > { %v1510_v18 = vpop.permute.xlu1 %1509 }
 0x1ef   : > { %1599 = vst.msk [vmem:[#allocation3 + $0x38] sm:$0xff] %vm1591_vm8, %v1510_v18  ;;  %v1516_v14 = vpop.permute.xlu0 %1515 }
 0x1f0   : > { %1722 = vrot.lane.b32.xlu1 %v1641_v21, %s4752_s14  ;;  %1602 = vst.msk [vmem:[#allocation3 + $0x50] sm:$0xff] %vm1591_vm8, %v1516_v14 }
 0x1f1   : > { %1913 = vrot.lane.b32.xlu0 %v1833_v17, %s4753_s21 }
 0x1f2   : > { %v1514_v13 = vpop.permute.xlu1 %1513 }
 0x1f3   : > { %1601 = vst.msk [vmem:[#allocation3 + $0x48] sm:$0xff] %vm1591_vm8, %v1514_v13  ;;  %v1520_v9 = vpop.permute.xlu0 %1519 }
 0x1f4   : > { %1726 = vrot.lane.b32.xlu1 %v1643_v1, %s4752_s14  ;;  %1604 = vst.msk [vmem:[#allocation3 + $0x60] sm:$0xff] %vm1591_vm8, %v1520_v9 }
 0x1f5   : > { %1917 = vrot.lane.b32.xlu0 %v1835_v50, %s4753_s21 }
 0x1f6   : > { %v1518_v25 = vpop.permute.xlu1 %1517 }
 0x1f7   : > { %1603 = vst.msk [vmem:[#allocation3 + $0x58] sm:$0xff] %vm1591_vm8, %v1518_v25  ;;  %v1524_v4 = vpop.permute.xlu0 %1523 }
 0x1f8   : > { %1915 = vrot.lane.b32.xlu1 %v1834_v12, %s4753_s21  ;;  %1606 = vst.msk [vmem:[#allocation3 + $0x70] sm:$0xff] %vm1591_vm8, %v1524_v4 }
 0x1f9   : > { %1728 = vrot.lane.b32.xlu0 %v1644_v48, %s4752_s14 }
 0x1fa   : > { %v1522_v6 = vpop.permute.xlu1 %1521 }
 0x1fb   : > { %1605 = vst.msk [vmem:[#allocation3 + $0x68] sm:$0xff] %vm1591_vm8, %v1522_v6  ;;  %v1528_v2 = vpop.permute.xlu0 %1527 }
 0x1fc   : > { %1919 = vrot.lane.b32.xlu1 %v1836_v30, %s4753_s21  ;;  %1608 = vst.msk [vmem:[#allocation3 + $0x80] sm:$0xff] %vm1591_vm8, %v1528_v2 }
 0x1fd   : > { %1732 = vrot.lane.b32.xlu0 %v1646_v32, %s4752_s14 }
 0x1fe   : > { %v1526_v11 = vpop.permute.xlu1 %1525 }
 0x1ff   : > { %1607 = vst.msk [vmem:[#allocation3 + $0x78] sm:$0xff] %vm1591_vm8, %v1526_v11  ;;  %v1532_v40 = vpop.permute.xlu0 %1531 }
 0x200   : > { %1730 = vrot.lane.b32.xlu1 %v1645_v38, %s4752_s14  ;;  %1610 = vst.msk [vmem:[#allocation3 + $0x90] sm:$0xff] %vm1591_vm8, %v1532_v40 }
 0x201   : > { %1921 = vrot.lane.b32.xlu0 %v1837_v49, %s4753_s21 }
 0x202   : > { %v1530_v54 = vpop.permute.xlu1 %1529 }
 0x203   : > { %1609 = vst.msk [vmem:[#allocation3 + $0x88] sm:$0xff] %vm1591_vm8, %v1530_v54  ;;  %v1536_v57 = vpop.permute.xlu0 %1535 }
 0x204   : > { %1734 = vrot.lane.b32.xlu1 %v1647_v52, %s4752_s14  ;;  %1612 = vst.msk [vmem:[#allocation3 + $0xa0] sm:$0xff] %vm1591_vm8, %v1536_v57 }
 0x205   : > { %1925 = vrot.lane.b32.xlu0 %v1839_v55, %s4753_s21 }
 0x206   : > { %v1534_v59 = vpop.permute.xlu1 %1533 }
 0x207   : > { %1611 = vst.msk [vmem:[#allocation3 + $0x98] sm:$0xff] %vm1591_vm8, %v1534_v59  ;;  %v1540_v61 = vpop.permute.xlu0 %1539 }
 0x208   : > { %1923 = vrot.lane.b32.xlu1 %v1838_v58, %s4753_s21  ;;  %1614 = vst.msk [vmem:[#allocation3 + $0xb0] sm:$0xff] %vm1591_vm8, %v1540_v61 }
 0x209   : > { %1736 = vrot.lane.b32.xlu0 %v1648_v60, %s4752_s14 }
 0x20a   : > { %v1538_v0 = vpop.permute.xlu1 %1537 }
 0x20b   : > { %1613 = vst.msk [vmem:[#allocation3 + $0xa8] sm:$0xff] %vm1591_vm8, %v1538_v0  ;;  %v1544_v8 = vpop.permute.xlu0 %1543 }
 0x20c   : > { %1927 = vrot.lane.b32.xlu1 %v1840_v62, %s4753_s21  ;;  %1616 = vst.msk [vmem:[#allocation3 + $0xc0] sm:$0xff] %vm1591_vm8, %v1544_v8 }
 0x20d   : > { %1740 = vrot.lane.b32.xlu0 %v1650_v7, %s4752_s14 }
 0x20e   : > { %v1542_v47 = vpop.permute.xlu1 %1541 }
 0x20f   : > { %1615 = vst.msk [vmem:[#allocation3 + $0xb8] sm:$0xff] %vm1591_vm8, %v1542_v47  ;;  %v1548_v36 = vpop.permute.xlu0 %1547 }
 0x210   : > { %1738 = vrot.lane.b32.xlu1 %v1649_v45, %s4752_s14  ;;  %1618 = vst.msk [vmem:[#allocation3 + $0xd0] sm:$0xff] %vm1591_vm8, %v1548_v36 }
 0x211   : > { %1929 = vrot.lane.b32.xlu0 %v1841_v39, %s4753_s21 }
 0x212   : > { %v1546_v37 = vpop.permute.xlu1 %1545 }
 0x213   : > { %1617 = vst.msk [vmem:[#allocation3 + $0xc8] sm:$0xff] %vm1591_vm8, %v1546_v37  ;;  %v1552_v34 = vpop.permute.xlu0 %1551 }
 0x214   : > { %1742 = vrot.lane.b32.xlu1 %v1651_v35, %s4752_s14  ;;  %1620 = vst.msk [vmem:[#allocation3 + $0xe0] sm:$0xff] %vm1591_vm8, %v1552_v34 }
 0x215   : > { %1933 = vrot.lane.b32.xlu0 %v1843_v29, %s4753_s21 }
 0x216   : > { %v1550_v24 = vpop.permute.xlu1 %1549 }
 0x217   : > { %1619 = vst.msk [vmem:[#allocation3 + $0xd8] sm:$0xff] %vm1591_vm8, %v1550_v24  ;;  %v1556_v23 = vpop.permute.xlu0 %1555 }
 0x218   : > { %1931 = vrot.lane.b32.xlu1 %v1842_v33, %s4753_s21  ;;  %1622 = vst.msk [vmem:[#allocation3 + $0xf0] sm:$0xff] %vm1591_vm8, %v1556_v23 }
 0x219   : > { %1744 = vrot.lane.b32.xlu0 %v5593_v15, %s4752_s14  ;;  %v1655_v15 = vld [vmem:[#allocation2 + $0x1a1] sm:$0xff] }
 0x21a   : > { %v1554_v41 = vpop.permute.xlu1 %1553 }
 0x21b   : > { %1621 = vst.msk [vmem:[#allocation3 + $0xe8] sm:$0xff] %vm1591_vm8, %v1554_v41  ;;  %v1689_v16 = vpop.permute.xlu0 %1688 }
 0x21c   : > { %1935 = vrot.lane.b32.xlu1 %v1844_v20, %s4753_s21  ;;  %1785 = vst.msk [vmem:[#allocation3] sm:$0xff] %vm1784_vm9, %v1689_v16 }
 0x21d   : > { %1748 = vrot.lane.b32.xlu0 %v1654_v19, %s4752_s14 }
 0x21e   : > { %v1558_v42 = vpop.permute.xlu1 %1557 }
 0x21f   : > { %1623 = vst.msk [vmem:[#allocation3 + $0xf8] sm:$0xff] %vm1591_vm8, %v1558_v42  ;;  %v1693_v5 = vpop.permute.xlu0 %1692 }
 0x220   : > { %1746 = vrot.lane.b32.xlu1 %v5604_v27, %s4752_s14  ;;  %1787 = vst.msk [vmem:[#allocation3 + $0x10] sm:$0xff] %vm1784_vm9, %v1693_v5 }
 0x221   : > { %1937 = vrot.lane.b32.xlu0 %v5693_v26, %s4753_s21  ;;  %v1848_v26 = vld [vmem:[#allocation2 + $0x1a2] sm:$0xff] }
 0x222   : > { %v1691_v43 = vpop.permute.xlu1 %1690 }
 0x223   : > { %1786 = vst.msk [vmem:[#allocation3 + $0x8] sm:$0xff] %vm1784_vm9, %v1691_v43  ;;  %v1697_v44 = vpop.permute.xlu0 %1696 }
 0x224   : > { %1750 = vrot.lane.b32.xlu1 %v1655_v15, %s4752_s14  ;;  %1789 = vst.msk [vmem:[#allocation3 + $0x20] sm:$0xff] %vm1784_vm9, %v1697_v44 }
 0x225   : > { %1941 = vrot.lane.b32.xlu0 %v1847_v10, %s4753_s21 }
 0x226   : > { %v1695_v46 = vpop.permute.xlu1 %1694 }
 0x227   : > { %1788 = vst.msk [vmem:[#allocation3 + $0x18] sm:$0xff] %vm1784_vm9, %v1695_v46  ;;  %v1701_v27 = vpop.permute.xlu0 %1700 }
 0x228   : > { %1939 = vrot.lane.b32.xlu1 %v5704_v31, %s4753_s21  ;;  %1791 = vst.msk [vmem:[#allocation3 + $0x30] sm:$0xff] %vm1784_vm9, %v1701_v27 }
 0x22a   : > { %v1699_v51 = vpop.permute.xlu1 %1698 }
 0x22b   : > { %1790 = vst.msk [vmem:[#allocation3 + $0x28] sm:$0xff] %vm1784_vm9, %v1699_v51  ;;  %v1705_v3 = vpop.permute.xlu0 %1704 }
 0x22c   : > { %1943 = vrot.lane.b32.xlu1 %v1848_v26, %s4753_s21  ;;  %1793 = vst.msk [vmem:[#allocation3 + $0x40] sm:$0xff] %vm1784_vm9, %v1705_v3 }
 0x22e   : > { %v1703_v53 = vpop.permute.xlu1 %1702 }
 0x22f   : > { %1792 = vst.msk [vmem:[#allocation3 + $0x38] sm:$0xff] %vm1784_vm9, %v1703_v53  ;;  %v1884_v56 = vpop.permute.xlu0 %1883 }
 0x230   : > { %1979 = vst.msk [vmem:[#allocation3 + $0x8] sm:$0xff] %vm1977_vm10, %v1884_v56 }
 0x232   : > { %v1882_v31 = vpop.permute.xlu1 %1881 }
 0x233   : > { %1978 = vst.msk [vmem:[#allocation3] sm:$0xff] %vm1977_vm10, %v1882_v31  ;;  %v1888_v63 = vpop.permute.xlu0 %1887 }
 0x234   : > { %1981 = vst.msk [vmem:[#allocation3 + $0x18] sm:$0xff] %vm1977_vm10, %v1888_v63 }
 0x236   : > { %v1886_v28 = vpop.permute.xlu1 %1885 }
 0x237   : > { %1980 = vst.msk [vmem:[#allocation3 + $0x10] sm:$0xff] %vm1977_vm10, %v1886_v28  ;;  %v1892_v22 = vpop.permute.xlu0 %1891  ;;  %v2011_v21 = vld [vmem:[#allocation3 + $0x8] sm:$0xff] }
 0x238   : > { %1983 = vst.msk [vmem:[#allocation3 + $0x28] sm:$0xff] %vm1977_vm10, %v1892_v22 }
 0x23a   : > { %v1890_v18 = vpop.permute.xlu1 %1889  ;;  %v2010_v17 = vld [vmem:[#allocation3] sm:$0xff] }
 0x23b   : > { %1982 = vst.msk [vmem:[#allocation3 + $0x20] sm:$0xff] %vm1977_vm10, %v1890_v18  ;;  %v2042_v14 = vpack.c.bf16 %v2011_v21, %v2010_v17  ;;  %v1896_v1 = vpop.permute.xlu0 %1895  ;;  %v2013_v13 = vld [vmem:[#allocation3 + $0x18] sm:$0xff] }
 0x23c   : > { %1985 = vst.msk [vmem:[#allocation3 + $0x38] sm:$0xff] %vm1977_vm10, %v1896_v1 }
 0x23d   : > { %4642 = vmatprep.mubr.msk.bf16.mxu0 %vm2078_vm11, %v2042_v14 }
 0x23e   : > { %v1894_v50 = vpop.permute.xlu1 %1893  ;;  %v2012_v9 = vld [vmem:[#allocation3 + $0x10] sm:$0xff] }
 0x23f   : > { %1984 = vst.msk [vmem:[#allocation3 + $0x30] sm:$0xff] %vm1977_vm10, %v1894_v50  ;;  %v2043_v12 = vpack.c.bf16 %v2013_v13, %v2012_v9  ;;  %v2015_v25 = vld [vmem:[#allocation3 + $0x28] sm:$0xff]  ;;  %v1709_v48 = vpop.permute.xlu0 %1708 }
 0x240   : > { %1795 = vst.msk [vmem:[#allocation3 + $0x50] sm:$0xff] %vm1784_vm9, %v1709_v48 }
 0x241   : > { %4643 = vmatmul.mubr.msk.bf16.vlgmr.msra.gmra.mxu0 %vm2078_vm11, %v2043_v12 }
 0x242   : > { %v1707_v4 = vpop.permute.xlu1 %1706  ;;  %v2014_v30 = vld [vmem:[#allocation3 + $0x20] sm:$0xff] }
 0x243   : > { %1794 = vst.msk [vmem:[#allocation3 + $0x48] sm:$0xff] %vm1784_vm9, %v1707_v4  ;;  %v2044_v6 = vpack.c.bf16 %v2015_v25, %v2014_v30  ;;  %v2017_v32 = vld [vmem:[#allocation3 + $0x38] sm:$0xff]  ;;  %v1898_v2 = vpop.permute.xlu0 %1897 }
 0x244   : > { %1986 = vst.msk [vmem:[#allocation3 + $0x40] sm:$0xff] %vm1977_vm10, %v1898_v2 }
 0x245   : > { %4646 = vmatprep.mubr.msk.bf16.mxu0 %vm2078_vm11, %v2044_v6 }
 0x246   : > { %v1711_v38 = vpop.permute.xlu1 %1710  ;;  %v2016_v11 = vld [vmem:[#allocation3 + $0x30] sm:$0xff] }
 0x247   : > { %1796 = vst.msk [vmem:[#allocation3 + $0x58] sm:$0xff] %vm1784_vm9, %v1711_v38  ;;  %v2045_v49 = vpack.c.bf16 %v2017_v32, %v2016_v11  ;;  %v1902_v40 = vpop.permute.xlu0 %1901  ;;  %v2498_v32 = vld [vmem:[#allocation2 + $0x1] sm:$0xff] }
 0x248   : > { %1988 = vst.msk [vmem:[#allocation3 + $0x50] sm:$0xff] %vm1977_vm10, %v1902_v40  ;;  %2562 = vrot.lane.b32.xlu0 %v2498_v32, %s4746_s8 }
 0x249   : > { %4647 = vmatmul.mubr.msk.bf16.gmra.mxu0 %vm2078_vm11, %v2045_v49  ;;  %v2499_v49 = vld [vmem:[#allocation2 + $0x9] sm:$0xff] }
 0x24a   : > { %v1900_v52 = vpop.permute.xlu1 %1899  ;;  %2564 = vrot.lane.b32.xlu1 %v2499_v49, %s4746_s8 }
 0x24b   : > { %1987 = vst.msk [vmem:[#allocation3 + $0x48] sm:$0xff] %vm1977_vm10, %v1900_v52  ;;  %v1713_v54 = vpop.permute.xlu0 %1712  ;;  %v2018_v57 = vld [vmem:[#allocation3 + $0x40] sm:$0xff] }
 0x24c   : > { %1797 = vst.msk [vmem:[#allocation3 + $0x60] sm:$0xff] %vm1784_vm9, %v1713_v54 }
 0x24e   : > { %v1904_v55 = vpop.permute.xlu1 %1903 }
 0x24f   : > { %1989 = vst.msk [vmem:[#allocation3 + $0x58] sm:$0xff] %vm1977_vm10, %v1904_v55  ;;  %v1717_v58 = vpop.permute.xlu0 %1716  ;;  %v2020_v62 = vld [vmem:[#allocation3 + $0x50] sm:$0xff] }
 0x250   : > { %1799 = vst.msk [vmem:[#allocation3 + $0x70] sm:$0xff] %vm1784_vm9, %v1717_v58 }
 0x252   : > { %v1715_v59 = vpop.permute.xlu1 %1714  ;;  %v2019_v60 = vld [vmem:[#allocation3 + $0x48] sm:$0xff] }
 0x253   : > { %1798 = vst.msk [vmem:[#allocation3 + $0x68] sm:$0xff] %vm1784_vm9, %v1715_v59  ;;  %v2046_v61 = vpack.c.bf16 %v2019_v60, %v2018_v57  ;;  %v1906_v0 = vpop.permute.xlu0 %1905 }
 0x254   : > { %1990 = vst.msk [vmem:[#allocation3 + $0x60] sm:$0xff] %vm1977_vm10, %v1906_v0 }
 0x255   : > { %4650 = vmatprep.mubr.msk.bf16.mxu0 %vm2078_vm11, %v2046_v61 }
 0x256   : > { %v1719_v7 = vpop.permute.xlu1 %1718  ;;  %v2021_v8 = vld [vmem:[#allocation3 + $0x58] sm:$0xff] }
 0x257   : > { %1800 = vst.msk [vmem:[#allocation3 + $0x78] sm:$0xff] %vm1784_vm9, %v1719_v7  ;;  %v2047_v45 = vpack.c.bf16 %v2021_v8, %v2020_v62  ;;  %v1910_v47 = vpop.permute.xlu0 %1909 }
 0x258   : > { %1992 = vst.msk [vmem:[#allocation3 + $0x70] sm:$0xff] %vm1977_vm10, %v1910_v47 }
 0x259   : > { %4651 = vmatmul.mubr.msk.bf16.gmra.mxu0 %vm2078_vm11, %v2047_v45 }
 0x25a   : > { %v1908_v39 = vpop.permute.xlu1 %1907 }
 0x25b   : > { %1991 = vst.msk [vmem:[#allocation3 + $0x68] sm:$0xff] %vm1977_vm10, %v1908_v39  ;;  %v1721_v36 = vpop.permute.xlu0 %1720  ;;  %v2022_v37 = vld [vmem:[#allocation3 + $0x60] sm:$0xff] }
 0x25c   : > { %1801 = vst.msk [vmem:[#allocation3 + $0x80] sm:$0xff] %vm1784_vm9, %v1721_v36 }
 0x25e   : > { %v1912_v35 = vpop.permute.xlu1 %1911 }
 0x25f   : > { %1993 = vst.msk [vmem:[#allocation3 + $0x78] sm:$0xff] %vm1977_vm10, %v1912_v35  ;;  %v1725_v29 = vpop.permute.xlu0 %1724  ;;  %v2024_v23 = vld [vmem:[#allocation3 + $0x70] sm:$0xff] }
 0x260   : > { %1803 = vst.msk [vmem:[#allocation3 + $0x90] sm:$0xff] %vm1784_vm9, %v1725_v29  ;;  %v2434_v35 = vld [vmem:[#allocation2] sm:$0xff] }
 0x261   : > { %2466 = vst.msk [vmem:[#allocation3] sm:$0xff] %vm280_vm0, %v2434_v35 }
 0x262   : > { %v1723_v34 = vpop.permute.xlu1 %1722  ;;  %v2023_v33 = vld [vmem:[#allocation3 + $0x68] sm:$0xff] }
 0x263   : > { %1802 = vst.msk [vmem:[#allocation3 + $0x88] sm:$0xff] %vm1784_vm9, %v1723_v34  ;;  %v2048_v24 = vpack.c.bf16 %v2023_v33, %v2022_v37  ;;  %v1914_v20 = vpop.permute.xlu0 %1913  ;;  %v6024_v37 = vld [vmem:[%s7139_s3] ss:$0 sm:$0xff] }
 0x264   : > { %1994 = vst.msk [vmem:[#allocation3 + $0x80] sm:$0xff] %vm1977_vm10, %v1914_v20  ;;  %v6030_v33 = vld [vmem:[%s7140_s4] ss:$0 sm:$0xff] }
 0x265   : > { %4654 = vmatprep.mubr.msk.bf16.mxu0 %vm2078_vm11, %v2048_v24 }
 0x266   : > { %v1727_v41 = vpop.permute.xlu1 %1726  ;;  %v2025_v19 = vld [vmem:[#allocation3 + $0x78] sm:$0xff] }
 0x267   : > { %1804 = vst.msk [vmem:[#allocation3 + $0x98] sm:$0xff] %vm1784_vm9, %v1727_v41  ;;  %v2049_v16 = vpack.c.bf16 %v2025_v19, %v2024_v23  ;;  %v1918_v42 = vpop.permute.xlu0 %1917  ;;  %v2435_v23 = vld [vmem:[#allocation2 + $0x8] sm:$0xff] }
 0x268   : > { %1996 = vst.msk [vmem:[#allocation3 + $0x90] sm:$0xff] %vm1977_vm10, %v1918_v42 }
 0x269   : > { %4655 = vmatmul.mubr.msk.bf16.gmra.mxu0 %vm2078_vm11, %v2049_v16  ;;  %2467 = vst.msk [vmem:[#allocation3 + $0x8] sm:$0xff] %vm280_vm0, %v2435_v23 }
 0x26a   : > { %v1916_v5 = vpop.permute.xlu1 %1915 }
 0x26b   : > { %1995 = vst.msk [vmem:[#allocation3 + $0x88] sm:$0xff] %vm1977_vm10, %v1916_v5  ;;  %v1729_v15 = vpop.permute.xlu0 %1728  ;;  %v2026_v10 = vld [vmem:[#allocation3 + $0x80] sm:$0xff] }
 0x26c   : > { %1805 = vst.msk [vmem:[#allocation3 + $0xa0] sm:$0xff] %vm1784_vm9, %v1729_v15 }
 0x26e   : > { %v1920_v43 = vpop.permute.xlu1 %1919 }
 0x26f   : > { %1997 = vst.msk [vmem:[#allocation3 + $0x98] sm:$0xff] %vm1977_vm10, %v1920_v43  ;;  %v1733_v44 = vpop.permute.xlu0 %1732  ;;  %v2028_v51 = vld [vmem:[#allocation3 + $0x90] sm:$0xff] }
 0x270   : > { %1807 = vst.msk [vmem:[#allocation3 + $0xb0] sm:$0xff] %vm1784_vm9, %v1733_v44 }
 0x272   : > { %v1731_v46 = vpop.permute.xlu1 %1730  ;;  %v2027_v27 = vld [vmem:[#allocation3 + $0x88] sm:$0xff] }
 0x273   : > { %1806 = vst.msk [vmem:[#allocation3 + $0xa8] sm:$0xff] %vm1784_vm9, %v1731_v46  ;;  %v2050_v26 = vpack.c.bf16 %v2027_v27, %v2026_v10  ;;  %v1922_v3 = vpop.permute.xlu0 %1921 }
 0x274   : > { %1998 = vst.msk [vmem:[#allocation3 + $0xa0] sm:$0xff] %vm1977_vm10, %v1922_v3 }
 0x275   : > { %4658 = vmatprep.mubr.msk.bf16.mxu0 %vm2078_vm11, %v2050_v26 }
 0x276   : > { %v1735_v53 = vpop.permute.xlu1 %1734  ;;  %v2029_v56 = vld [vmem:[#allocation3 + $0x98] sm:$0xff] }
 0x277   : > { %1808 = vst.msk [vmem:[#allocation3 + $0xb8] sm:$0xff] %vm1784_vm9, %v1735_v53  ;;  %v2051_v31 = vpack.c.bf16 %v2029_v56, %v2028_v51  ;;  %v1926_v63 = vpop.permute.xlu0 %1925 }
 0x278   : > { %2000 = vst.msk [vmem:[#allocation3 + $0xb0] sm:$0xff] %vm1977_vm10, %v1926_v63 }
 0x279   : > { %4659 = vmatmul.mubr.msk.bf16.gmra.mxu0 %vm2078_vm11, %v2051_v31 }
 0x27a   : > { %v1924_v28 = vpop.permute.xlu1 %1923 }
 0x27b   : > { %1999 = vst.msk [vmem:[#allocation3 + $0xa8] sm:$0xff] %vm1977_vm10, %v1924_v28  ;;  %v1737_v22 = vpop.permute.xlu0 %1736  ;;  %v2030_v18 = vld [vmem:[#allocation3 + $0xa0] sm:$0xff] }
 0x27c   : > { %1809 = vst.msk [vmem:[#allocation3 + $0xc0] sm:$0xff] %vm1784_vm9, %v1737_v22 }
 0x27e   : > { %v1928_v21 = vpop.permute.xlu1 %1927 }
 0x27f   : > { %2001 = vst.msk [vmem:[#allocation3 + $0xb8] sm:$0xff] %vm1977_vm10, %v1928_v21  ;;  %v1741_v17 = vpop.permute.xlu0 %1740  ;;  %v2032_v50 = vld [vmem:[#allocation3 + $0xb0] sm:$0xff] }
 0x280   : > { %1811 = vst.msk [vmem:[#allocation3 + $0xd0] sm:$0xff] %vm1784_vm9, %v1741_v17 }
 0x282   : > { %v1739_v14 = vpop.permute.xlu1 %1738  ;;  %v2031_v1 = vld [vmem:[#allocation3 + $0xa8] sm:$0xff] }
 0x283   : > { %1810 = vst.msk [vmem:[#allocation3 + $0xc8] sm:$0xff] %vm1784_vm9, %v1739_v14  ;;  %v2052_v13 = vpack.c.bf16 %v2031_v1, %v2030_v18  ;;  %v1930_v9 = vpop.permute.xlu0 %1929 }
 0x284   : > { %2002 = vst.msk [vmem:[#allocation3 + $0xc0] sm:$0xff] %vm1977_vm10, %v1930_v9 }
 0x285   : > { %4662 = vmatprep.mubr.msk.bf16.mxu0 %vm2078_vm11, %v2052_v13 }
 0x286   : > { %v1743_v12 = vpop.permute.xlu1 %1742  ;;  %v2033_v25 = vld [vmem:[#allocation3 + $0xb8] sm:$0xff] }
 0x287   : > { %1812 = vst.msk [vmem:[#allocation3 + $0xd8] sm:$0xff] %vm1784_vm9, %v1743_v12  ;;  %v2053_v48 = vpack.c.bf16 %v2033_v25, %v2032_v50  ;;  %v1934_v4 = vpop.permute.xlu0 %1933 }
 0x288   : > { %2004 = vst.msk [vmem:[#allocation3 + $0xd0] sm:$0xff] %vm1977_vm10, %v1934_v4 }
 0x289   : > { %4663 = vmatmul.mubr.msk.bf16.gmra.mxu0 %vm2078_vm11, %v2053_v48 }
 0x28a   : > { %v1932_v30 = vpop.permute.xlu1 %1931 }
 0x28b   : > { %2003 = vst.msk [vmem:[#allocation3 + $0xc8] sm:$0xff] %vm1977_vm10, %v1932_v30  ;;  %v1745_v6 = vpop.permute.xlu0 %1744  ;;  %v2034_v38 = vld [vmem:[#allocation3 + $0xc0] sm:$0xff] }
 0x28c   : > { %1813 = vst.msk [vmem:[#allocation3 + $0xe0] sm:$0xff] %vm1784_vm9, %v1745_v6 }
 0x28e   : > { %v1936_v2 = vpop.permute.xlu1 %1935 }
 0x28f   : > { %2005 = vst.msk [vmem:[#allocation3 + $0xd8] sm:$0xff] %vm1977_vm10, %v1936_v2  ;;  %v1749_v11 = vpop.permute.xlu0 %1748  ;;  %v2036_v55 = vld [vmem:[#allocation3 + $0xd0] sm:$0xff] }
 0x290   : > { %1815 = vst.msk [vmem:[#allocation3 + $0xf0] sm:$0xff] %vm1784_vm9, %v1749_v11 }
 0x292   : > { %v1747_v40 = vpop.permute.xlu1 %1746  ;;  %v2035_v52 = vld [vmem:[#allocation3 + $0xc8] sm:$0xff] }
 0x293   : > { %1814 = vst.msk [vmem:[#allocation3 + $0xe8] sm:$0xff] %vm1784_vm9, %v1747_v40  ;;  %v2054_v54 = vpack.c.bf16 %v2035_v52, %v2034_v38  ;;  %v1938_v57 = vpop.permute.xlu0 %1937 }
 0x294   : > { %2006 = vst.msk [vmem:[#allocation3 + $0xe0] sm:$0xff] %vm1977_vm10, %v1938_v57 }
 0x295   : > { %4666 = vmatprep.mubr.msk.bf16.mxu0 %vm2078_vm11, %v2054_v54 }
 0x296   : > { %v1751_v58 = vpop.permute.xlu1 %1750  ;;  %v2037_v59 = vld [vmem:[#allocation3 + $0xd8] sm:$0xff] }
 0x297   : > { %1816 = vst.msk [vmem:[#allocation3 + $0xf8] sm:$0xff] %vm1784_vm9, %v1751_v58  ;;  %v2055_v60 = vpack.c.bf16 %v2037_v59, %v2036_v55  ;;  %v1942_v61 = vpop.permute.xlu0 %1941 }
 0x298   : > { %2008 = vst.msk [vmem:[#allocation3 + $0xf0] sm:$0xff] %vm1977_vm10, %v1942_v61 }
 0x299   : > { %4667 = vmatmul.mubr.msk.bf16.gmra.mxu0 %vm2078_vm11, %v2055_v60 }
 0x29a   : > { %v1940_v62 = vpop.permute.xlu1 %1939 }
 0x29b   : > { %2007 = vst.msk [vmem:[#allocation3 + $0xe8] sm:$0xff] %vm1977_vm10, %v1940_v62  ;;  %v2038_v7 = vld [vmem:[#allocation3 + $0xe0] sm:$0xff] }
 0x29e   : > { %v1944_v0 = vpop.permute.xlu1 %1943 }
 0x29f   : > { %2009 = vst.msk [vmem:[#allocation3 + $0xf8] sm:$0xff] %vm1977_vm10, %v1944_v0  ;;  %v2040_v47 = vld [vmem:[#allocation3 + $0xf0] sm:$0xff] }
 0x2a2   : > { %v2039_v8 = vld [vmem:[#allocation3 + $0xe8] sm:$0xff] }
 0x2a3   : > { %v2056_v45 = vpack.c.bf16 %v2039_v8, %v2038_v7 }
 0x2a5   : > { %4670 = vmatprep.mubr.msk.bf16.mxu0 %vm2078_vm11, %v2056_v45 }
 0x2a6   : > { %v2041_v39 = vld [vmem:[#allocation3 + $0xf8] sm:$0xff] }
 0x2a7   : > { %v2057_v36 = vpack.c.bf16 %v2041_v39, %v2040_v47 }
 0x2a9   : > { %4671 = vmatmul.mubr.msk.bf16.gmra.mxu0 %vm2078_vm11, %v2057_v36 }
 0x2ba   : > { %v2563_v29 = vpop.permute.xlu0 %2562 }
 0x2bb   : > { %2658 = vst.msk [vmem:[#allocation3] sm:$0xff] %vm625_vm2, %v2563_v29 }
 0x2bc   : > { %v2565_v16 = vpop.permute.xlu1 %2564 }
 0x2bd   : > { %2659 = vst.msk [vmem:[#allocation3 + $0x8] sm:$0xff] %vm625_vm2, %v2565_v16 }
 0x301   : > { %v4644_v34 = vpop.f32.mrf.mxu0 }
 0x302   : > { %v2301_v24 = vmul.f32 %v4644_v34, %v6024_v37 }
 0x303   : > { %v2165_v20 = vpop.f32.mrf.mxu0 }
 0x304   : > { %v2340_v41 = vadd.f32 %v6030_v33, %v2301_v24  ;;  %v2299_v19 = vmul.f32 %v6024_v37, %v2165_v20 }
 0x305   : > { %v4645_v42 = vpop.f32.mrf.mxu0 }
 0x306   : > { %v2372_v5 = vmax.f32 %v2340_v41, 0.0  ;;  %v2338_v15 = vadd.f32 %v6030_v33, %v2299_v19  ;;  %v2302_v43 = vmul.f32 %v4645_v42, %v6024_v37 }
 0x307   : > { %v2168_v10 = vpop.f32.mrf.mxu0 }
 0x308   : > { %2404 = vst.msk [vmem:[#allocation2 + $0x31] sm:$0xff] %vm280_vm0, %v2372_v5  ;;  %v2370_v44 = vmax.f32 %v2338_v15, 0.0  ;;  %v2341_v46 = vadd.f32 %v6030_v33, %v2302_v43  ;;  %v2300_v27 = vmul.f32 %v6024_v37, %v2168_v10 }
 0x309   : > { %v4648_v26 = vpop.f32.mrf.mxu0 }
 0x30a   : > { %2402 = vst.msk [vmem:[#allocation2 + $0x19] sm:$0xff] %vm280_vm0, %v2370_v44  ;;  %v2373_v51 = vmax.f32 %v2341_v46, 0.0  ;;  %v2339_v3 = vadd.f32 %v6030_v33, %v2300_v27  ;;  %v2305_v53 = vmul.f32 %v4648_v26, %v6024_v37 }
 0x30b   : > { %v2181_v56 = vpop.f32.mrf.mxu0 }
 0x30c   : > { %2405 = vst.msk [vmem:[#allocation2 + $0x39] sm:$0xff] %vm280_vm0, %v2373_v51  ;;  %v2371_v31 = vmax.f32 %v2339_v3, 0.0  ;;  %v2344_v63 = vadd.f32 %v6030_v33, %v2305_v53  ;;  %v2303_v28 = vmul.f32 %v6024_v37, %v2181_v56 }
 0x30d   : > { %v4649_v22 = vpop.f32.mrf.mxu0 }
 0x30e   : > { %2403 = vst.msk [vmem:[#allocation2 + $0x21] sm:$0xff] %vm280_vm0, %v2371_v31  ;;  %v2376_v21 = vmax.f32 %v2344_v63, 0.0  ;;  %v2342_v18 = vadd.f32 %v6030_v33, %v2303_v28  ;;  %v2306_v17 = vmul.f32 %v4649_v22, %v6024_v37 }
 0x30f   : > { %v2184_v14 = vpop.f32.mrf.mxu0  ;;  %v6052_v1 = vld [vmem:[#allocation2 + $0x30] sm:$0xff] }
 0x310   : > { %2408 = vst.msk [vmem:[#allocation2 + $0x61] sm:$0xff] %vm280_vm0, %v2376_v21  ;;  %v2374_v13 = vmax.f32 %v2342_v18, 0.0  ;;  %v2345_v50 = vadd.f32 %v6030_v33, %v2306_v17  ;;  %v2304_v9 = vmul.f32 %v6024_v37, %v2184_v14  ;;  %2470 = vst.msk [vmem:[#allocation3 + $0x20] sm:$0xff] %vm280_vm0, %v6052_v1  ;;  %v6072_v32 = vld [vmem:[#allocation2 + $0x31] sm:$0xff] }
 0x311   : > { %v6059_v12 = vld [vmem:[#allocation2 + $0x19] sm:$0xff] }
 0x312   : > { %v6061_v25 = vld [vmem:[#allocation2 + $0x18] sm:$0xff]  ;;  %2406 = vst.msk [vmem:[#allocation2 + $0x49] sm:$0xff] %vm280_vm0, %v2374_v13  ;;  %v2377_v48 = vmax.f32 %v2345_v50, 0.0  ;;  %v2343_v4 = vadd.f32 %v6030_v33, %v2304_v9  ;;  %2566 = vrot.lane.b32.xlu0 %v6059_v12, %s4746_s8 }
 0x313   : > { %2468 = vst.msk [vmem:[#allocation3 + $0x10] sm:$0xff] %vm280_vm0, %v6061_v25  ;;  %v6070_v6 = vld [vmem:[#allocation2 + $0x38] sm:$0xff] }
 0x314   : > { %2409 = vst.msk [vmem:[#allocation2 + $0x69] sm:$0xff] %vm280_vm0, %v2377_v48  ;;  %v2375_v30 = vmax.f32 %v2343_v4, 0.0  ;;  %2471 = vst.msk [vmem:[#allocation3 + $0x28] sm:$0xff] %vm280_vm0, %v6070_v6  ;;  %v6091_v40 = vld [vmem:[#allocation2 + $0x39] sm:$0xff] }
 0x315   : > { %v6074_v2 = vld [vmem:[#allocation2 + $0x21] sm:$0xff] }
 0x316   : > { %2407 = vst.msk [vmem:[#allocation2 + $0x51] sm:$0xff] %vm280_vm0, %v2375_v30  ;;  %2570 = vrot.lane.b32.xlu0 %v6072_v32, %s4746_s8  ;;  %2568 = vrot.lane.b32.xlu1 %v6074_v2, %s4746_s8  ;;  %v6083_v38 = vld [vmem:[#allocation2 + $0x20] sm:$0xff] }
 0x317   : > { %2469 = vst.msk [vmem:[#allocation3 + $0x18] sm:$0xff] %vm280_vm0, %v6083_v38  ;;  %v6087_v11 = vld [vmem:[#allocation2 + $0x60] sm:$0xff] }
 0x318   : > { %2474 = vst.msk [vmem:[#allocation3 + $0x40] sm:$0xff] %vm280_vm0, %v6087_v11  ;;  %v6108_v62 = vld [vmem:[#allocation2 + $0x61] sm:$0xff] }
 0x319   : > { %v4652_v49 = vpop.f32.mrf.mxu0  ;;  %v6093_v52 = vld [vmem:[#allocation2 + $0x49] sm:$0xff] }
 0x31a   : > { %v6095_v54 = vld [vmem:[#allocation2 + $0x48] sm:$0xff]  ;;  %v2309_v55 = vmul.f32 %v4652_v49, %v6024_v37  ;;  %2572 = vrot.lane.b32.xlu1 %v6091_v40, %s4746_s8  ;;  %2574 = vrot.lane.b32.xlu0 %v6093_v52, %s4746_s8 }
 0x31b   : > { %2472 = vst.msk [vmem:[#allocation3 + $0x30] sm:$0xff] %vm280_vm0, %v6095_v54  ;;  %v2197_v57 = vpop.f32.mrf.mxu0  ;;  %v6106_v60 = vld [vmem:[#allocation2 + $0x68] sm:$0xff] }
 0x31c   : > { %v2348_v58 = vadd.f32 %v6030_v33, %v2309_v55  ;;  %v2307_v59 = vmul.f32 %v6024_v37, %v2197_v57  ;;  %2475 = vst.msk [vmem:[#allocation3 + $0x48] sm:$0xff] %vm280_vm0, %v6106_v60  ;;  %v6127_v34 = vld [vmem:[#allocation2 + $0x69] sm:$0xff] }
 0x31d   : > { %v4653_v61 = vpop.f32.mrf.mxu0  ;;  %v6110_v0 = vld [vmem:[#allocation2 + $0x51] sm:$0xff] }
 0x31e   : > { %v2380_v7 = vmax.f32 %v2348_v58, 0.0  ;;  %v2346_v8 = vadd.f32 %v6030_v33, %v2307_v59  ;;  %v2310_v45 = vmul.f32 %v4653_v61, %v6024_v37  ;;  %2578 = vrot.lane.b32.xlu0 %v6108_v62, %s4746_s8  ;;  %2576 = vrot.lane.b32.xlu1 %v6110_v0, %s4746_s8  ;;  %v6120_v47 = vld [vmem:[#allocation2 + $0x50] sm:$0xff] }
 0x31f   : > { %v2200_v39 = vpop.f32.mrf.mxu0  ;;  %2473 = vst.msk [vmem:[#allocation3 + $0x38] sm:$0xff] %vm280_vm0, %v6120_v47 }
 0x320   : > { %2412 = vst.msk [vmem:[#allocation2 + $0x91] sm:$0xff] %vm280_vm0, %v2380_v7  ;;  %v2378_v36 = vmax.f32 %v2346_v8, 0.0  ;;  %v2349_v35 = vadd.f32 %v6030_v33, %v2310_v45  ;;  %v2308_v29 = vmul.f32 %v6024_v37, %v2200_v39 }
 0x322   : > { %2410 = vst.msk [vmem:[#allocation2 + $0x79] sm:$0xff] %vm280_vm0, %v2378_v36  ;;  %v2381_v24 = vmax.f32 %v2349_v35, 0.0  ;;  %v2347_v23 = vadd.f32 %v6030_v33, %v2308_v29  ;;  %2580 = vrot.lane.b32.xlu1 %v6127_v34, %s4746_s8 }
 0x324   : > { %2413 = vst.msk [vmem:[#allocation2 + $0x99] sm:$0xff] %vm280_vm0, %v2381_v24  ;;  %v2379_v20 = vmax.f32 %v2347_v23, 0.0 }
 0x326   : > { %2411 = vst.msk [vmem:[#allocation2 + $0x81] sm:$0xff] %vm280_vm0, %v2379_v20 }
 0x327   : > { %v6135_v41 = vld [vmem:[#allocation2 + $0x90] sm:$0xff] }
 0x328   : > { %2478 = vst.msk [vmem:[#allocation3 + $0x60] sm:$0xff] %vm280_vm0, %v6135_v41  ;;  %v2510_v27 = vld [vmem:[#allocation2 + $0x91] sm:$0xff] }
 0x329   : > { %v4656_v19 = vpop.f32.mrf.mxu0  ;;  %v6139_v16 = vld [vmem:[#allocation2 + $0x79] sm:$0xff] }
 0x32a   : > { %v6141_v42 = vld [vmem:[#allocation2 + $0x78] sm:$0xff]  ;;  %v2313_v5 = vmul.f32 %v4656_v19, %v6024_v37  ;;  %2582 = vrot.lane.b32.xlu0 %v6139_v16, %s4746_s8 }
 0x32b   : > { %2476 = vst.msk [vmem:[#allocation3 + $0x50] sm:$0xff] %vm280_vm0, %v6141_v42  ;;  %v2213_v15 = vpop.f32.mrf.mxu0  ;;  %v6150_v44 = vld [vmem:[#allocation2 + $0x98] sm:$0xff] }
 0x32c   : > { %v2352_v43 = vadd.f32 %v6030_v33, %v2313_v5  ;;  %v2311_v10 = vmul.f32 %v6024_v37, %v2213_v15  ;;  %2479 = vst.msk [vmem:[#allocation3 + $0x68] sm:$0xff] %vm280_vm0, %v6150_v44  ;;  %v2511_v21 = vld [vmem:[#allocation2 + $0x99] sm:$0xff] }
 0x32d   : > { %v4657_v46 = vpop.f32.mrf.mxu0  ;;  %v6152_v26 = vld [vmem:[#allocation2 + $0x81] sm:$0xff] }
 0x32e   : > { %v2384_v51 = vmax.f32 %v2352_v43, 0.0  ;;  %v2350_v3 = vadd.f32 %v6030_v33, %v2311_v10  ;;  %v2314_v53 = vmul.f32 %v4657_v46, %v6024_v37  ;;  %2586 = vrot.lane.b32.xlu0 %v2510_v27, %s4746_s8  ;;  %2584 = vrot.lane.b32.xlu1 %v6152_v26, %s4746_s8  ;;  %v6161_v56 = vld [vmem:[#allocation2 + $0x80] sm:$0xff] }
 0x32f   : > { %v2216_v31 = vpop.f32.mrf.mxu0  ;;  %2477 = vst.msk [vmem:[#allocation3 + $0x58] sm:$0xff] %vm280_vm0, %v6161_v56 }
 0x330   : > { %2416 = vst.msk [vmem:[#allocation2 + $0xc1] sm:$0xff] %vm280_vm0, %v2384_v51  ;;  %v2382_v63 = vmax.f32 %v2350_v3, 0.0  ;;  %v2353_v28 = vadd.f32 %v6030_v33, %v2314_v53  ;;  %v2312_v22 = vmul.f32 %v6024_v37, %v2216_v31 }
 0x332   : > { %2414 = vst.msk [vmem:[#allocation2 + $0xa9] sm:$0xff] %vm280_vm0, %v2382_v63  ;;  %v2385_v18 = vmax.f32 %v2353_v28, 0.0  ;;  %v2351_v17 = vadd.f32 %v6030_v33, %v2312_v22  ;;  %2588 = vrot.lane.b32.xlu1 %v2511_v21, %s4746_s8 }
 0x334   : > { %2417 = vst.msk [vmem:[#allocation2 + $0xc9] sm:$0xff] %vm280_vm0, %v2385_v18  ;;  %v2383_v14 = vmax.f32 %v2351_v17, 0.0 }
 0x336   : > { %2415 = vst.msk [vmem:[#allocation2 + $0xb1] sm:$0xff] %vm280_vm0, %v2383_v14 }
 0x337   : > { %v6173_v13 = vld [vmem:[#allocation2 + $0xc0] sm:$0xff] }
 0x338   : > { %2482 = vst.msk [vmem:[#allocation3 + $0x80] sm:$0xff] %vm280_vm0, %v6173_v13  ;;  %v2514_v59 = vld [vmem:[#allocation2 + $0xc1] sm:$0xff] }
 0x339   : > { %v4660_v50 = vpop.f32.mrf.mxu0  ;;  %v2512_v9 = vld [vmem:[#allocation2 + $0xa9] sm:$0xff] }
 0x33a   : > { %v6177_v48 = vld [vmem:[#allocation2 + $0xa8] sm:$0xff]  ;;  %v2317_v4 = vmul.f32 %v4660_v50, %v6024_v37  ;;  %2590 = vrot.lane.b32.xlu0 %v2512_v9, %s4746_s8 }
 0x33b   : > { %2480 = vst.msk [vmem:[#allocation3 + $0x70] sm:$0xff] %vm280_vm0, %v6177_v48  ;;  %v2229_v30 = vpop.f32.mrf.mxu0  ;;  %v6185_v57 = vld [vmem:[#allocation2 + $0xc8] sm:$0xff] }
 0x33c   : > { %v2356_v49 = vadd.f32 %v6030_v33, %v2317_v4  ;;  %v2315_v55 = vmul.f32 %v6024_v37, %v2229_v30  ;;  %2483 = vst.msk [vmem:[#allocation3 + $0x88] sm:$0xff] %vm280_vm0, %v6185_v57  ;;  %v2515_v23 = vld [vmem:[#allocation2 + $0xc9] sm:$0xff] }
 0x33d   : > { %v4661_v58 = vpop.f32.mrf.mxu0  ;;  %v2513_v61 = vld [vmem:[#allocation2 + $0xb1] sm:$0xff] }
 0x33e   : > { %v2388_v7 = vmax.f32 %v2356_v49, 0.0  ;;  %v2354_v8 = vadd.f32 %v6030_v33, %v2315_v55  ;;  %v2318_v45 = vmul.f32 %v4661_v58, %v6024_v37  ;;  %2594 = vrot.lane.b32.xlu0 %v2514_v59, %s4746_s8  ;;  %2592 = vrot.lane.b32.xlu1 %v2513_v61, %s4746_s8  ;;  %v6193_v39 = vld [vmem:[#allocation2 + $0xb0] sm:$0xff] }
 0x33f   : > { %v2232_v36 = vpop.f32.mrf.mxu0  ;;  %2481 = vst.msk [vmem:[#allocation3 + $0x78] sm:$0xff] %vm280_vm0, %v6193_v39 }
 0x340   : > { %2420 = vst.msk [vmem:[#allocation2 + $0xf1] sm:$0xff] %vm280_vm0, %v2388_v7  ;;  %v2386_v35 = vmax.f32 %v2354_v8, 0.0  ;;  %v2357_v29 = vadd.f32 %v6030_v33, %v2318_v45  ;;  %v2316_v24 = vmul.f32 %v6024_v37, %v2232_v36 }
 0x342   : > { %2418 = vst.msk [vmem:[#allocation2 + $0xd9] sm:$0xff] %vm280_vm0, %v2386_v35  ;;  %v2389_v20 = vmax.f32 %v2357_v29, 0.0  ;;  %v2355_v19 = vadd.f32 %v6030_v33, %v2316_v24  ;;  %2596 = vrot.lane.b32.xlu1 %v2515_v23, %s4746_s8 }
 0x344   : > { %2421 = vst.msk [vmem:[#allocation2 + $0xf9] sm:$0xff] %vm280_vm0, %v2389_v20  ;;  %v2387_v5 = vmax.f32 %v2355_v19, 0.0 }
 0x346   : > { %2419 = vst.msk [vmem:[#allocation2 + $0xe1] sm:$0xff] %vm280_vm0, %v2387_v5 }
 0x347   : > { %v6205_v15 = vld [vmem:[#allocation2 + $0xf0] sm:$0xff] }
 0x348   : > { %2486 = vst.msk [vmem:[#allocation3 + $0xa0] sm:$0xff] %vm280_vm0, %v6205_v15  ;;  %v2518_v28 = vld [vmem:[#allocation2 + $0xf1] sm:$0xff] }
 0x349   : > { %v4664_v43 = vpop.f32.mrf.mxu0  ;;  %v2516_v10 = vld [vmem:[#allocation2 + $0xd9] sm:$0xff] }
 0x34a   : > { %v6209_v46 = vld [vmem:[#allocation2 + $0xd8] sm:$0xff]  ;;  %v2321_v27 = vmul.f32 %v4664_v43, %v6024_v37  ;;  %2598 = vrot.lane.b32.xlu0 %v2516_v10, %s4746_s8 }
 0x34b   : > { %2484 = vst.msk [vmem:[#allocation3 + $0x90] sm:$0xff] %vm280_vm0, %v6209_v46  ;;  %v2245_v51 = vpop.f32.mrf.mxu0  ;;  %v6217_v31 = vld [vmem:[#allocation2 + $0xf8] sm:$0xff] }
 0x34c   : > { %v2360_v3 = vadd.f32 %v6030_v33, %v2321_v27  ;;  %v2319_v53 = vmul.f32 %v6024_v37, %v2245_v51  ;;  %2487 = vst.msk [vmem:[#allocation3 + $0xa8] sm:$0xff] %vm280_vm0, %v6217_v31  ;;  %v2519_v49 = vld [vmem:[#allocation2 + $0xf9] sm:$0xff] }
 0x34d   : > { %v4665_v63 = vpop.f32.mrf.mxu0  ;;  %v2517_v22 = vld [vmem:[#allocation2 + $0xe1] sm:$0xff] }
 0x34e   : > { %v2392_v21 = vmax.f32 %v2360_v3, 0.0  ;;  %v2358_v18 = vadd.f32 %v6030_v33, %v2319_v53  ;;  %v2322_v17 = vmul.f32 %v4665_v63, %v6024_v37  ;;  %2602 = vrot.lane.b32.xlu0 %v2518_v28, %s4746_s8  ;;  %2600 = vrot.lane.b32.xlu1 %v2517_v22, %s4746_s8  ;;  %v6225_v14 = vld [vmem:[#allocation2 + $0xe0] sm:$0xff] }
 0x34f   : > { %v2248_v50 = vpop.f32.mrf.mxu0  ;;  %2485 = vst.msk [vmem:[#allocation3 + $0x98] sm:$0xff] %vm280_vm0, %v6225_v14 }
 0x350   : > { %2424 = vst.msk [vmem:[#allocation2 + $0x121] sm:$0xff] %vm280_vm0, %v2392_v21  ;;  %v2390_v9 = vmax.f32 %v2358_v18, 0.0  ;;  %v2361_v4 = vadd.f32 %v6030_v33, %v2322_v17  ;;  %v2320_v30 = vmul.f32 %v6024_v37, %v2248_v50 }
 0x352   : > { %2422 = vst.msk [vmem:[#allocation2 + $0x109] sm:$0xff] %vm280_vm0, %v2390_v9  ;;  %v2393_v55 = vmax.f32 %v2361_v4, 0.0  ;;  %v2359_v58 = vadd.f32 %v6030_v33, %v2320_v30  ;;  %2604 = vrot.lane.b32.xlu1 %v2519_v49, %s4746_s8 }
 0x354   : > { %2425 = vst.msk [vmem:[#allocation2 + $0x129] sm:$0xff] %vm280_vm0, %v2393_v55  ;;  %v2391_v59 = vmax.f32 %v2359_v58, 0.0 }
 0x356   : > { %2423 = vst.msk [vmem:[#allocation2 + $0x111] sm:$0xff] %vm280_vm0, %v2391_v59 }
 0x357   : > { %v6237_v61 = vld [vmem:[#allocation2 + $0x120] sm:$0xff] }
 0x358   : > { %2490 = vst.msk [vmem:[#allocation3 + $0xc0] sm:$0xff] %vm280_vm0, %v6237_v61  ;;  %v2522_v19 = vld [vmem:[#allocation2 + $0x121] sm:$0xff] }
 0x359   : > { %v4668_v7 = vpop.f32.mrf.mxu0  ;;  %v2520_v8 = vld [vmem:[#allocation2 + $0x109] sm:$0xff] }
 0x35a   : > { %v6241_v45 = vld [vmem:[#allocation2 + $0x108] sm:$0xff]  ;;  %v2325_v36 = vmul.f32 %v4668_v7, %v6024_v37  ;;  %2606 = vrot.lane.b32.xlu0 %v2520_v8, %s4746_s8 }
 0x35b   : > { %2488 = vst.msk [vmem:[#allocation3 + $0xb0] sm:$0xff] %vm280_vm0, %v6241_v45  ;;  %v2261_v35 = vpop.f32.mrf.mxu0  ;;  %v6249_v23 = vld [vmem:[#allocation2 + $0x128] sm:$0xff] }
 0x35c   : > { %v2364_v29 = vadd.f32 %v6030_v33, %v2325_v36  ;;  %v2323_v24 = vmul.f32 %v6024_v37, %v2261_v35  ;;  %2491 = vst.msk [vmem:[#allocation3 + $0xc8] sm:$0xff] %vm280_vm0, %v6249_v23  ;;  %v2523_v22 = vld [vmem:[#allocation2 + $0x129] sm:$0xff] }
 0x35d   : > { %v4669_v20 = vpop.f32.mrf.mxu0  ;;  %v2521_v5 = vld [vmem:[#allocation2 + $0x111] sm:$0xff] }
 0x35e   : > { %v2396_v43 = vmax.f32 %v2364_v29, 0.0  ;;  %v2362_v10 = vadd.f32 %v6030_v33, %v2323_v24  ;;  %v2326_v27 = vmul.f32 %v4669_v20, %v6024_v37  ;;  %2610 = vrot.lane.b32.xlu0 %v2522_v19, %s4746_s8  ;;  %2608 = vrot.lane.b32.xlu1 %v2521_v5, %s4746_s8  ;;  %v6257_v51 = vld [vmem:[#allocation2 + $0x110] sm:$0xff] }
 0x35f   : > { %v2264_v3 = vpop.f32.mrf.mxu0  ;;  %2489 = vst.msk [vmem:[#allocation3 + $0xb8] sm:$0xff] %vm280_vm0, %v6257_v51 }
 0x360   : > { %2428 = vst.msk [vmem:[#allocation2 + $0x151] sm:$0xff] %vm280_vm0, %v2396_v43  ;;  %v2394_v53 = vmax.f32 %v2362_v10, 0.0  ;;  %v2365_v63 = vadd.f32 %v6030_v33, %v2326_v27  ;;  %v2324_v28 = vmul.f32 %v6024_v37, %v2264_v3 }
 0x362   : > { %2426 = vst.msk [vmem:[#allocation2 + $0x139] sm:$0xff] %vm280_vm0, %v2394_v53  ;;  %v2397_v21 = vmax.f32 %v2365_v63, 0.0  ;;  %v2363_v18 = vadd.f32 %v6030_v33, %v2324_v28  ;;  %2612 = vrot.lane.b32.xlu1 %v2523_v22, %s4746_s8 }
 0x364   : > { %2429 = vst.msk [vmem:[#allocation2 + $0x159] sm:$0xff] %vm280_vm0, %v2397_v21  ;;  %v2395_v17 = vmax.f32 %v2363_v18, 0.0 }
 0x366   : > { %2427 = vst.msk [vmem:[#allocation2 + $0x141] sm:$0xff] %vm280_vm0, %v2395_v17  ;;  %v2691_v17 = vld [vmem:[#allocation2 + $0xa] sm:$0xff] }
 0x367   : > { %v2462_v50 = vld [vmem:[#allocation2 + $0x150] sm:$0xff] }
 0x368   : > { %2494 = vst.msk [vmem:[#allocation3 + $0xe0] sm:$0xff] %vm280_vm0, %v2462_v50  ;;  %v2526_v36 = vld [vmem:[#allocation2 + $0x151] sm:$0xff]  ;;  %v6300_v50 = vld [vmem:[#allocation2 + $0x1a] sm:$0xff] }
 0x369   : > { %v4672_v9 = vpop.f32.mrf.mxu0  ;;  %v2524_v4 = vld [vmem:[#allocation2 + $0x139] sm:$0xff] }
 0x36a   : > { %v6270_v30 = vld [vmem:[#allocation2 + $0x138] sm:$0xff]  ;;  %v2329_v49 = vmul.f32 %v4672_v9, %v6024_v37  ;;  %2614 = vrot.lane.b32.xlu0 %v2524_v4, %s4746_s8 }
 0x36b   : > { %2492 = vst.msk [vmem:[#allocation3 + $0xd0] sm:$0xff] %vm280_vm0, %v6270_v30  ;;  %v2277_v55 = vpop.f32.mrf.mxu0  ;;  %v2463_v7 = vld [vmem:[#allocation2 + $0x158] sm:$0xff] }
 0x36c   : > { %v2368_v58 = vadd.f32 %v6030_v33, %v2329_v49  ;;  %v2327_v59 = vmul.f32 %v6024_v37, %v2277_v55  ;;  %2495 = vst.msk [vmem:[#allocation3 + $0xe8] sm:$0xff] %vm280_vm0, %v2463_v7  ;;  %v2527_v3 = vld [vmem:[#allocation2 + $0x159] sm:$0xff]  ;;  %v6308_v49 = vld [vmem:[#allocation2 + $0x22] sm:$0xff] }
 0x36d   : > { %v4673_v8 = vpop.f32.mrf.mxu0  ;;  %v2525_v35 = vld [vmem:[#allocation2 + $0x141] sm:$0xff]  ;;  %v6306_v4 = vld [vmem:[#allocation2 + $0x32] sm:$0xff] }
 0x36e   : > { %v2400_v29 = vmax.f32 %v2368_v58, 0.0  ;;  %v2366_v24 = vadd.f32 %v6030_v33, %v2327_v59  ;;  %v2330_v20 = vmul.f32 %v4673_v8, %v6024_v37  ;;  %2618 = vrot.lane.b32.xlu0 %v2526_v36, %s4746_s8  ;;  %2616 = vrot.lane.b32.xlu1 %v2525_v35, %s4746_s8  ;;  %v6283_v19 = vld [vmem:[#allocation2 + $0x140] sm:$0xff]  ;;  %v6316_v59 = vld [vmem:[#allocation2 + $0x4a] sm:$0xff] }
 0x36f   : > { %v2280_v5 = vpop.f32.mrf.mxu0  ;;  %2493 = vst.msk [vmem:[#allocation3 + $0xd8] sm:$0xff] %vm280_vm0, %v6283_v19  ;;  %v6318_v7 = vld [vmem:[#allocation2 + $0x3a] sm:$0xff]  ;;  %v6326_v35 = vld [vmem:[#allocation2 + $0x62] sm:$0xff] }
 0x370   : > { %2432 = vst.msk [vmem:[#allocation2 + $0x181] sm:$0xff] %vm280_vm0, %v2400_v29  ;;  %v2398_v43 = vmax.f32 %v2366_v24, 0.0  ;;  %v2369_v10 = vadd.f32 %v6030_v33, %v2330_v20  ;;  %v2328_v27 = vmul.f32 %v6024_v37, %v2280_v5  ;;  %v2690_v37 = vld [vmem:[#allocation2 + $0x2] sm:$0xff]  ;;  %v6328_v29 = vld [vmem:[#allocation2 + $0x52] sm:$0xff]  ;;  %v6336_v5 = vld [vmem:[#allocation2 + $0x7a] sm:$0xff] }
 0x372   : > { %2430 = vst.msk [vmem:[#allocation2 + $0x169] sm:$0xff] %vm280_vm0, %v2398_v43  ;;  %v2401_v53 = vmax.f32 %v2369_v10, 0.0  ;;  %v2367_v63 = vadd.f32 %v6030_v33, %v2328_v27  ;;  %2620 = vrot.lane.b32.xlu1 %v2527_v3, %s4746_s8  ;;  %v6338_v43 = vld [vmem:[#allocation2 + $0x6a] sm:$0xff]  ;;  %v6345_v27 = vld [vmem:[#allocation2 + $0x92] sm:$0xff]  ;;  %v6347_v3 = vld [vmem:[#allocation2 + $0x82] sm:$0xff] }
 0x374   : > { %2433 = vst.msk [vmem:[#allocation2 + $0x189] sm:$0xff] %vm280_vm0, %v2401_v53  ;;  %v2399_v28 = vmax.f32 %v2367_v63, 0.0  ;;  %v6353_v53 = vld [vmem:[#allocation2 + $0xaa] sm:$0xff]  ;;  %v6355_v63 = vld [vmem:[#allocation2 + $0x9a] sm:$0xff] }
 0x376   : > { %2431 = vst.msk [vmem:[#allocation2 + $0x171] sm:$0xff] %vm280_vm0, %v2399_v28 }
 0x379   : > { %v2528_v22 = vld [vmem:[#allocation2 + $0x169] sm:$0xff] }
 0x37a   : > { %v2464_v21 = vld [vmem:[#allocation2 + $0x168] sm:$0xff]  ;;  %2622 = vrot.lane.b32.xlu0 %v2528_v22, %s4746_s8 }
 0x37b   : > { %2496 = vst.msk [vmem:[#allocation3 + $0xf0] sm:$0xff] %vm280_vm0, %v2464_v21  ;;  %v6362_v22 = vld [vmem:[#allocation2 + $0xc2] sm:$0xff]  ;;  %v6364_v21 = vld [vmem:[#allocation2 + $0xb2] sm:$0xff] }
 0x37d   : > { %v2529_v18 = vld [vmem:[#allocation2 + $0x171] sm:$0xff] }
 0x37e   : > { %2754 = vrot.lane.b32.xlu0 %v2690_v37, %s4747_s9  ;;  %2624 = vrot.lane.b32.xlu1 %v2529_v18, %s4746_s8  ;;  %v2465_v33 = vld [vmem:[#allocation2 + $0x170] sm:$0xff] }
 0x37f   : > { %2497 = vst.msk [vmem:[#allocation3 + $0xf8] sm:$0xff] %vm280_vm0, %v2465_v33  ;;  %v6372_v33 = vld [vmem:[#allocation2 + $0xda] sm:$0xff] }
 0x382   : > { %2758 = vrot.lane.b32.xlu0 %v6300_v50, %s4747_s9  ;;  %2756 = vrot.lane.b32.xlu1 %v2691_v17, %s4747_s9  ;;  %v6374_v17 = vld [vmem:[#allocation2 + $0xca] sm:$0xff] }
 0x384   : > { %v2567_v9 = vpop.permute.xlu0 %2566 }
 0x385   : > { %2660 = vst.msk [vmem:[#allocation3 + $0x10] sm:$0xff] %vm625_vm2, %v2567_v9 }
 0x386   : > { %2762 = vrot.lane.b32.xlu0 %v6306_v4, %s4747_s9  ;;  %2760 = vrot.lane.b32.xlu1 %v6308_v49, %s4747_s9 }
 0x388   : > { %v2571_v55 = vpop.permute.xlu0 %2570  ;;  %v2569_v58 = vpop.permute.xlu1 %2568 }
 0x389   : > { %2662 = vst.msk [vmem:[#allocation3 + $0x20] sm:$0xff] %vm625_vm2, %v2571_v55  ;;  %2661 = vst.msk [vmem:[#allocation3 + $0x18] sm:$0xff] %vm625_vm2, %v2569_v58  ;;  %v6381_v55 = vld [vmem:[#allocation2 + $0xf2] sm:$0xff]  ;;  %v6383_v58 = vld [vmem:[#allocation2 + $0xe2] sm:$0xff] }
 0x38a   : > { %2766 = vrot.lane.b32.xlu0 %v6316_v59, %s4747_s9  ;;  %2764 = vrot.lane.b32.xlu1 %v6318_v7, %s4747_s9 }
 0x38c   : > { %v2573_v8 = vpop.permute.xlu1 %2572  ;;  %v2575_v36 = vpop.permute.xlu0 %2574 }
 0x38d   : > { %2663 = vst.msk [vmem:[#allocation3 + $0x28] sm:$0xff] %vm625_vm2, %v2573_v8  ;;  %2664 = vst.msk [vmem:[#allocation3 + $0x30] sm:$0xff] %vm625_vm2, %v2575_v36  ;;  %v2712_v8 = vld [vmem:[#allocation2 + $0x10a] sm:$0xff]  ;;  %v2711_v36 = vld [vmem:[#allocation2 + $0xfa] sm:$0xff] }
 0x38e   : > { %2770 = vrot.lane.b32.xlu0 %v6326_v35, %s4747_s9  ;;  %2768 = vrot.lane.b32.xlu1 %v6328_v29, %s4747_s9 }
 0x390   : > { %v2579_v24 = vpop.permute.xlu0 %2578  ;;  %v2577_v20 = vpop.permute.xlu1 %2576 }
 0x391   : > { %2666 = vst.msk [vmem:[#allocation3 + $0x40] sm:$0xff] %vm625_vm2, %v2579_v24  ;;  %2665 = vst.msk [vmem:[#allocation3 + $0x38] sm:$0xff] %vm625_vm2, %v2577_v20  ;;  %v2714_v20 = vld [vmem:[#allocation2 + $0x122] sm:$0xff] }
 0x392   : > { %2774 = vrot.lane.b32.xlu0 %v6336_v5, %s4747_s9  ;;  %2772 = vrot.lane.b32.xlu1 %v6338_v43, %s4747_s9 }
 0x394   : > { %v2581_v10 = vpop.permute.xlu1 %2580 }
 0x395   : > { %2667 = vst.msk [vmem:[#allocation3 + $0x48] sm:$0xff] %vm625_vm2, %v2581_v10  ;;  %v2713_v10 = vld [vmem:[#allocation2 + $0x112] sm:$0xff] }
 0x396   : > { %2778 = vrot.lane.b32.xlu0 %v6345_v27, %s4747_s9  ;;  %2776 = vrot.lane.b32.xlu1 %v6347_v3, %s4747_s9 }
 0x39a   : > { %2782 = vrot.lane.b32.xlu0 %v6353_v53, %s4747_s9  ;;  %2780 = vrot.lane.b32.xlu1 %v6355_v63, %s4747_s9 }
 0x39c   : > { %v2583_v28 = vpop.permute.xlu0 %2582 }
 0x39d   : > { %2668 = vst.msk [vmem:[#allocation3 + $0x50] sm:$0xff] %vm625_vm2, %v2583_v28 }
 0x39e   : > { %2786 = vrot.lane.b32.xlu0 %v6362_v22, %s4747_s9  ;;  %2784 = vrot.lane.b32.xlu1 %v6364_v21, %s4747_s9 }
 0x3a0   : > { %v2587_v37 = vpop.permute.xlu0 %2586  ;;  %v2585_v18 = vpop.permute.xlu1 %2584 }
 0x3a1   : > { %2670 = vst.msk [vmem:[#allocation3 + $0x60] sm:$0xff] %vm625_vm2, %v2587_v37  ;;  %2669 = vst.msk [vmem:[#allocation3 + $0x58] sm:$0xff] %vm625_vm2, %v2585_v18  ;;  %v2716_v18 = vld [vmem:[#allocation2 + $0x13a] sm:$0xff] }
 0x3a2   : > { %2790 = vrot.lane.b32.xlu0 %v6372_v33, %s4747_s9  ;;  %2788 = vrot.lane.b32.xlu1 %v6374_v17, %s4747_s9 }
 0x3a4   : > { %v2589_v9 = vpop.permute.xlu1 %2588 }
 0x3a5   : > { %2671 = vst.msk [vmem:[#allocation3 + $0x68] sm:$0xff] %vm625_vm2, %v2589_v9  ;;  %v2715_v9 = vld [vmem:[#allocation2 + $0x12a] sm:$0xff] }
 0x3a6   : > { %2794 = vrot.lane.b32.xlu0 %v6381_v55, %s4747_s9  ;;  %2792 = vrot.lane.b32.xlu1 %v6383_v58, %s4747_s9 }
 0x3aa   : > { %2798 = vrot.lane.b32.xlu0 %v2712_v8, %s4747_s9  ;;  %2796 = vrot.lane.b32.xlu1 %v2711_v36, %s4747_s9  ;;  %v2718_v36 = vld [vmem:[#allocation2 + $0x152] sm:$0xff] }
 0x3ac   : > { %v2591_v24 = vpop.permute.xlu0 %2590 }
 0x3ad   : > { %2672 = vst.msk [vmem:[#allocation3 + $0x70] sm:$0xff] %vm625_vm2, %v2591_v24  ;;  %v2717_v24 = vld [vmem:[#allocation2 + $0x142] sm:$0xff] }
 0x3ae   : > { %2802 = vrot.lane.b32.xlu0 %v2714_v20, %s4747_s9  ;;  %2800 = vrot.lane.b32.xlu1 %v2713_v10, %s4747_s9  ;;  %v2720_v20 = vld [vmem:[#allocation2 + $0x16a] sm:$0xff]  ;;  %v2719_v10 = vld [vmem:[#allocation2 + $0x15a] sm:$0xff] }
 0x3b0   : > { %v2595_v28 = vpop.permute.xlu0 %2594  ;;  %v2593_v37 = vpop.permute.xlu1 %2592 }
 0x3b1   : > { %2674 = vst.msk [vmem:[#allocation3 + $0x80] sm:$0xff] %vm625_vm2, %v2595_v28  ;;  %2673 = vst.msk [vmem:[#allocation3 + $0x78] sm:$0xff] %vm625_vm2, %v2593_v37  ;;  %v2721_v37 = vld [vmem:[#allocation2 + $0x172] sm:$0xff] }
 0x3b2   : > { %2806 = vrot.lane.b32.xlu0 %v2716_v18, %s4747_s9  ;;  %2804 = vrot.lane.b32.xlu1 %v2715_v9, %s4747_s9 }
 0x3b4   : > { %v2597_v8 = vpop.permute.xlu1 %2596 }
 0x3b5   : > { %2675 = vst.msk [vmem:[#allocation3 + $0x88] sm:$0xff] %vm625_vm2, %v2597_v8 }
 0x3b6   : > { %2810 = vrot.lane.b32.xlu0 %v2718_v36, %s4747_s9  ;;  %2808 = vrot.lane.b32.xlu1 %v2717_v24, %s4747_s9 }
 0x3ba   : > { %2814 = vrot.lane.b32.xlu0 %v2720_v20, %s4747_s9  ;;  %2812 = vrot.lane.b32.xlu1 %v2719_v10, %s4747_s9 }
 0x3bc   : > { %v2599_v28 = vpop.permute.xlu0 %2598 }
 0x3bd   : > { %2676 = vst.msk [vmem:[#allocation3 + $0x90] sm:$0xff] %vm625_vm2, %v2599_v28 }
 0x3be   : > { %2946 = vrot.lane.b32.xlu0 %v6061_v25, %s4748_s10  ;;  %2816 = vrot.lane.b32.xlu1 %v2721_v37, %s4747_s9 }
 0x3c0   : > { %v2603_v18 = vpop.permute.xlu0 %2602  ;;  %v2601_v9 = vpop.permute.xlu1 %2600 }
 0x3c1   : > { %2678 = vst.msk [vmem:[#allocation3 + $0xa0] sm:$0xff] %vm625_vm2, %v2603_v18  ;;  %2677 = vst.msk [vmem:[#allocation3 + $0x98] sm:$0xff] %vm625_vm2, %v2601_v9 }
 0x3c2   : > { %2950 = vrot.lane.b32.xlu0 %v6052_v1, %s4748_s10  ;;  %2948 = vrot.lane.b32.xlu1 %v6083_v38, %s4748_s10 }
 0x3c4   : > { %v2605_v8 = vpop.permute.xlu1 %2604 }
 0x3c5   : > { %2679 = vst.msk [vmem:[#allocation3 + $0xa8] sm:$0xff] %vm625_vm2, %v2605_v8 }
 0x3c6   : > { %2954 = vrot.lane.b32.xlu0 %v6095_v54, %s4748_s10  ;;  %2952 = vrot.lane.b32.xlu1 %v6070_v6, %s4748_s10 }
 0x3ca   : > { %2958 = vrot.lane.b32.xlu0 %v6087_v11, %s4748_s10  ;;  %2956 = vrot.lane.b32.xlu1 %v6120_v47, %s4748_s10 }
 0x3cc   : > { %v2607_v25 = vpop.permute.xlu0 %2606 }
 0x3cd   : > { %2680 = vst.msk [vmem:[#allocation3 + $0xb0] sm:$0xff] %vm625_vm2, %v2607_v25 }
 0x3ce   : > { %2962 = vrot.lane.b32.xlu0 %v6141_v42, %s4748_s10  ;;  %2960 = vrot.lane.b32.xlu1 %v6106_v60, %s4748_s10 }
 0x3d0   : > { %v2611_v38 = vpop.permute.xlu0 %2610  ;;  %v2609_v36 = vpop.permute.xlu1 %2608 }
 0x3d1   : > { %2682 = vst.msk [vmem:[#allocation3 + $0xc0] sm:$0xff] %vm625_vm2, %v2611_v38  ;;  %2681 = vst.msk [vmem:[#allocation3 + $0xb8] sm:$0xff] %vm625_vm2, %v2609_v36 }
 0x3d2   : > { %2966 = vrot.lane.b32.xlu0 %v6135_v41, %s4748_s10  ;;  %2964 = vrot.lane.b32.xlu1 %v6161_v56, %s4748_s10 }
 0x3d4   : > { %v2613_v24 = vpop.permute.xlu1 %2612 }
 0x3d5   : > { %2683 = vst.msk [vmem:[#allocation3 + $0xc8] sm:$0xff] %vm625_vm2, %v2613_v24 }
 0x3d6   : > { %2970 = vrot.lane.b32.xlu0 %v6177_v48, %s4748_s10  ;;  %2968 = vrot.lane.b32.xlu1 %v6150_v44, %s4748_s10 }
 0x3da   : > { %2974 = vrot.lane.b32.xlu0 %v6173_v13, %s4748_s10  ;;  %2972 = vrot.lane.b32.xlu1 %v6193_v39, %s4748_s10 }
 0x3dc   : > { %v2615_v20 = vpop.permute.xlu0 %2614 }
 0x3dd   : > { %2684 = vst.msk [vmem:[#allocation3 + $0xd0] sm:$0xff] %vm625_vm2, %v2615_v20 }
 0x3de   : > { %2978 = vrot.lane.b32.xlu0 %v6209_v46, %s4748_s10  ;;  %2976 = vrot.lane.b32.xlu1 %v6185_v57, %s4748_s10 }
 0x3e0   : > { %v2619_v10 = vpop.permute.xlu0 %2618  ;;  %v2617_v28 = vpop.permute.xlu1 %2616 }
 0x3e1   : > { %2686 = vst.msk [vmem:[#allocation3 + $0xe0] sm:$0xff] %vm625_vm2, %v2619_v10  ;;  %2685 = vst.msk [vmem:[#allocation3 + $0xd8] sm:$0xff] %vm625_vm2, %v2617_v28 }
 0x3e2   : > { %2982 = vrot.lane.b32.xlu0 %v6205_v15, %s4748_s10  ;;  %2980 = vrot.lane.b32.xlu1 %v6225_v14, %s4748_s10 }
 0x3e4   : > { %v2621_v37 = vpop.permute.xlu1 %2620 }
 0x3e5   : > { %2687 = vst.msk [vmem:[#allocation3 + $0xe8] sm:$0xff] %vm625_vm2, %v2621_v37 }
 0x3e6   : > { %2986 = vrot.lane.b32.xlu0 %v6241_v45, %s4748_s10  ;;  %2984 = vrot.lane.b32.xlu1 %v6217_v31, %s4748_s10 }
 0x3ea   : > { %2990 = vrot.lane.b32.xlu0 %v6237_v61, %s4748_s10  ;;  %2988 = vrot.lane.b32.xlu1 %v6257_v51, %s4748_s10 }
 0x3ec   : > { %v2623_v18 = vpop.permute.xlu0 %2622 }
 0x3ed   : > { %2688 = vst.msk [vmem:[#allocation3 + $0xf0] sm:$0xff] %vm625_vm2, %v2623_v18 }
 0x3ee   : > { %3138 = vrot.lane.b32.xlu0 %v6059_v12, %s4749_s11  ;;  %2992 = vrot.lane.b32.xlu1 %v6249_v23, %s4748_s10 }
 0x3f0   : > { %v2755_v9 = vpop.permute.xlu0 %2754  ;;  %v2625_v8 = vpop.permute.xlu1 %2624 }
 0x3f1   : > { %2850 = vst.msk [vmem:[#allocation3] sm:$0xff] %vm818_vm3, %v2755_v9 }
 0x3f2   : > { %2689 = vst.msk [vmem:[#allocation3 + $0xf8] sm:$0xff] %vm625_vm2, %v2625_v8  ;;  %3142 = vrot.lane.b32.xlu0 %v6072_v32, %s4749_s11  ;;  %3140 = vrot.lane.b32.xlu1 %v6074_v2, %s4749_s11 }
 0x3f4   : > { %v2759_v61 = vpop.permute.xlu0 %2758  ;;  %v2757_v25 = vpop.permute.xlu1 %2756 }
 0x3f5   : > { %2852 = vst.msk [vmem:[#allocation3 + $0x10] sm:$0xff] %vm818_vm3, %v2759_v61  ;;  %2851 = vst.msk [vmem:[#allocation3 + $0x8] sm:$0xff] %vm818_vm3, %v2757_v25 }
 0x3f6   : > { %3330 = vrot.lane.b32.xlu0 %v6300_v50, %s4750_s12  ;;  %3144 = vrot.lane.b32.xlu1 %v6091_v40, %s4749_s11 }
 0x3f8   : > { %v2763_v12 = vpop.permute.xlu0 %2762  ;;  %v2761_v23 = vpop.permute.xlu1 %2760 }
 0x3f9   : > { %2854 = vst.msk [vmem:[#allocation3 + $0x20] sm:$0xff] %vm818_vm3, %v2763_v12  ;;  %2853 = vst.msk [vmem:[#allocation3 + $0x18] sm:$0xff] %vm818_vm3, %v2761_v23 }
 0x3fa   : > { %3334 = vrot.lane.b32.xlu0 %v6306_v4, %s4750_s12  ;;  %3332 = vrot.lane.b32.xlu1 %v6308_v49, %s4750_s12 }
 0x3fc   : > { %v2767_v2 = vpop.permute.xlu0 %2766  ;;  %v2765_v38 = vpop.permute.xlu1 %2764 }
 0x3fd   : > { %2856 = vst.msk [vmem:[#allocation3 + $0x30] sm:$0xff] %vm818_vm3, %v2767_v2  ;;  %2855 = vst.msk [vmem:[#allocation3 + $0x28] sm:$0xff] %vm818_vm3, %v2765_v38 }
 0x3fe   : > { %3522 = vrot.lane.b32.xlu0 %v6052_v1, %s4751_s13  ;;  %3336 = vrot.lane.b32.xlu1 %v6318_v7, %s4750_s12  ;;  %v4734_v1 = vld [vmem:[%s7138_s2 + $0x10] ss:$0 sps:$4 sm:$0x33]  }
 0x3ff   : > { %4713 = vmatprep.subr.msk.bf16.mxu1 %vm2127_vm7, %v4734_v1 }
 0x400   : > { %v2771_v50 = vpop.permute.xlu0 %2770  ;;  %v2769_v36 = vpop.permute.xlu1 %2768 }
 0x401   : > { %2858 = vst.msk [vmem:[#allocation3 + $0x40] sm:$0xff] %vm818_vm3, %v2771_v50  ;;  %2857 = vst.msk [vmem:[#allocation3 + $0x38] sm:$0xff] %vm818_vm3, %v2769_v36 }
 0x402   : > { %3526 = vrot.lane.b32.xlu0 %v6095_v54, %s4751_s13  ;;  %3524 = vrot.lane.b32.xlu1 %v6070_v6, %s4751_s13  ;;  %v4151_v6 = vsel %vm2127_vm7, %v4734_v1, 0 }
 0x403   : > { %4675 = vmatpush3.bf16.msra.mxu1 %v4151_v6 }
 0x404   : > { %v2775_v49 = vpop.permute.xlu0 %2774  ;;  %v2773_v24 = vpop.permute.xlu1 %2772 }
 0x405   : > { %2860 = vst.msk [vmem:[#allocation3 + $0x50] sm:$0xff] %vm818_vm3, %v2775_v49  ;;  %2859 = vst.msk [vmem:[#allocation3 + $0x48] sm:$0xff] %vm818_vm3, %v2773_v24  ;;  %v3084_v24 = vld [vmem:[#allocation2 + $0x91] sm:$0xff] }
 0x406   : > { %3714 = vrot.lane.b32.xlu0 %v6072_v32, %s4752_s14  ;;  %3528 = vrot.lane.b32.xlu1 %v6120_v47, %s4751_s13  ;;  %v4735_v32 = vld [vmem:[%s7138_s2 + $0x8] sm:$0xff]  }
 0x407   : > { %4676 = vmatprep.subr.bf16.mxu1 %v4735_v32 }
 0x408   : > { %v2779_v54 = vpop.permute.xlu0 %2778  ;;  %v2777_v20 = vpop.permute.xlu1 %2776  ;;  %4677 = vmatpush3.bf16.msra.mxu1 %v4735_v32 }
 0x409   : > { %2862 = vst.msk [vmem:[#allocation3 + $0x60] sm:$0xff] %vm818_vm3, %v2779_v54  ;;  %2861 = vst.msk [vmem:[#allocation3 + $0x58] sm:$0xff] %vm818_vm3, %v2777_v20  ;;  %v3085_v20 = vld [vmem:[#allocation2 + $0x99] sm:$0xff] }
 0x40a   : > { %3718 = vrot.lane.b32.xlu0 %v6093_v52, %s4752_s14  ;;  %3716 = vrot.lane.b32.xlu1 %v6091_v40, %s4752_s14  ;;  %v4736_v40 = vld [vmem:[%s7138_s2] sm:$0xff]  }
 0x40b   : > { %4678 = vmatprep.subr.bf16.mxu1 %v4736_v40 }
 0x40c   : > { %v2783_v47 = vpop.permute.xlu0 %2782  ;;  %v2781_v10 = vpop.permute.xlu1 %2780  ;;  %4679 = vmatpush3.bf16.msra.mxu1 %v4736_v40 }
 0x40d   : > { %2864 = vst.msk [vmem:[#allocation3 + $0x70] sm:$0xff] %vm818_vm3, %v2783_v47  ;;  %2863 = vst.msk [vmem:[#allocation3 + $0x68] sm:$0xff] %vm818_vm3, %v2781_v10 }
 0x40e   : > { %3906 = vrot.lane.b32.xlu0 %v6306_v4, %s4753_s21  ;;  %3720 = vrot.lane.b32.xlu1 %v6110_v0, %s4752_s14 }
 0x410   : > { %v2787_v28 = vpop.permute.xlu0 %2786  ;;  %v2785_v37 = vpop.permute.xlu1 %2784 }
 0x411   : > { %2866 = vst.msk [vmem:[#allocation3 + $0x80] sm:$0xff] %vm818_vm3, %v2787_v28  ;;  %2865 = vst.msk [vmem:[#allocation3 + $0x78] sm:$0xff] %vm818_vm3, %v2785_v37 }
 0x412   : > { %3910 = vrot.lane.b32.xlu0 %v6316_v59, %s4753_s21  ;;  %3908 = vrot.lane.b32.xlu1 %v6318_v7, %s4753_s21 }
 0x414   : > { %v2791_v4 = vpop.permute.xlu0 %2790  ;;  %v2789_v18 = vpop.permute.xlu1 %2788 }
 0x415   : > { %2868 = vst.msk [vmem:[#allocation3 + $0x90] sm:$0xff] %vm818_vm3, %v2791_v4  ;;  %2867 = vst.msk [vmem:[#allocation3 + $0x88] sm:$0xff] %vm818_vm3, %v2789_v18  ;;  %v3661_v18 = vld [vmem:[#allocation2 + $0xb1] sm:$0xff] }
 0x416   : > { %3146 = vrot.lane.b32.xlu0 %v6093_v52, %s4749_s11  ;;  %3912 = vrot.lane.b32.xlu1 %v6328_v29, %s4753_s21 }
 0x418   : > { %v2795_v9 = vpop.permute.xlu0 %2794  ;;  %v2793_v8 = vpop.permute.xlu1 %2792 }
 0x419   : > { %2870 = vst.msk [vmem:[#allocation3 + $0xa0] sm:$0xff] %vm818_vm3, %v2795_v9  ;;  %2869 = vst.msk [vmem:[#allocation3 + $0x98] sm:$0xff] %vm818_vm3, %v2793_v8 }
 0x41a   : > { %3150 = vrot.lane.b32.xlu0 %v6108_v62, %s4749_s11  ;;  %3148 = vrot.lane.b32.xlu1 %v6110_v0, %s4749_s11 }
 0x41c   : > { %v2799_v7 = vpop.permute.xlu0 %2798  ;;  %v2797_v61 = vpop.permute.xlu1 %2796 }
 0x41d   : > { %2872 = vst.msk [vmem:[#allocation3 + $0xb0] sm:$0xff] %vm818_vm3, %v2799_v7  ;;  %2871 = vst.msk [vmem:[#allocation3 + $0xa8] sm:$0xff] %vm818_vm3, %v2797_v61 }
 0x41e   : > { %3338 = vrot.lane.b32.xlu0 %v6316_v59, %s4750_s12  ;;  %3152 = vrot.lane.b32.xlu1 %v6127_v34, %s4749_s11 }
 0x420   : > { %v2803_v52 = vpop.permute.xlu0 %2802  ;;  %v2801_v25 = vpop.permute.xlu1 %2800 }
 0x421   : > { %2874 = vst.msk [vmem:[#allocation3 + $0xc0] sm:$0xff] %vm818_vm3, %v2803_v52  ;;  %2873 = vst.msk [vmem:[#allocation3 + $0xb8] sm:$0xff] %vm818_vm3, %v2801_v25  ;;  %v3088_v52 = vld [vmem:[#allocation2 + $0xc1] sm:$0xff] }
 0x422   : > { %3342 = vrot.lane.b32.xlu0 %v6326_v35, %s4750_s12  ;;  %3340 = vrot.lane.b32.xlu1 %v6328_v29, %s4750_s12 }
 0x424   : > { %v2807_v62 = vpop.permute.xlu0 %2806  ;;  %v2805_v0 = vpop.permute.xlu1 %2804 }
 0x425   : > { %2876 = vst.msk [vmem:[#allocation3 + $0xd0] sm:$0xff] %vm818_vm3, %v2807_v62  ;;  %2875 = vst.msk [vmem:[#allocation3 + $0xc8] sm:$0xff] %vm818_vm3, %v2805_v0  ;;  %v3089_v62 = vld [vmem:[#allocation2 + $0xc9] sm:$0xff] }
 0x426   : > { %3530 = vrot.lane.b32.xlu0 %v6087_v11, %s4751_s13  ;;  %3344 = vrot.lane.b32.xlu1 %v6338_v43, %s4750_s12  ;;  %v3654_v11 = vld [vmem:[#allocation2 + $0x61] sm:$0xff] }
 0x428   : > { %v2811_v34 = vpop.permute.xlu0 %2810  ;;  %v2809_v59 = vpop.permute.xlu1 %2808 }
 0x429   : > { %2878 = vst.msk [vmem:[#allocation3 + $0xe0] sm:$0xff] %vm818_vm3, %v2811_v34  ;;  %2877 = vst.msk [vmem:[#allocation3 + $0xd8] sm:$0xff] %vm818_vm3, %v2809_v59 }
 0x42a   : > { %3534 = vrot.lane.b32.xlu0 %v6141_v42, %s4751_s13  ;;  %3532 = vrot.lane.b32.xlu1 %v6106_v60, %s4751_s13  ;;  %v3655_v42 = vld [vmem:[#allocation2 + $0x69] sm:$0xff] }
 0x42c   : > { %v2815_v29 = vpop.permute.xlu0 %2814  ;;  %v2813_v12 = vpop.permute.xlu1 %2812 }
 0x42d   : > { %2880 = vst.msk [vmem:[#allocation3 + $0xf0] sm:$0xff] %vm818_vm3, %v2815_v29  ;;  %2879 = vst.msk [vmem:[#allocation3 + $0xe8] sm:$0xff] %vm818_vm3, %v2813_v12 }
 0x42e   : > { %3722 = vrot.lane.b32.xlu0 %v3654_v11, %s4752_s14  ;;  %3536 = vrot.lane.b32.xlu1 %v6161_v56, %s4751_s13 }
 0x430   : > { %v2947_v23 = vpop.permute.xlu0 %2946  ;;  %v2817_v2 = vpop.permute.xlu1 %2816 }
 0x431   : > { %3042 = vst.msk [vmem:[#allocation3] sm:$0xff] %vm1011_vm4, %v2947_v23 }
 0x432   : > { %2881 = vst.msk [vmem:[#allocation3 + $0xf8] sm:$0xff] %vm818_vm3, %v2817_v2  ;;  %3726 = vrot.lane.b32.xlu0 %v6139_v16, %s4752_s14  ;;  %3724 = vrot.lane.b32.xlu1 %v3655_v42, %s4752_s14  ;;  %v3665_v42 = vld [vmem:[#allocation2 + $0xe1] sm:$0xff] }
 0x434   : > { %v2951_v60 = vpop.permute.xlu0 %2950  ;;  %v2949_v38 = vpop.permute.xlu1 %2948 }
 0x435   : > { %3044 = vst.msk [vmem:[#allocation3 + $0x10] sm:$0xff] %vm1011_vm4, %v2951_v60  ;;  %3043 = vst.msk [vmem:[#allocation3 + $0x8] sm:$0xff] %vm1011_vm4, %v2949_v38 }
 0x436   : > { %3914 = vrot.lane.b32.xlu0 %v6326_v35, %s4753_s21  ;;  %3728 = vrot.lane.b32.xlu1 %v6152_v26, %s4752_s14  ;;  %v3082_v35 = vld [vmem:[#allocation2 + $0x79] sm:$0xff] }
 0x438   : > { %v2955_v56 = vpop.permute.xlu0 %2954  ;;  %v2953_v50 = vpop.permute.xlu1 %2952 }
 0x439   : > { %3046 = vst.msk [vmem:[#allocation3 + $0x20] sm:$0xff] %vm1011_vm4, %v2955_v56  ;;  %3045 = vst.msk [vmem:[#allocation3 + $0x18] sm:$0xff] %vm1011_vm4, %v2953_v50 }
 0x43a   : > { %3918 = vrot.lane.b32.xlu0 %v6336_v5, %s4753_s21  ;;  %3916 = vrot.lane.b32.xlu1 %v6338_v43, %s4753_s21  ;;  %v3083_v43 = vld [vmem:[#allocation2 + $0x81] sm:$0xff] }
 0x43c   : > { %v2959_v16 = vpop.permute.xlu0 %2958  ;;  %v2957_v36 = vpop.permute.xlu1 %2956 }
 0x43d   : > { %3048 = vst.msk [vmem:[#allocation3 + $0x30] sm:$0xff] %vm1011_vm4, %v2959_v16  ;;  %3047 = vst.msk [vmem:[#allocation3 + $0x28] sm:$0xff] %vm1011_vm4, %v2957_v36 }
 0x43e   : > { %3154 = vrot.lane.b32.xlu0 %v3082_v35, %s4749_s11  ;;  %3920 = vrot.lane.b32.xlu1 %v6347_v3, %s4753_s21 }
 0x440   : > { %v2963_v26 = vpop.permute.xlu0 %2962  ;;  %v2961_v49 = vpop.permute.xlu1 %2960 }
 0x441   : > { %3050 = vst.msk [vmem:[#allocation3 + $0x40] sm:$0xff] %vm1011_vm4, %v2963_v26  ;;  %3049 = vst.msk [vmem:[#allocation3 + $0x38] sm:$0xff] %vm1011_vm4, %v2961_v49  ;;  %v3092_v49 = vld [vmem:[#allocation2 + $0xf1] sm:$0xff] }
 0x442   : > { %3158 = vrot.lane.b32.xlu0 %v3084_v24, %s4749_s11  ;;  %3156 = vrot.lane.b32.xlu1 %v3083_v43, %s4749_s11 }
 0x444   : > { %v2967_v1 = vpop.permute.xlu0 %2966  ;;  %v2965_v54 = vpop.permute.xlu1 %2964 }
 0x445   : > { %3052 = vst.msk [vmem:[#allocation3 + $0x50] sm:$0xff] %vm1011_vm4, %v2967_v1  ;;  %3051 = vst.msk [vmem:[#allocation3 + $0x48] sm:$0xff] %vm1011_vm4, %v2965_v54  ;;  %v3093_v54 = vld [vmem:[#allocation2 + $0xf9] sm:$0xff] }
 0x446   : > { %3346 = vrot.lane.b32.xlu0 %v6336_v5, %s4750_s12  ;;  %3160 = vrot.lane.b32.xlu1 %v3085_v20, %s4749_s11 }
 0x448   : > { %v2971_v6 = vpop.permute.xlu0 %2970  ;;  %v2969_v32 = vpop.permute.xlu1 %2968 }
 0x449   : > { %3054 = vst.msk [vmem:[#allocation3 + $0x60] sm:$0xff] %vm1011_vm4, %v2971_v6  ;;  %3053 = vst.msk [vmem:[#allocation3 + $0x58] sm:$0xff] %vm1011_vm4, %v2969_v32 }
 0x44a   : > { %3350 = vrot.lane.b32.xlu0 %v6345_v27, %s4750_s12  ;;  %3348 = vrot.lane.b32.xlu1 %v6347_v3, %s4750_s12 }
 0x44c   : > { %v2975_v47 = vpop.permute.xlu0 %2974  ;;  %v2973_v10 = vpop.permute.xlu1 %2972 }
 0x44d   : > { %3056 = vst.msk [vmem:[#allocation3 + $0x70] sm:$0xff] %vm1011_vm4, %v2975_v47  ;;  %3055 = vst.msk [vmem:[#allocation3 + $0x68] sm:$0xff] %vm1011_vm4, %v2973_v10 }
 0x44e   : > { %3538 = vrot.lane.b32.xlu0 %v6135_v41, %s4751_s13  ;;  %3352 = vrot.lane.b32.xlu1 %v6355_v63, %s4750_s12 }
 0x450   : > { %v2979_v5 = vpop.permute.xlu0 %2978  ;;  %v2977_v40 = vpop.permute.xlu1 %2976 }
 0x451   : > { %3058 = vst.msk [vmem:[#allocation3 + $0x80] sm:$0xff] %vm1011_vm4, %v2979_v5  ;;  %3057 = vst.msk [vmem:[#allocation3 + $0x78] sm:$0xff] %vm1011_vm4, %v2977_v40 }
 0x452   : > { %3542 = vrot.lane.b32.xlu0 %v6177_v48, %s4751_s13  ;;  %3540 = vrot.lane.b32.xlu1 %v6150_v44, %s4751_s13  ;;  %v3660_v48 = vld [vmem:[#allocation2 + $0xa9] sm:$0xff] }
 0x454   : > { %v2983_v3 = vpop.permute.xlu0 %2982  ;;  %v2981_v28 = vpop.permute.xlu1 %2980 }
 0x455   : > { %3060 = vst.msk [vmem:[#allocation3 + $0x90] sm:$0xff] %vm1011_vm4, %v2983_v3  ;;  %3059 = vst.msk [vmem:[#allocation3 + $0x88] sm:$0xff] %vm1011_vm4, %v2981_v28  ;;  %v3858_v28 = vld [vmem:[#allocation2 + $0xf2] sm:$0xff] }
 0x456   : > { %3730 = vrot.lane.b32.xlu0 %v3084_v24, %s4752_s14  ;;  %3544 = vrot.lane.b32.xlu1 %v6193_v39, %s4751_s13 }
 0x458   : > { %v2987_v41 = vpop.permute.xlu0 %2986  ;;  %v2985_v37 = vpop.permute.xlu1 %2984 }
 0x459   : > { %3062 = vst.msk [vmem:[#allocation3 + $0xa0] sm:$0xff] %vm1011_vm4, %v2987_v41  ;;  %3061 = vst.msk [vmem:[#allocation3 + $0x98] sm:$0xff] %vm1011_vm4, %v2985_v37  ;;  %v3669_v41 = vld [vmem:[#allocation2 + $0x111] sm:$0xff] }
 0x45a   : > { %3734 = vrot.lane.b32.xlu0 %v3660_v48, %s4752_s14  ;;  %3732 = vrot.lane.b32.xlu1 %v3085_v20, %s4752_s14 }
 0x45c   : > { %v2991_v44 = vpop.permute.xlu0 %2990  ;;  %v2989_v4 = vpop.permute.xlu1 %2988 }
 0x45d   : > { %3064 = vst.msk [vmem:[#allocation3 + $0xb0] sm:$0xff] %vm1011_vm4, %v2991_v44  ;;  %3063 = vst.msk [vmem:[#allocation3 + $0xa8] sm:$0xff] %vm1011_vm4, %v2989_v4 }
 0x45e   : > { %3922 = vrot.lane.b32.xlu0 %v6345_v27, %s4753_s21  ;;  %3736 = vrot.lane.b32.xlu1 %v3661_v18, %s4752_s14 }
 0x460   : > { %v3139_v39 = vpop.permute.xlu0 %3138  ;;  %v2993_v9 = vpop.permute.xlu1 %2992 }
 0x461   : > { %3234 = vst.msk [vmem:[#allocation3] sm:$0xff] %vm1204_vm5, %v3139_v39 }
 0x462   : > { %3065 = vst.msk [vmem:[#allocation3 + $0xb8] sm:$0xff] %vm1011_vm4, %v2993_v9  ;;  %3926 = vrot.lane.b32.xlu0 %v6353_v53, %s4753_s21  ;;  %3924 = vrot.lane.b32.xlu1 %v6355_v63, %s4753_s21  ;;  %v3861_v9 = vld [vmem:[#allocation2 + $0x112] sm:$0xff] }
 0x464   : > { %v3143_v8 = vpop.permute.xlu0 %3142  ;;  %v3141_v7 = vpop.permute.xlu1 %3140 }
 0x465   : > { %3236 = vst.msk [vmem:[#allocation3 + $0x10] sm:$0xff] %vm1204_vm5, %v3143_v8  ;;  %3235 = vst.msk [vmem:[#allocation3 + $0x8] sm:$0xff] %vm1204_vm5, %v3141_v7 }
 0x466   : > { %3162 = vrot.lane.b32.xlu0 %v3660_v48, %s4749_s11  ;;  %3928 = vrot.lane.b32.xlu1 %v6364_v21, %s4753_s21  ;;  %v3860_v48 = vld [vmem:[#allocation2 + $0x10a] sm:$0xff] }
 0x468   : > { %v3331_v27 = vpop.permute.xlu0 %3330  ;;  %v3145_v61 = vpop.permute.xlu1 %3144 }
 0x469   : > { %3426 = vst.msk [vmem:[#allocation3] sm:$0xff] %vm1397_vm6, %v3331_v27 }
 0x46a   : > { %3237 = vst.msk [vmem:[#allocation3 + $0x18] sm:$0xff] %vm1204_vm5, %v3145_v61  ;;  %3166 = vrot.lane.b32.xlu0 %v3088_v52, %s4749_s11  ;;  %3164 = vrot.lane.b32.xlu1 %v3661_v18, %s4749_s11 }
 0x46c   : > { %v3335_v63 = vpop.permute.xlu0 %3334  ;;  %v3333_v25 = vpop.permute.xlu1 %3332 }
 0x46d   : > { %3428 = vst.msk [vmem:[#allocation3 + $0x10] sm:$0xff] %vm1397_vm6, %v3335_v63  ;;  %3427 = vst.msk [vmem:[#allocation3 + $0x8] sm:$0xff] %vm1397_vm6, %v3333_v25  ;;  %v3096_v63 = vld [vmem:[#allocation2 + $0x121] sm:$0xff] }
 0x46e   : > { %3354 = vrot.lane.b32.xlu0 %v6353_v53, %s4750_s12  ;;  %3168 = vrot.lane.b32.xlu1 %v3089_v62, %s4749_s11 }
 0x470   : > { %v3523_v0 = vpop.permute.xlu0 %3522  ;;  %v3337_v34 = vpop.permute.xlu1 %3336 }
 0x471   : > { %3618 = vst.msk [vmem:[#allocation3] sm:$0xff] %vm1591_vm8, %v3523_v0 }
 0x472   : > { %3429 = vst.msk [vmem:[#allocation3 + $0x18] sm:$0xff] %vm1397_vm6, %v3337_v34  ;;  %3358 = vrot.lane.b32.xlu0 %v6362_v22, %s4750_s12  ;;  %3356 = vrot.lane.b32.xlu1 %v6364_v21, %s4750_s12  ;;  %v3097_v34 = vld [vmem:[#allocation2 + $0x129] sm:$0xff] }
 0x474   : > { %v3527_v59 = vpop.permute.xlu0 %3526  ;;  %v3525_v29 = vpop.permute.xlu1 %3524 }
 0x475   : > { %3620 = vst.msk [vmem:[#allocation3 + $0x10] sm:$0xff] %vm1591_vm8, %v3527_v59  ;;  %3619 = vst.msk [vmem:[#allocation3 + $0x8] sm:$0xff] %vm1591_vm8, %v3525_v29 }
 0x476   : > { %3546 = vrot.lane.b32.xlu0 %v6173_v13, %s4751_s13  ;;  %3360 = vrot.lane.b32.xlu1 %v6374_v17, %s4750_s12 }
 0x478   : > { %v3715_v53 = vpop.permute.xlu0 %3714  ;;  %v3529_v12 = vpop.permute.xlu1 %3528 }
 0x479   : > { %3810 = vst.msk [vmem:[#allocation3] sm:$0xff] %vm1784_vm9, %v3715_v53  ;;  %v3288_v53 = vld [vmem:[#allocation2 + $0x122] sm:$0xff] }
 0x47a   : > { %3621 = vst.msk [vmem:[#allocation3 + $0x18] sm:$0xff] %vm1591_vm8, %v3529_v12  ;;  %3550 = vrot.lane.b32.xlu0 %v6209_v46, %s4751_s13  ;;  %3548 = vrot.lane.b32.xlu1 %v6185_v57, %s4751_s13  ;;  %v3664_v46 = vld [vmem:[#allocation2 + $0xd9] sm:$0xff] }
 0x47c   : > { %v3719_v21 = vpop.permute.xlu0 %3718  ;;  %v3717_v11 = vpop.permute.xlu1 %3716 }
 0x47d   : > { %3812 = vst.msk [vmem:[#allocation3 + $0x10] sm:$0xff] %vm1784_vm9, %v3719_v21  ;;  %3811 = vst.msk [vmem:[#allocation3 + $0x8] sm:$0xff] %vm1784_vm9, %v3717_v11  ;;  %v3478_v11 = vld [vmem:[#allocation2 + $0x120] sm:$0xff] }
 0x47e   : > { %3738 = vrot.lane.b32.xlu0 %v3088_v52, %s4752_s14  ;;  %3552 = vrot.lane.b32.xlu1 %v6225_v14, %s4751_s13 }
 0x480   : > { %v3907_v13 = vpop.permute.xlu0 %3906  ;;  %v3721_v23 = vpop.permute.xlu1 %3720 }
 0x481   : > { %4002 = vst.msk [vmem:[#allocation3] sm:$0xff] %vm1977_vm10, %v3907_v13  ;;  %v3289_v13 = vld [vmem:[#allocation2 + $0x12a] sm:$0xff] }
 0x482   : > { %3813 = vst.msk [vmem:[#allocation3 + $0x18] sm:$0xff] %vm1784_vm9, %v3721_v23  ;;  %3742 = vrot.lane.b32.xlu0 %v3664_v46, %s4752_s14  ;;  %3740 = vrot.lane.b32.xlu1 %v3089_v62, %s4752_s14 }
 0x484   : > { %v3911_v57 = vpop.permute.xlu0 %3910  ;;  %v3909_v2 = vpop.permute.xlu1 %3908 }
 0x485   : > { %4004 = vst.msk [vmem:[#allocation3 + $0x10] sm:$0xff] %vm1977_vm10, %v3911_v57  ;;  %4003 = vst.msk [vmem:[#allocation3 + $0x8] sm:$0xff] %vm1977_vm10, %v3909_v2  ;;  %v3479_v57 = vld [vmem:[#allocation2 + $0x128] sm:$0xff] }
 0x486   : > { %3930 = vrot.lane.b32.xlu0 %v6362_v22, %s4753_s21  ;;  %3744 = vrot.lane.b32.xlu1 %v3665_v42, %s4752_s14 }
 0x488   : > { %v3147_v14 = vpop.permute.xlu0 %3146  ;;  %v3913_v60 = vpop.permute.xlu1 %3912  ;;  %v4034_v50 = vld [vmem:[#allocation3] sm:$0xff] }
 0x489   : > { %3238 = vst.msk [vmem:[#allocation3 + $0x20] sm:$0xff] %vm1204_vm5, %v3147_v14 }
 0x48a   : > { %4005 = vst.msk [vmem:[#allocation3 + $0x18] sm:$0xff] %vm1977_vm10, %v3913_v60  ;;  %3934 = vrot.lane.b32.xlu0 %v6372_v33, %s4753_s21  ;;  %3932 = vrot.lane.b32.xlu1 %v6374_v17, %s4753_s21 }
 0x48c   : > { %v3151_v38 = vpop.permute.xlu0 %3150  ;;  %v3149_v56 = vpop.permute.xlu1 %3148  ;;  %v4035_v16 = vld [vmem:[#allocation3 + $0x8] sm:$0xff]  ;;  %v4036_v26 = vld [vmem:[#allocation3 + $0x10] sm:$0xff] }
 0x48d   : > { %3240 = vst.msk [vmem:[#allocation3 + $0x30] sm:$0xff] %vm1204_vm5, %v3151_v38  ;;  %3239 = vst.msk [vmem:[#allocation3 + $0x28] sm:$0xff] %vm1204_vm5, %v3149_v56  ;;  %v4066_v22 = vpack.c.bf16 %v4035_v16, %v4034_v50  ;;  %v3673_v50 = vld [vmem:[#allocation2 + $0x141] sm:$0xff] }
 0x48e   : > { %3170 = vrot.lane.b32.xlu0 %v3664_v46, %s4749_s11  ;;  %3936 = vrot.lane.b32.xlu1 %v6383_v58, %s4753_s21 }
 0x48f   : > { %4680 = vmatprep.mubr.msk.bf16.mxu1 %vm2078_vm11, %v4066_v22  ;;  %v3864_v22 = vld [vmem:[#allocation2 + $0x13a] sm:$0xff] }
 0x490   : > { %v3339_v36 = vpop.permute.xlu0 %3338  ;;  %v3153_v35 = vpop.permute.xlu1 %3152 }
 0x491   : > { %v4037_v17 = vld [vmem:[#allocation3 + $0x18] sm:$0xff]  ;;  %3430 = vst.msk [vmem:[#allocation3 + $0x20] sm:$0xff] %vm1397_vm6, %v3339_v36 }
 0x492   : > { %3241 = vst.msk [vmem:[#allocation3 + $0x38] sm:$0xff] %vm1204_vm5, %v3153_v35  ;;  %v4067_v24 = vpack.c.bf16 %v4037_v17, %v4036_v26  ;;  %3174 = vrot.lane.b32.xlu0 %v3092_v49, %s4749_s11  ;;  %3172 = vrot.lane.b32.xlu1 %v3665_v42, %s4749_s11 }
 0x494   : > { %4681 = vmatmul.mubr.msk.bf16.vlgmr.msra.gmra.mxu1 %vm2078_vm11, %v4067_v24  ;;  %v3343_v43 = vpop.permute.xlu0 %3342  ;;  %v3341_v1 = vpop.permute.xlu1 %3340  ;;  %v3865_v24 = vld [vmem:[#allocation2 + $0x142] sm:$0xff] }
 0x495   : > { %3432 = vst.msk [vmem:[#allocation3 + $0x30] sm:$0xff] %vm1397_vm6, %v3343_v43  ;;  %3431 = vst.msk [vmem:[#allocation3 + $0x28] sm:$0xff] %vm1397_vm6, %v3341_v1 }
 0x496   : > { %3362 = vrot.lane.b32.xlu0 %v6372_v33, %s4750_s12  ;;  %3176 = vrot.lane.b32.xlu1 %v3093_v54, %s4749_s11  ;;  %v3285_v33 = vld [vmem:[#allocation2 + $0xfa] sm:$0xff] }
 0x498   : > { %v3531_v20 = vpop.permute.xlu0 %3530  ;;  %v3345_v6 = vpop.permute.xlu1 %3344 }
 0x499   : > { %3622 = vst.msk [vmem:[#allocation3 + $0x20] sm:$0xff] %vm1591_vm8, %v3531_v20 }
 0x49a   : > { %3433 = vst.msk [vmem:[#allocation3 + $0x38] sm:$0xff] %vm1397_vm6, %v3345_v6  ;;  %3366 = vrot.lane.b32.xlu0 %v6381_v55, %s4750_s12  ;;  %3364 = vrot.lane.b32.xlu1 %v6383_v58, %s4750_s12 }
 0x49c   : > { %v3535_v32 = vpop.permute.xlu0 %3534  ;;  %v3533_v47 = vpop.permute.xlu1 %3532 }
 0x49d   : > { %3624 = vst.msk [vmem:[#allocation3 + $0x30] sm:$0xff] %vm1591_vm8, %v3535_v32  ;;  %3623 = vst.msk [vmem:[#allocation3 + $0x28] sm:$0xff] %vm1591_vm8, %v3533_v47  ;;  %v2908_v32 = vld [vmem:[#allocation2 + $0x150] sm:$0xff]  ;;  %v2907_v47 = vld [vmem:[#allocation2 + $0x140] sm:$0xff] }
 0x49e   : > { %3554 = vrot.lane.b32.xlu0 %v6205_v15, %s4751_s13  ;;  %3368 = vrot.lane.b32.xlu1 %v3285_v33, %s4750_s12 }
 0x4a0   : > { %v3723_v10 = vpop.permute.xlu0 %3722  ;;  %v3537_v5 = vpop.permute.xlu1 %3536 }
 0x4a1   : > { %3814 = vst.msk [vmem:[#allocation3 + $0x20] sm:$0xff] %vm1784_vm9, %v3723_v10 }
 0x4a2   : > { %3625 = vst.msk [vmem:[#allocation3 + $0x38] sm:$0xff] %vm1591_vm8, %v3537_v5  ;;  %3558 = vrot.lane.b32.xlu0 %v6241_v45, %s4751_s13  ;;  %3556 = vrot.lane.b32.xlu1 %v6217_v31, %s4751_s13  ;;  %v3668_v45 = vld [vmem:[#allocation2 + $0x109] sm:$0xff] }
 0x4a4   : > { %v3727_v55 = vpop.permute.xlu0 %3726  ;;  %v3725_v58 = vpop.permute.xlu1 %3724 }
 0x4a5   : > { %3816 = vst.msk [vmem:[#allocation3 + $0x30] sm:$0xff] %vm1784_vm9, %v3727_v55  ;;  %3815 = vst.msk [vmem:[#allocation3 + $0x28] sm:$0xff] %vm1784_vm9, %v3725_v58  ;;  %v2909_v55 = vld [vmem:[#allocation2 + $0x158] sm:$0xff] }
 0x4a6   : > { %3746 = vrot.lane.b32.xlu0 %v3092_v49, %s4752_s14  ;;  %3560 = vrot.lane.b32.xlu1 %v6257_v51, %s4751_s13  ;;  %v2906_v49 = vld [vmem:[#allocation2 + $0x138] sm:$0xff] }
 0x4a8   : > { %v3915_v15 = vpop.permute.xlu0 %3914  ;;  %v3729_v40 = vpop.permute.xlu1 %3728 }
 0x4a9   : > { %4006 = vst.msk [vmem:[#allocation3 + $0x20] sm:$0xff] %vm1977_vm10, %v3915_v15 }
 0x4aa   : > { %3817 = vst.msk [vmem:[#allocation3 + $0x38] sm:$0xff] %vm1784_vm9, %v3729_v40  ;;  %3750 = vrot.lane.b32.xlu0 %v3668_v45, %s4752_s14  ;;  %3748 = vrot.lane.b32.xlu1 %v3093_v54, %s4752_s14  ;;  %v3100_v40 = vld [vmem:[#allocation2 + $0x151] sm:$0xff] }
 0x4ac   : > { %v3919_v31 = vpop.permute.xlu0 %3918  ;;  %v3917_v3 = vpop.permute.xlu1 %3916 }
 0x4ad   : > { %4008 = vst.msk [vmem:[#allocation3 + $0x30] sm:$0xff] %vm1977_vm10, %v3919_v31  ;;  %4007 = vst.msk [vmem:[#allocation3 + $0x28] sm:$0xff] %vm1977_vm10, %v3917_v3  ;;  %v3101_v3 = vld [vmem:[#allocation2 + $0x159] sm:$0xff] }
 0x4ae   : > { %3938 = vrot.lane.b32.xlu0 %v3858_v28, %s4753_s21  ;;  %3752 = vrot.lane.b32.xlu1 %v3669_v41, %s4752_s14 }
 0x4b0   : > { %v3155_v51 = vpop.permute.xlu0 %3154  ;;  %v3921_v37 = vpop.permute.xlu1 %3920  ;;  %v4038_v18 = vld [vmem:[#allocation3 + $0x20] sm:$0xff] }
 0x4b1   : > { %3242 = vst.msk [vmem:[#allocation3 + $0x40] sm:$0xff] %vm1204_vm5, %v3155_v51  ;;  %v3292_v51 = vld [vmem:[#allocation2 + $0x152] sm:$0xff] }
 0x4b2   : > { %4009 = vst.msk [vmem:[#allocation3 + $0x38] sm:$0xff] %vm1977_vm10, %v3921_v37  ;;  %3942 = vrot.lane.b32.xlu0 %v3860_v48, %s4753_s21  ;;  %3940 = vrot.lane.b32.xlu1 %v3285_v33, %s4753_s21 }
 0x4b4   : > { %v3159_v44 = vpop.permute.xlu0 %3158  ;;  %v3157_v4 = vpop.permute.xlu1 %3156  ;;  %v4039_v39 = vld [vmem:[#allocation3 + $0x28] sm:$0xff]  ;;  %v4040_v61 = vld [vmem:[#allocation3 + $0x30] sm:$0xff] }
 0x4b5   : > { %3244 = vst.msk [vmem:[#allocation3 + $0x50] sm:$0xff] %vm1204_vm5, %v3159_v44  ;;  %3243 = vst.msk [vmem:[#allocation3 + $0x48] sm:$0xff] %vm1204_vm5, %v3157_v4  ;;  %v4068_v8 = vpack.c.bf16 %v4039_v39, %v4038_v18  ;;  %v3293_v44 = vld [vmem:[#allocation2 + $0x15a] sm:$0xff]  ;;  %v3484_v39 = vld [vmem:[#allocation2 + $0x168] sm:$0xff] }
 0x4b6   : > { %3178 = vrot.lane.b32.xlu0 %v3668_v45, %s4749_s11  ;;  %3944 = vrot.lane.b32.xlu1 %v3861_v9, %s4753_s21 }
 0x4b7   : > { %4684 = vmatprep.mubr.msk.bf16.mxu1 %vm2078_vm11, %v4068_v8 }
 0x4b8   : > { %v3347_v7 = vpop.permute.xlu0 %3346  ;;  %v3161_v27 = vpop.permute.xlu1 %3160 }
 0x4b9   : > { %v4041_v52 = vld [vmem:[#allocation3 + $0x38] sm:$0xff]  ;;  %3434 = vst.msk [vmem:[#allocation3 + $0x40] sm:$0xff] %vm1397_vm6, %v3347_v7  ;;  %v3485_v7 = vld [vmem:[#allocation2 + $0x170] sm:$0xff] }
 0x4ba   : > { %3245 = vst.msk [vmem:[#allocation3 + $0x58] sm:$0xff] %vm1204_vm5, %v3161_v27  ;;  %v4069_v25 = vpack.c.bf16 %v4041_v52, %v4040_v61  ;;  %3182 = vrot.lane.b32.xlu0 %v3096_v63, %s4749_s11  ;;  %3180 = vrot.lane.b32.xlu1 %v3669_v41, %s4749_s11  ;;  %v3676_v52 = vld [vmem:[#allocation2 + $0x169] sm:$0xff] }
 0x4bc   : > { %4685 = vmatmul.mubr.msk.bf16.gmra.mxu1 %vm2078_vm11, %v4069_v25  ;;  %v3351_v62 = vpop.permute.xlu0 %3350  ;;  %v3349_v0 = vpop.permute.xlu1 %3348 }
 0x4bd   : > { %3436 = vst.msk [vmem:[#allocation3 + $0x50] sm:$0xff] %vm1397_vm6, %v3351_v62  ;;  %3435 = vst.msk [vmem:[#allocation3 + $0x48] sm:$0xff] %vm1397_vm6, %v3349_v0 }
 0x4be   : > { %3370 = vrot.lane.b32.xlu0 %v3860_v48, %s4750_s12  ;;  %3184 = vrot.lane.b32.xlu1 %v3097_v34, %s4749_s11 }
 0x4c0   : > { %v3539_v59 = vpop.permute.xlu0 %3538  ;;  %v3353_v29 = vpop.permute.xlu1 %3352 }
 0x4c1   : > { %3626 = vst.msk [vmem:[#allocation3 + $0x40] sm:$0xff] %vm1591_vm8, %v3539_v59 }
 0x4c2   : > { %3437 = vst.msk [vmem:[#allocation3 + $0x58] sm:$0xff] %vm1397_vm6, %v3353_v29  ;;  %3374 = vrot.lane.b32.xlu0 %v3288_v53, %s4750_s12  ;;  %3372 = vrot.lane.b32.xlu1 %v3861_v9, %s4750_s12 }
 0x4c4   : > { %v3543_v12 = vpop.permute.xlu0 %3542  ;;  %v3541_v21 = vpop.permute.xlu1 %3540 }
 0x4c5   : > { %3628 = vst.msk [vmem:[#allocation3 + $0x50] sm:$0xff] %vm1591_vm8, %v3543_v12  ;;  %3627 = vst.msk [vmem:[#allocation3 + $0x48] sm:$0xff] %vm1591_vm8, %v3541_v21 }
 0x4c6   : > { %3562 = vrot.lane.b32.xlu0 %v3478_v11, %s4751_s13  ;;  %3376 = vrot.lane.b32.xlu1 %v3289_v13, %s4750_s12  ;;  %v3868_v11 = vld [vmem:[#allocation2 + $0x16a] sm:$0xff] }
 0x4c8   : > { %v3731_v23 = vpop.permute.xlu0 %3730  ;;  %v3545_v46 = vpop.permute.xlu1 %3544 }
 0x4c9   : > { %3818 = vst.msk [vmem:[#allocation3 + $0x40] sm:$0xff] %vm1784_vm9, %v3731_v23 }
 0x4ca   : > { %3629 = vst.msk [vmem:[#allocation3 + $0x58] sm:$0xff] %vm1591_vm8, %v3545_v46  ;;  %3566 = vrot.lane.b32.xlu0 %v6270_v30, %s4751_s13  ;;  %3564 = vrot.lane.b32.xlu1 %v3479_v57, %s4751_s13  ;;  %v3672_v30 = vld [vmem:[#allocation2 + $0x139] sm:$0xff] }
 0x4cb   : > { %v3869_v57 = vld [vmem:[#allocation2 + $0x172] sm:$0xff] }
 0x4cc   : > { %v3735_v2 = vpop.permute.xlu0 %3734  ;;  %v3733_v42 = vpop.permute.xlu1 %3732 }
 0x4cd   : > { %3820 = vst.msk [vmem:[#allocation3 + $0x50] sm:$0xff] %vm1784_vm9, %v3735_v2  ;;  %3819 = vst.msk [vmem:[#allocation3 + $0x48] sm:$0xff] %vm1784_vm9, %v3733_v42 }
 0x4ce   : > { %3754 = vrot.lane.b32.xlu0 %v3096_v63, %s4752_s14  ;;  %3568 = vrot.lane.b32.xlu1 %v6283_v19, %s4751_s13 }
 0x4d0   : > { %v3923_v14 = vpop.permute.xlu0 %3922  ;;  %v3737_v60 = vpop.permute.xlu1 %3736 }
 0x4d1   : > { %4010 = vst.msk [vmem:[#allocation3 + $0x40] sm:$0xff] %vm1977_vm10, %v3923_v14  ;;  %v2912_v14 = vld [vmem:[#allocation2 + $0x180] sm:$0xff] }
 0x4d2   : > { %3821 = vst.msk [vmem:[#allocation3 + $0x58] sm:$0xff] %vm1784_vm9, %v3737_v60  ;;  %3758 = vrot.lane.b32.xlu0 %v3672_v30, %s4752_s14  ;;  %3756 = vrot.lane.b32.xlu1 %v3097_v34, %s4752_s14  ;;  %v3677_v34 = vld [vmem:[#allocation2 + $0x171] sm:$0xff] }
 0x4d4   : > { %v3927_v38 = vpop.permute.xlu0 %3926  ;;  %v3925_v56 = vpop.permute.xlu1 %3924 }
 0x4d5   : > { %4012 = vst.msk [vmem:[#allocation3 + $0x50] sm:$0xff] %vm1977_vm10, %v3927_v38  ;;  %4011 = vst.msk [vmem:[#allocation3 + $0x48] sm:$0xff] %vm1977_vm10, %v3925_v56  ;;  %v2913_v38 = vld [vmem:[#allocation2 + $0x188] sm:$0xff] }
 0x4d6   : > { %3946 = vrot.lane.b32.xlu0 %v3288_v53, %s4753_s21  ;;  %3760 = vrot.lane.b32.xlu1 %v3673_v50, %s4752_s14 }
 0x4d8   : > { %v3163_v19 = vpop.permute.xlu0 %3162  ;;  %v3929_v16 = vpop.permute.xlu1 %3928  ;;  %v4042_v26 = vld [vmem:[#allocation3 + $0x40] sm:$0xff] }
 0x4d9   : > { %3246 = vst.msk [vmem:[#allocation3 + $0x60] sm:$0xff] %vm1204_vm5, %v3163_v19  ;;  %v3104_v19 = vld [vmem:[#allocation2 + $0x181] sm:$0xff] }
 0x4da   : > { %4013 = vst.msk [vmem:[#allocation3 + $0x58] sm:$0xff] %vm1977_vm10, %v3929_v16  ;;  %3950 = vrot.lane.b32.xlu0 %v3864_v22, %s4753_s21  ;;  %3948 = vrot.lane.b32.xlu1 %v3289_v13, %s4753_s21 }
 0x4dc   : > { %v3167_v36 = vpop.permute.xlu0 %3166  ;;  %v3165_v35 = vpop.permute.xlu1 %3164  ;;  %v4043_v17 = vld [vmem:[#allocation3 + $0x48] sm:$0xff]  ;;  %v4044_v20 = vld [vmem:[#allocation3 + $0x50] sm:$0xff] }
 0x4dd   : > { %3248 = vst.msk [vmem:[#allocation3 + $0x70] sm:$0xff] %vm1204_vm5, %v3167_v36  ;;  %3247 = vst.msk [vmem:[#allocation3 + $0x68] sm:$0xff] %vm1204_vm5, %v3165_v35  ;;  %v4070_v43 = vpack.c.bf16 %v4043_v17, %v4042_v26  ;;  %v3105_v36 = vld [vmem:[#allocation2 + $0x189] sm:$0xff] }
 0x4de   : > { %2994 = vrot.lane.b32.xlu0 %v2906_v49, %s4748_s10  ;;  %3952 = vrot.lane.b32.xlu1 %v3865_v24, %s4753_s21  ;;  %v3296_v17 = vld [vmem:[#allocation2 + $0x182] sm:$0xff] }
 0x4df   : > { %4688 = vmatprep.mubr.msk.bf16.mxu1 %vm2078_vm11, %v4070_v43  ;;  %v3297_v43 = vld [vmem:[#allocation2 + $0x18a] sm:$0xff] }
 0x4e0   : > { %v3355_v1 = vpop.permute.xlu0 %3354  ;;  %v3169_v54 = vpop.permute.xlu1 %3168 }
 0x4e1   : > { %v4045_v6 = vld [vmem:[#allocation3 + $0x58] sm:$0xff]  ;;  %3438 = vst.msk [vmem:[#allocation3 + $0x60] sm:$0xff] %vm1397_vm6, %v3355_v1  ;;  %v3488_v1 = vld [vmem:[#allocation2 + $0x198] sm:$0xff] }
 0x4e2   : > { %3249 = vst.msk [vmem:[#allocation3 + $0x78] sm:$0xff] %vm1204_vm5, %v3169_v54  ;;  %v4071_v33 = vpack.c.bf16 %v4045_v6, %v4044_v20  ;;  %2998 = vrot.lane.b32.xlu0 %v2908_v32, %s4748_s10  ;;  %2996 = vrot.lane.b32.xlu1 %v2907_v47, %s4748_s10  ;;  %v3489_v6 = vld [vmem:[#allocation2 + $0x1a0] sm:$0xff] }
 0x4e4   : > { %4689 = vmatmul.mubr.msk.bf16.gmra.mxu1 %vm2078_vm11, %v4071_v33  ;;  %v3359_v10 = vpop.permute.xlu0 %3358  ;;  %v3357_v5 = vpop.permute.xlu1 %3356 }
 0x4e5   : > { %3440 = vst.msk [vmem:[#allocation3 + $0x70] sm:$0xff] %vm1397_vm6, %v3359_v10  ;;  %3439 = vst.msk [vmem:[#allocation3 + $0x68] sm:$0xff] %vm1397_vm6, %v3357_v5 }
 0x4e6   : > { %3186 = vrot.lane.b32.xlu0 %v3672_v30, %s4749_s11  ;;  %3000 = vrot.lane.b32.xlu1 %v2909_v55, %s4748_s10 }
 0x4e8   : > { %v3547_v58 = vpop.permute.xlu0 %3546  ;;  %v3361_v15 = vpop.permute.xlu1 %3360 }
 0x4e9   : > { %3630 = vst.msk [vmem:[#allocation3 + $0x60] sm:$0xff] %vm1591_vm8, %v3547_v58 }
 0x4ea   : > { %3441 = vst.msk [vmem:[#allocation3 + $0x78] sm:$0xff] %vm1397_vm6, %v3361_v15  ;;  %3190 = vrot.lane.b32.xlu0 %v3100_v40, %s4749_s11  ;;  %3188 = vrot.lane.b32.xlu1 %v3673_v50, %s4749_s11 }
 0x4ec   : > { %v3551_v45 = vpop.permute.xlu0 %3550  ;;  %v3549_v31 = vpop.permute.xlu1 %3548 }
 0x4ed   : > { %3632 = vst.msk [vmem:[#allocation3 + $0x70] sm:$0xff] %vm1591_vm8, %v3551_v45  ;;  %3631 = vst.msk [vmem:[#allocation3 + $0x68] sm:$0xff] %vm1591_vm8, %v3549_v31 }
 0x4ee   : > { %3378 = vrot.lane.b32.xlu0 %v3864_v22, %s4750_s12  ;;  %3192 = vrot.lane.b32.xlu1 %v3101_v3, %s4749_s11 }
 0x4f0   : > { %v3739_v28 = vpop.permute.xlu0 %3738  ;;  %v3553_v41 = vpop.permute.xlu1 %3552 }
 0x4f1   : > { %3822 = vst.msk [vmem:[#allocation3 + $0x60] sm:$0xff] %vm1784_vm9, %v3739_v28 }
 0x4f2   : > { %3633 = vst.msk [vmem:[#allocation3 + $0x78] sm:$0xff] %vm1591_vm8, %v3553_v41  ;;  %3382 = vrot.lane.b32.xlu0 %v3292_v51, %s4750_s12  ;;  %3380 = vrot.lane.b32.xlu1 %v3865_v24, %s4750_s12 }
 0x4f4   : > { %v3743_v37 = vpop.permute.xlu0 %3742  ;;  %v3741_v48 = vpop.permute.xlu1 %3740 }
 0x4f5   : > { %3824 = vst.msk [vmem:[#allocation3 + $0x70] sm:$0xff] %vm1784_vm9, %v3743_v37  ;;  %3823 = vst.msk [vmem:[#allocation3 + $0x68] sm:$0xff] %vm1784_vm9, %v3741_v48 }
 0x4f6   : > { %3570 = vrot.lane.b32.xlu0 %v2908_v32, %s4751_s13  ;;  %3384 = vrot.lane.b32.xlu1 %v3293_v44, %s4750_s12 }
 0x4f8   : > { %v3931_v4 = vpop.permute.xlu0 %3930  ;;  %v3745_v18 = vpop.permute.xlu1 %3744 }
 0x4f9   : > { %4014 = vst.msk [vmem:[#allocation3 + $0x60] sm:$0xff] %vm1977_vm10, %v3931_v4 }
 0x4fa   : > { %3825 = vst.msk [vmem:[#allocation3 + $0x78] sm:$0xff] %vm1784_vm9, %v3745_v18  ;;  %3574 = vrot.lane.b32.xlu0 %v3484_v39, %s4751_s13  ;;  %3572 = vrot.lane.b32.xlu1 %v2909_v55, %s4751_s13  ;;  %v3680_v55 = vld [vmem:[#allocation2 + $0x199] sm:$0xff] }
 0x4fc   : > { %v3935_v9 = vpop.permute.xlu0 %3934  ;;  %v3933_v8 = vpop.permute.xlu1 %3932 }
 0x4fd   : > { %4016 = vst.msk [vmem:[#allocation3 + $0x70] sm:$0xff] %vm1977_vm10, %v3935_v9  ;;  %4015 = vst.msk [vmem:[#allocation3 + $0x68] sm:$0xff] %vm1977_vm10, %v3933_v8 }
 0x4fe   : > { %3762 = vrot.lane.b32.xlu0 %v3100_v40, %s4752_s14  ;;  %3576 = vrot.lane.b32.xlu1 %v3485_v7, %s4751_s13 }
 0x500   : > { %v3171_v27 = vpop.permute.xlu0 %3170  ;;  %v3937_v61 = vpop.permute.xlu1 %3936  ;;  %v4046_v62 = vld [vmem:[#allocation3 + $0x60] sm:$0xff] }
 0x501   : > { %3250 = vst.msk [vmem:[#allocation3 + $0x80] sm:$0xff] %vm1204_vm5, %v3171_v27 }
 0x502   : > { %4017 = vst.msk [vmem:[#allocation3 + $0x78] sm:$0xff] %vm1977_vm10, %v3937_v61  ;;  %3766 = vrot.lane.b32.xlu0 %v3676_v52, %s4752_s14  ;;  %3764 = vrot.lane.b32.xlu1 %v3101_v3, %s4752_s14  ;;  %v3681_v3 = vld [vmem:[#allocation2 + $0x1a1] sm:$0xff] }
 0x504   : > { %v3175_v63 = vpop.permute.xlu0 %3174  ;;  %v3173_v25 = vpop.permute.xlu1 %3172  ;;  %v4047_v0 = vld [vmem:[#allocation3 + $0x68] sm:$0xff]  ;;  %v4048_v12 = vld [vmem:[#allocation3 + $0x70] sm:$0xff] }
 0x505   : > { %3252 = vst.msk [vmem:[#allocation3 + $0x90] sm:$0xff] %vm1204_vm5, %v3175_v63  ;;  %3251 = vst.msk [vmem:[#allocation3 + $0x88] sm:$0xff] %vm1204_vm5, %v3173_v25  ;;  %v4072_v59 = vpack.c.bf16 %v4047_v0, %v4046_v62  ;;  %v6906_v0 = vld [vmem:[%s7141_s5] ss:$0 sm:$0xff] }
 0x506   : > { %3954 = vrot.lane.b32.xlu0 %v3292_v51, %s4753_s21  ;;  %3768 = vrot.lane.b32.xlu1 %v3677_v34, %s4752_s14  ;;  %v3872_v51 = vld [vmem:[#allocation2 + $0x19a] sm:$0xff] }
 0x507   : > { %4692 = vmatprep.mubr.msk.bf16.mxu1 %vm2078_vm11, %v4072_v59  ;;  %v6911_v59 = vld [vmem:[%s7142_s6] ss:$0 sm:$0xff] }
 0x508   : > { %v3363_v29 = vpop.permute.xlu0 %3362  ;;  %v3177_v53 = vpop.permute.xlu1 %3176 }
 0x509   : > { %v4049_v21 = vld [vmem:[#allocation3 + $0x78] sm:$0xff]  ;;  %3442 = vst.msk [vmem:[#allocation3 + $0x80] sm:$0xff] %vm1397_vm6, %v3363_v29 }
 0x50a   : > { %3253 = vst.msk [vmem:[#allocation3 + $0x98] sm:$0xff] %vm1204_vm5, %v3177_v53  ;;  %v4073_v13 = vpack.c.bf16 %v4049_v21, %v4048_v12  ;;  %3958 = vrot.lane.b32.xlu0 %v3868_v11, %s4753_s21  ;;  %3956 = vrot.lane.b32.xlu1 %v3293_v44, %s4753_s21  ;;  %v3873_v44 = vld [vmem:[#allocation2 + $0x1a2] sm:$0xff] }
 0x50c   : > { %4693 = vmatmul.mubr.msk.bf16.gmra.mxu1 %vm2078_vm11, %v4073_v13  ;;  %v3367_v23 = vpop.permute.xlu0 %3366  ;;  %v3365_v46 = vpop.permute.xlu1 %3364 }
 0x50d   : > { %3444 = vst.msk [vmem:[#allocation3 + $0x90] sm:$0xff] %vm1397_vm6, %v3367_v23  ;;  %3443 = vst.msk [vmem:[#allocation3 + $0x88] sm:$0xff] %vm1397_vm6, %v3365_v46 }
 0x50e   : > { %3002 = vrot.lane.b32.xlu0 %v3484_v39, %s4748_s10  ;;  %3960 = vrot.lane.b32.xlu1 %v3869_v57, %s4753_s21 }
 0x510   : > { %v3555_v2 = vpop.permute.xlu0 %3554  ;;  %v3369_v42 = vpop.permute.xlu1 %3368 }
 0x511   : > { %3634 = vst.msk [vmem:[#allocation3 + $0x80] sm:$0xff] %vm1591_vm8, %v3555_v2 }
 0x512   : > { %3445 = vst.msk [vmem:[#allocation3 + $0x98] sm:$0xff] %vm1397_vm6, %v3369_v42  ;;  %3006 = vrot.lane.b32.xlu0 %v2912_v14, %s4748_s10  ;;  %3004 = vrot.lane.b32.xlu1 %v3485_v7, %s4748_s10  ;;  %v7299_v42 = vld [vmem:[#allocation5_spill] sm:$0xff] }
 0x514   : > { %v3559_v60 = vpop.permute.xlu0 %3558  ;;  %v3557_v30 = vpop.permute.xlu1 %3556 }
 0x515   : > { %3636 = vst.msk [vmem:[#allocation3 + $0x90] sm:$0xff] %vm1591_vm8, %v3559_v60  ;;  %3635 = vst.msk [vmem:[#allocation3 + $0x88] sm:$0xff] %vm1591_vm8, %v3557_v30 }
 0x516   : > { %3194 = vrot.lane.b32.xlu0 %v3676_v52, %s4749_s11  ;;  %3008 = vrot.lane.b32.xlu1 %v2913_v38, %s4748_s10 }
 0x518   : > { %v3747_v56 = vpop.permute.xlu0 %3746  ;;  %v3561_v50 = vpop.permute.xlu1 %3560 }
 0x519   : > { %3826 = vst.msk [vmem:[#allocation3 + $0x80] sm:$0xff] %vm1784_vm9, %v3747_v56 }
 0x51a   : > { %3637 = vst.msk [vmem:[#allocation3 + $0x98] sm:$0xff] %vm1591_vm8, %v3561_v50  ;;  %3198 = vrot.lane.b32.xlu0 %v3104_v19, %s4749_s11  ;;  %3196 = vrot.lane.b32.xlu1 %v3677_v34, %s4749_s11 }
 0x51c   : > { %v3751_v16 = vpop.permute.xlu0 %3750  ;;  %v3749_v22 = vpop.permute.xlu1 %3748 }
 0x51d   : > { %3828 = vst.msk [vmem:[#allocation3 + $0x90] sm:$0xff] %vm1784_vm9, %v3751_v16  ;;  %3827 = vst.msk [vmem:[#allocation3 + $0x88] sm:$0xff] %vm1784_vm9, %v3749_v22 }
 0x51e   : > { %3386 = vrot.lane.b32.xlu0 %v3868_v11, %s4750_s12  ;;  %3200 = vrot.lane.b32.xlu1 %v3105_v36, %s4749_s11 }
 0x520   : > { %v3939_v35 = vpop.permute.xlu0 %3938  ;;  %v3753_v26 = vpop.permute.xlu1 %3752 }
 0x521   : > { %4018 = vst.msk [vmem:[#allocation3 + $0x80] sm:$0xff] %vm1977_vm10, %v3939_v35  ;;  %v7300_v35 = vld [vmem:[#allocation4_spill] sm:$0xff] }
 0x522   : > { %3829 = vst.msk [vmem:[#allocation3 + $0x98] sm:$0xff] %vm1784_vm9, %v3753_v26  ;;  %3390 = vrot.lane.b32.xlu0 %v3296_v17, %s4750_s12  ;;  %3388 = vrot.lane.b32.xlu1 %v3869_v57, %s4750_s12 }
 0x524   : > { %v3943_v49 = vpop.permute.xlu0 %3942  ;;  %v3941_v24 = vpop.permute.xlu1 %3940 }
 0x525   : > { %4020 = vst.msk [vmem:[#allocation3 + $0x90] sm:$0xff] %vm1977_vm10, %v3943_v49  ;;  %4019 = vst.msk [vmem:[#allocation3 + $0x88] sm:$0xff] %vm1977_vm10, %v3941_v24 }
 0x526   : > { %3578 = vrot.lane.b32.xlu0 %v2912_v14, %s4751_s13  ;;  %3392 = vrot.lane.b32.xlu1 %v3297_v43, %s4750_s12 }
 0x528   : > { %v3179_v54 = vpop.permute.xlu0 %3178  ;;  %v3945_v20 = vpop.permute.xlu1 %3944  ;;  %v4050_v33 = vld [vmem:[#allocation3 + $0x80] sm:$0xff] }
 0x529   : > { %3254 = vst.msk [vmem:[#allocation3 + $0xa0] sm:$0xff] %vm1204_vm5, %v3179_v54 }
 0x52a   : > { %4021 = vst.msk [vmem:[#allocation3 + $0x98] sm:$0xff] %vm1977_vm10, %v3945_v20  ;;  %3582 = vrot.lane.b32.xlu0 %v3488_v1, %s4751_s13  ;;  %3580 = vrot.lane.b32.xlu1 %v2913_v38, %s4751_s13 }
 0x52c   : > { %v3183_v32 = vpop.permute.xlu0 %3182  ;;  %v3181_v47 = vpop.permute.xlu1 %3180  ;;  %v4051_v10 = vld [vmem:[#allocation3 + $0x88] sm:$0xff]  ;;  %v4052_v40 = vld [vmem:[#allocation3 + $0x90] sm:$0xff] }
 0x52d   : > { %3256 = vst.msk [vmem:[#allocation3 + $0xb0] sm:$0xff] %vm1204_vm5, %v3183_v32  ;;  %3255 = vst.msk [vmem:[#allocation3 + $0xa8] sm:$0xff] %vm1204_vm5, %v3181_v47  ;;  %v4074_v5 = vpack.c.bf16 %v4051_v10, %v4050_v33  ;;  %v7302_v47 = vld [vmem:[#allocation6_spill] sm:$0xff] }
 0x52e   : > { %3770 = vrot.lane.b32.xlu0 %v3104_v19, %s4752_s14  ;;  %3584 = vrot.lane.b32.xlu1 %v3489_v6, %s4751_s13 }
 0x52f   : > { %4696 = vmatprep.mubr.msk.bf16.mxu1 %vm2078_vm11, %v4074_v5 }
 0x530   : > { %v3371_v58 = vpop.permute.xlu0 %3370  ;;  %v3185_v15 = vpop.permute.xlu1 %3184 }
 0x531   : > { %v4053_v45 = vld [vmem:[#allocation3 + $0x98] sm:$0xff]  ;;  %3446 = vst.msk [vmem:[#allocation3 + $0xa0] sm:$0xff] %vm1397_vm6, %v3371_v58 }
 0x532   : > { %3257 = vst.msk [vmem:[#allocation3 + $0xb8] sm:$0xff] %vm1204_vm5, %v3185_v15  ;;  %v4075_v31 = vpack.c.bf16 %v4053_v45, %v4052_v40  ;;  %3774 = vrot.lane.b32.xlu0 %v3680_v55, %s4752_s14  ;;  %3772 = vrot.lane.b32.xlu1 %v3105_v36, %s4752_s14 }
 0x534   : > { %4697 = vmatmul.mubr.msk.bf16.gmra.mxu1 %vm2078_vm11, %v4075_v31  ;;  %v3375_v28 = vpop.permute.xlu0 %3374  ;;  %v3373_v41 = vpop.permute.xlu1 %3372 }
 0x535   : > { %3448 = vst.msk [vmem:[#allocation3 + $0xb0] sm:$0xff] %vm1397_vm6, %v3375_v28  ;;  %3447 = vst.msk [vmem:[#allocation3 + $0xa8] sm:$0xff] %vm1397_vm6, %v3373_v41 }
 0x536   : > { %3962 = vrot.lane.b32.xlu0 %v3296_v17, %s4753_s21  ;;  %3776 = vrot.lane.b32.xlu1 %v3681_v3, %s4752_s14 }
 0x538   : > { %v3563_v37 = vpop.permute.xlu0 %3562  ;;  %v3377_v48 = vpop.permute.xlu1 %3376 }
 0x539   : > { %3638 = vst.msk [vmem:[#allocation3 + $0xa0] sm:$0xff] %vm1591_vm8, %v3563_v37 }
 0x53a   : > { %3449 = vst.msk [vmem:[#allocation3 + $0xb8] sm:$0xff] %vm1397_vm6, %v3377_v48  ;;  %3964 = vrot.lane.b32.xlu1 %v3297_v43, %s4753_s21  ;;  %3966 = vrot.lane.b32.xlu0 %v3872_v51, %s4753_s21  ;;  %v7301_v43 = vld [vmem:[#allocation8_spill] sm:$0xff] }
 0x53c   : > { %v3567_v4 = vpop.permute.xlu0 %3566  ;;  %v3565_v18 = vpop.permute.xlu1 %3564 }
 0x53d   : > { %3640 = vst.msk [vmem:[#allocation3 + $0xb0] sm:$0xff] %vm1591_vm8, %v3567_v4  ;;  %3639 = vst.msk [vmem:[#allocation3 + $0xa8] sm:$0xff] %vm1591_vm8, %v3565_v18 }
 0x53e   : > { %3968 = vrot.lane.b32.xlu1 %v3873_v44, %s4753_s21 }
 0x540   : > { %v3755_v39 = vpop.permute.xlu0 %3754  ;;  %v3569_v9 = vpop.permute.xlu1 %3568 }
 0x541   : > { %3830 = vst.msk [vmem:[#allocation3 + $0xa0] sm:$0xff] %vm1784_vm9, %v3755_v39 }
 0x542   : > { %3641 = vst.msk [vmem:[#allocation3 + $0xb8] sm:$0xff] %vm1591_vm8, %v3569_v9 }
 0x544   : > { %v3759_v8 = vpop.permute.xlu0 %3758  ;;  %v3757_v7 = vpop.permute.xlu1 %3756 }
 0x545   : > { %3832 = vst.msk [vmem:[#allocation3 + $0xb0] sm:$0xff] %vm1784_vm9, %v3759_v8  ;;  %3831 = vst.msk [vmem:[#allocation3 + $0xa8] sm:$0xff] %vm1784_vm9, %v3757_v7 }
 0x548   : > { %v3947_v27 = vpop.permute.xlu0 %3946  ;;  %v3761_v61 = vpop.permute.xlu1 %3760 }
 0x549   : > { %4022 = vst.msk [vmem:[#allocation3 + $0xa0] sm:$0xff] %vm1977_vm10, %v3947_v27 }
 0x54a   : > { %3833 = vst.msk [vmem:[#allocation3 + $0xb8] sm:$0xff] %vm1784_vm9, %v3761_v61 }
 0x54c   : > { %v3951_v52 = vpop.permute.xlu0 %3950  ;;  %v3949_v63 = vpop.permute.xlu1 %3948 }
 0x54d   : > { %4024 = vst.msk [vmem:[#allocation3 + $0xb0] sm:$0xff] %vm1977_vm10, %v3951_v52  ;;  %4023 = vst.msk [vmem:[#allocation3 + $0xa8] sm:$0xff] %vm1977_vm10, %v3949_v63  ;;  %v7303_v52 = vld [vmem:[#allocation9_spill] sm:$0xff] }
 0x550   : > { %v2995_v25 = vpop.permute.xlu0 %2994  ;;  %v3953_v62 = vpop.permute.xlu1 %3952  ;;  %v4054_v21 = vld [vmem:[#allocation3 + $0xa0] sm:$0xff] }
 0x551   : > { %3066 = vst.msk [vmem:[#allocation3 + $0xc0] sm:$0xff] %vm1011_vm4, %v2995_v25 }
 0x552   : > { %4025 = vst.msk [vmem:[#allocation3 + $0xb8] sm:$0xff] %vm1977_vm10, %v3953_v62 }
 0x554   : > { %v4682_v34 = vpop.f32.mrf.mxu1  ;;  %v2999_v53 = vpop.permute.xlu0 %2998  ;;  %v4055_v11 = vld [vmem:[#allocation3 + $0xa8] sm:$0xff]  ;;  %v4056_v50 = vld [vmem:[#allocation3 + $0xb0] sm:$0xff] }
 0x555   : > { %v4323_v29 = vmul.f32 %v4682_v34, %v6906_v0  ;;  %v2997_v12 = vpop.permute.xlu1 %2996  ;;  %3068 = vst.msk [vmem:[#allocation3 + $0xd0] sm:$0xff] %vm1011_vm4, %v2999_v53  ;;  %v4076_v23 = vpack.c.bf16 %v4055_v11, %v4054_v21  ;;  %v7304_v21 = vld [vmem:[#allocation7_spill] sm:$0xff] }
 0x556   : > { %3067 = vst.msk [vmem:[#allocation3 + $0xc8] sm:$0xff] %vm1011_vm4, %v2997_v12  ;;  %v4187_v13 = vpop.f32.mrf.mxu1 }
 0x557   : > { %v4362_v46 = vadd.f32 %v6911_v59, %v4323_v29  ;;  %v4321_v57 = vmul.f32 %v6906_v0, %v4187_v13  ;;  %4700 = vmatprep.mubr.msk.bf16.mxu1 %vm2078_vm11, %v4076_v23 }
 0x558   : > { %v4683_v2 = vpop.f32.mrf.mxu1  ;;  %v3187_v38 = vpop.permute.xlu0 %3186 }
 0x559   : > { %v4394_v14 = vadd.f32 %v4362_v46, %v7299_v42  ;;  %v4360_v60 = vadd.f32 %v6911_v59, %v4321_v57  ;;  %v4324_v30 = vmul.f32 %v4683_v2, %v6906_v0  ;;  %v3001_v56 = vpop.permute.xlu1 %3000  ;;  %v4057_v19 = vld [vmem:[#allocation3 + $0xb8] sm:$0xff]  ;;  %3258 = vst.msk [vmem:[#allocation3 + $0xc0] sm:$0xff] %vm1204_vm5, %v3187_v38  ;;  %v7305_v57 = vld [vmem:[#allocation12_spill] sm:$0xff] }
 0x55a   : > { %3069 = vst.msk [vmem:[#allocation3 + $0xd8] sm:$0xff] %vm1011_vm4, %v3001_v56  ;;  %v4190_v16 = vpop.f32.mrf.mxu1  ;;  %v4077_v22 = vpack.c.bf16 %v4057_v19, %v4056_v50  ;;  %v7306_v19 = vld [vmem:[#allocation10_spill] sm:$0xff] }
 0x55b   : > { %v4426_v36 = vmax.f32 %v4394_v14, 0.0  ;;  %v4392_v26 = vadd.f32 %v4360_v60, %v7300_v35  ;;  %v4363_v17 = vadd.f32 %v6911_v59, %v4324_v30  ;;  %v4322_v49 = vmul.f32 %v6906_v0, %v4190_v16 }
 0x55c   : > { %4701 = vmatmul.mubr.msk.bf16.gmra.mxu1 %vm2078_vm11, %v4077_v22  ;;  %v3191_v20 = vpop.permute.xlu0 %3190 }
 0x55d   : > { %4458 = vst.msk [vmem:[%s6927_s18 + $0x10] sm:$0xff] %vm280_vm0, %v4426_v36  ;;  %v4424_v24 = vmax.f32 %v4392_v26, 0.0  ;;  %v4395_v1 = vadd.f32 %v4363_v17, %v7301_v43  ;;  %v4361_v54 = vadd.f32 %v6911_v59, %v4322_v49  ;;  %v3189_v6 = vpop.permute.xlu1 %3188 }
 0x55e   : > { %3260 = vst.msk [vmem:[#allocation3 + $0xd0] sm:$0xff] %vm1204_vm5, %v3191_v20  ;;  %3259 = vst.msk [vmem:[#allocation3 + $0xc8] sm:$0xff] %vm1204_vm5, %v3189_v6 }
 0x55f   : > { %4456 = vst.msk [vmem:[%s6927_s18] sm:$0xff] %vm280_vm0, %v4424_v24  ;;  %v4427_v32 = vmax.f32 %v4395_v1, 0.0  ;;  %v4393_v33 = vadd.f32 %v4361_v54, %v7302_v47 }
 0x560   : > { %v3379_v5 = vpop.permute.xlu0 %3378 }
 0x561   : > { %4459 = vst.msk [vmem:[%s6927_s18 + $0x18] sm:$0xff] %vm280_vm0, %v4427_v32  ;;  %v4425_v10 = vmax.f32 %v4393_v33, 0.0  ;;  %v3193_v55 = vpop.permute.xlu1 %3192 }
 0x562   : > { %3450 = vst.msk [vmem:[#allocation3 + $0xc0] sm:$0xff] %vm1397_vm6, %v3379_v5 }
 0x563   : > { %3261 = vst.msk [vmem:[#allocation3 + $0xd8] sm:$0xff] %vm1204_vm5, %v3193_v55 }
 0x564   : > { %4457 = vst.msk [vmem:[%s6927_s18 + $0x8] sm:$0xff] %vm280_vm0, %v4425_v10  ;;  %v3383_v58 = vpop.permute.xlu0 %3382 }
 0x565   : > { %v3381_v15 = vpop.permute.xlu1 %3380  ;;  %3452 = vst.msk [vmem:[#allocation3 + $0xd0] sm:$0xff] %vm1397_vm6, %v3383_v58 }
 0x566   : > { %3451 = vst.msk [vmem:[#allocation3 + $0xc8] sm:$0xff] %vm1397_vm6, %v3381_v15 }
 0x568   : > { %v3571_v40 = vpop.permute.xlu0 %3570 }
 0x569   : > { %v3385_v45 = vpop.permute.xlu1 %3384  ;;  %3642 = vst.msk [vmem:[#allocation3 + $0xc0] sm:$0xff] %vm1591_vm8, %v3571_v40 }
 0x56a   : > { %3453 = vst.msk [vmem:[#allocation3 + $0xd8] sm:$0xff] %vm1397_vm6, %v3385_v45 }
 0x56c   : > { %v3575_v31 = vpop.permute.xlu0 %3574 }
 0x56d   : > { %v3573_v3 = vpop.permute.xlu1 %3572  ;;  %3644 = vst.msk [vmem:[#allocation3 + $0xd0] sm:$0xff] %vm1591_vm8, %v3575_v31 }
 0x56e   : > { %3643 = vst.msk [vmem:[#allocation3 + $0xc8] sm:$0xff] %vm1591_vm8, %v3573_v3 }
 0x570   : > { %v3763_v28 = vpop.permute.xlu0 %3762 }
 0x571   : > { %v3577_v41 = vpop.permute.xlu1 %3576  ;;  %3834 = vst.msk [vmem:[#allocation3 + $0xc0] sm:$0xff] %vm1784_vm9, %v3763_v28 }
 0x572   : > { %3645 = vst.msk [vmem:[#allocation3 + $0xd8] sm:$0xff] %vm1591_vm8, %v3577_v41 }
 0x574   : > { %v3767_v51 = vpop.permute.xlu0 %3766 }
 0x575   : > { %v3765_v37 = vpop.permute.xlu1 %3764  ;;  %3836 = vst.msk [vmem:[#allocation3 + $0xd0] sm:$0xff] %vm1784_vm9, %v3767_v51  ;;  %v7307_v51 = vld [vmem:[#allocation13_spill] sm:$0xff] }
 0x576   : > { %3835 = vst.msk [vmem:[#allocation3 + $0xc8] sm:$0xff] %vm1784_vm9, %v3765_v37 }
 0x578   : > { %v3955_v48 = vpop.permute.xlu0 %3954 }
 0x579   : > { %v3769_v44 = vpop.permute.xlu1 %3768  ;;  %4026 = vst.msk [vmem:[#allocation3 + $0xc0] sm:$0xff] %vm1977_vm10, %v3955_v48 }
 0x57a   : > { %3837 = vst.msk [vmem:[#allocation3 + $0xd8] sm:$0xff] %vm1784_vm9, %v3769_v44 }
 0x57c   : > { %v4686_v4 = vpop.f32.mrf.mxu1  ;;  %v3959_v39 = vpop.permute.xlu0 %3958 }
 0x57d   : > { %v4327_v18 = vmul.f32 %v4686_v4, %v6906_v0  ;;  %v3957_v9 = vpop.permute.xlu1 %3956  ;;  %4028 = vst.msk [vmem:[#allocation3 + $0xd0] sm:$0xff] %vm1977_vm10, %v3959_v39 }
 0x57e   : > { %4027 = vst.msk [vmem:[#allocation3 + $0xc8] sm:$0xff] %vm1977_vm10, %v3957_v9  ;;  %v4203_v8 = vpop.f32.mrf.mxu1 }
 0x57f   : > { %v4366_v7 = vadd.f32 %v6911_v59, %v4327_v18  ;;  %v4325_v27 = vmul.f32 %v6906_v0, %v4203_v8  ;;  %v7308_v8 = vld [vmem:[#allocation11_spill] sm:$0xff] }
 0x580   : > { %v4687_v61 = vpop.f32.mrf.mxu1  ;;  %v3003_v34 = vpop.permute.xlu0 %3002  ;;  %v4058_v30 = vld [vmem:[#allocation3 + $0xc0] sm:$0xff] }
 0x581   : > { %v4398_v63 = vadd.f32 %v4366_v7, %v7303_v52  ;;  %v4364_v25 = vadd.f32 %v6911_v59, %v4325_v27  ;;  %v4328_v62 = vmul.f32 %v4687_v61, %v6906_v0  ;;  %v3961_v29 = vpop.permute.xlu1 %3960  ;;  %3070 = vst.msk [vmem:[#allocation3 + $0xe0] sm:$0xff] %vm1011_vm4, %v3003_v34 }
 0x582   : > { %4029 = vst.msk [vmem:[#allocation3 + $0xd8] sm:$0xff] %vm1977_vm10, %v3961_v29  ;;  %v4206_v53 = vpop.f32.mrf.mxu1 }
 0x583   : > { %v4430_v12 = vmax.f32 %v4398_v63, 0.0  ;;  %v4396_v11 = vadd.f32 %v4364_v25, %v7304_v21  ;;  %v4367_v13 = vadd.f32 %v6911_v59, %v4328_v62  ;;  %v4326_v23 = vmul.f32 %v6906_v0, %v4206_v53  ;;  %v7309_v63 = vld [vmem:[#allocation16_spill] sm:$0xff] }
 0x584   : > { %v3007_v14 = vpop.permute.xlu0 %3006  ;;  %v4060_v26 = vld [vmem:[#allocation3 + $0xd0] sm:$0xff] }
 0x585   : > { %4462 = vst.msk [vmem:[%s6927_s18 + $0x30] sm:$0xff] %vm280_vm0, %v4430_v12  ;;  %v4428_v46 = vmax.f32 %v4396_v11, 0.0  ;;  %v4399_v2 = vadd.f32 %v4367_v13, %v7305_v57  ;;  %v4365_v42 = vadd.f32 %v6911_v59, %v4326_v23  ;;  %v3005_v60 = vpop.permute.xlu1 %3004  ;;  %v4059_v38 = vld [vmem:[#allocation3 + $0xc8] sm:$0xff]  ;;  %v7310_v12 = vld [vmem:[#allocation14_spill] sm:$0xff] }
 0x586   : > { %3072 = vst.msk [vmem:[#allocation3 + $0xf0] sm:$0xff] %vm1011_vm4, %v3007_v14  ;;  %3071 = vst.msk [vmem:[#allocation3 + $0xe8] sm:$0xff] %vm1011_vm4, %v3005_v60  ;;  %v4078_v56 = vpack.c.bf16 %v4059_v38, %v4058_v30 }
 0x587   : > { %4460 = vst.msk [vmem:[%s6927_s18 + $0x20] sm:$0xff] %vm280_vm0, %v4428_v46  ;;  %v4431_v50 = vmax.f32 %v4399_v2, 0.0  ;;  %v4397_v16 = vadd.f32 %v4365_v42, %v7306_v19 }
 0x588   : > { %4704 = vmatprep.mubr.msk.bf16.mxu1 %vm2078_vm11, %v4078_v56  ;;  %v3195_v36 = vpop.permute.xlu0 %3194 }
 0x589   : > { %4463 = vst.msk [vmem:[%s6927_s18 + $0x38] sm:$0xff] %vm280_vm0, %v4431_v50  ;;  %v4429_v22 = vmax.f32 %v4397_v16, 0.0  ;;  %v3009_v35 = vpop.permute.xlu1 %3008  ;;  %v4061_v17 = vld [vmem:[#allocation3 + $0xd8] sm:$0xff]  ;;  %v7311_v16 = vld [vmem:[#allocation17_spill] sm:$0xff] }
 0x58a   : > { %3262 = vst.msk [vmem:[#allocation3 + $0xe0] sm:$0xff] %vm1204_vm5, %v3195_v36  ;;  %v4079_v49 = vpack.c.bf16 %v4061_v17, %v4060_v26 }
 0x58b   : > { %3073 = vst.msk [vmem:[#allocation3 + $0xf8] sm:$0xff] %vm1011_vm4, %v3009_v35 }
 0x58c   : > { %4461 = vst.msk [vmem:[%s6927_s18 + $0x28] sm:$0xff] %vm280_vm0, %v4429_v22  ;;  %4705 = vmatmul.mubr.msk.bf16.gmra.mxu1 %vm2078_vm11, %v4079_v49  ;;  %v3199_v24 = vpop.permute.xlu0 %3198  ;;  %v7312_v49 = vld [vmem:[#allocation15_spill] sm:$0xff] }
 0x58d   : > { %v3197_v43 = vpop.permute.xlu1 %3196  ;;  %3264 = vst.msk [vmem:[#allocation3 + $0xf0] sm:$0xff] %vm1204_vm5, %v3199_v24 }
 0x58e   : > { %3263 = vst.msk [vmem:[#allocation3 + $0xe8] sm:$0xff] %vm1204_vm5, %v3197_v43 }
 0x590   : > { %v3387_v1 = vpop.permute.xlu0 %3386 }
 0x591   : > { %v3201_v54 = vpop.permute.xlu1 %3200  ;;  %3454 = vst.msk [vmem:[#allocation3 + $0xe0] sm:$0xff] %vm1397_vm6, %v3387_v1 }
 0x592   : > { %3265 = vst.msk [vmem:[#allocation3 + $0xf8] sm:$0xff] %vm1204_vm5, %v3201_v54 }
 0x594   : > { %v3391_v20 = vpop.permute.xlu0 %3390 }
 0x595   : > { %v3389_v6 = vpop.permute.xlu1 %3388  ;;  %3456 = vst.msk [vmem:[#allocation3 + $0xf0] sm:$0xff] %vm1397_vm6, %v3391_v20  ;;  %v7313_v20 = vld [vmem:[#allocation20_spill] sm:$0xff] }
 0x596   : > { %3455 = vst.msk [vmem:[#allocation3 + $0xe8] sm:$0xff] %vm1397_vm6, %v3389_v6 }
 0x598   : > { %v3579_v32 = vpop.permute.xlu0 %3578 }
 0x599   : > { %v3393_v47 = vpop.permute.xlu1 %3392  ;;  %3646 = vst.msk [vmem:[#allocation3 + $0xe0] sm:$0xff] %vm1591_vm8, %v3579_v32 }
 0x59a   : > { %3457 = vst.msk [vmem:[#allocation3 + $0xf8] sm:$0xff] %vm1397_vm6, %v3393_v47 }
 0x59c   : > { %v3583_v33 = vpop.permute.xlu0 %3582 }
 0x59d   : > { %v3581_v10 = vpop.permute.xlu1 %3580  ;;  %3648 = vst.msk [vmem:[#allocation3 + $0xf0] sm:$0xff] %vm1591_vm8, %v3583_v33  ;;  %v7314_v33 = vld [vmem:[#allocation18_spill] sm:$0xff] }
 0x59e   : > { %3647 = vst.msk [vmem:[#allocation3 + $0xe8] sm:$0xff] %vm1591_vm8, %v3581_v10 }
 0x5a0   : > { %v3771_v5 = vpop.permute.xlu0 %3770 }
 0x5a1   : > { %v3585_v55 = vpop.permute.xlu1 %3584  ;;  %3838 = vst.msk [vmem:[#allocation3 + $0xe0] sm:$0xff] %vm1784_vm9, %v3771_v5 }
 0x5a2   : > { %3649 = vst.msk [vmem:[#allocation3 + $0xf8] sm:$0xff] %vm1591_vm8, %v3585_v55 }
 0x5a4   : > { %v4690_v58 = vpop.f32.mrf.mxu1  ;;  %v3775_v40 = vpop.permute.xlu0 %3774 }
 0x5a5   : > { %v4331_v15 = vmul.f32 %v4690_v58, %v6906_v0  ;;  %v3773_v45 = vpop.permute.xlu1 %3772  ;;  %3840 = vst.msk [vmem:[#allocation3 + $0xf0] sm:$0xff] %vm1784_vm9, %v3775_v40 }
 0x5a6   : > { %3839 = vst.msk [vmem:[#allocation3 + $0xe8] sm:$0xff] %vm1784_vm9, %v3773_v45  ;;  %v4219_v31 = vpop.f32.mrf.mxu1 }
 0x5a7   : > { %v4370_v3 = vadd.f32 %v6911_v59, %v4331_v15  ;;  %v4329_v28 = vmul.f32 %v6906_v0, %v4219_v31 }
 0x5a8   : > { %v4691_v41 = vpop.f32.mrf.mxu1  ;;  %v3963_v4 = vpop.permute.xlu0 %3962 }
 0x5a9   : > { %v4402_v37 = vadd.f32 %v4370_v3, %v7307_v51  ;;  %v4368_v48 = vadd.f32 %v6911_v59, %v4329_v28  ;;  %v4332_v44 = vmul.f32 %v4691_v41, %v6906_v0  ;;  %v3777_v18 = vpop.permute.xlu1 %3776  ;;  %4030 = vst.msk [vmem:[#allocation3 + $0xe0] sm:$0xff] %vm1977_vm10, %v3963_v4  ;;  %v7315_v3 = vld [vmem:[#allocation21_spill] sm:$0xff] }
 0x5aa   : > { %3841 = vst.msk [vmem:[#allocation3 + $0xf8] sm:$0xff] %vm1784_vm9, %v3777_v18  ;;  %v4222_v39 = vpop.f32.mrf.mxu1 }
 0x5ab   : > { %v4434_v9 = vmax.f32 %v4402_v37, 0.0  ;;  %v4400_v7 = vadd.f32 %v4368_v48, %v7308_v8  ;;  %v4371_v27 = vadd.f32 %v6911_v59, %v4332_v44  ;;  %v4330_v61 = vmul.f32 %v6906_v0, %v4222_v39  ;;  %v7316_v44 = vld [vmem:[#allocation19_spill] sm:$0xff]  ;;  %v7317_v8 = vld [vmem:[#allocation24_spill] sm:$0xff] }
 0x5ac   : > { %v3967_v29 = vpop.permute.xlu0 %3966 }
 0x5ad   : > { %4466 = vst.msk [vmem:[%s6927_s18 + $0x50] sm:$0xff] %vm280_vm0, %v4434_v9  ;;  %v4432_v52 = vmax.f32 %v4400_v7, 0.0  ;;  %v4403_v25 = vadd.f32 %v4371_v27, %v7309_v63  ;;  %v4369_v62 = vadd.f32 %v6911_v59, %v4330_v61  ;;  %v3965_v34 = vpop.permute.xlu1 %3964 }
 0x5ae   : > { %4031 = vst.msk [vmem:[#allocation3 + $0xe8] sm:$0xff] %vm1977_vm10, %v3965_v34  ;;  %4032 = vst.msk [vmem:[#allocation3 + $0xf0] sm:$0xff] %vm1977_vm10, %v3967_v29 }
 0x5af   : > { %4464 = vst.msk [vmem:[%s6927_s18 + $0x40] sm:$0xff] %vm280_vm0, %v4432_v52  ;;  %v4435_v53 = vmax.f32 %v4403_v25, 0.0  ;;  %v4401_v21 = vadd.f32 %v4369_v62, %v7310_v12  ;;  %v7318_v52 = vld [vmem:[#allocation22_spill] sm:$0xff] }
 0x5b0   : > { %v4062_v23 = vld [vmem:[#allocation3 + $0xe0] sm:$0xff] }
 0x5b1   : > { %4467 = vst.msk [vmem:[%s6927_s18 + $0x58] sm:$0xff] %vm280_vm0, %v4435_v53  ;;  %v4433_v11 = vmax.f32 %v4401_v21, 0.0  ;;  %v3969_v13 = vpop.permute.xlu1 %3968 }
 0x5b2   : > { %4033 = vst.msk [vmem:[#allocation3 + $0xf8] sm:$0xff] %vm1977_vm10, %v3969_v13 }
 0x5b3   : > { %4465 = vst.msk [vmem:[%s6927_s18 + $0x48] sm:$0xff] %vm280_vm0, %v4433_v11  ;;  %v7319_v11 = vld [vmem:[#allocation25_spill] sm:$0xff] }
 0x5b5   : > { %v4063_v46 = vld [vmem:[#allocation3 + $0xe8] sm:$0xff]  ;;  %v4064_v2 = vld [vmem:[#allocation3 + $0xf0] sm:$0xff] }
 0x5b6   : > { %v4080_v57 = vpack.c.bf16 %v4063_v46, %v4062_v23 }
 0x5b8   : > { %4708 = vmatprep.mubr.msk.bf16.mxu1 %vm2078_vm11, %v4080_v57 }
 0x5b9   : > { %v4065_v42 = vld [vmem:[#allocation3 + $0xf8] sm:$0xff] }
 0x5ba   : > { %v4081_v14 = vpack.c.bf16 %v4065_v42, %v4064_v2  ;;  %v7320_v42 = vld [vmem:[#allocation23_spill] sm:$0xff] }
 0x5bc   : > { %4709 = vmatmul.mubr.msk.bf16.gmra.mxu1 %vm2078_vm11, %v4081_v14 }
 0x5cc   : > { %v4694_v60 = vpop.f32.mrf.mxu1 }
 0x5cd   : > { %v4335_v30 = vmul.f32 %v4694_v60, %v6906_v0 }
 0x5ce   : > { %v4235_v38 = vpop.f32.mrf.mxu1 }
 0x5cf   : > { %v4374_v56 = vadd.f32 %v6911_v59, %v4335_v30  ;;  %v4333_v50 = vmul.f32 %v6906_v0, %v4235_v38 }
 0x5d0   : > { %v4695_v19 = vpop.f32.mrf.mxu1 }
 0x5d1   : > { %v4406_v22 = vadd.f32 %v4374_v56, %v7311_v16  ;;  %v4372_v36 = vadd.f32 %v6911_v59, %v4333_v50  ;;  %v4336_v35 = vmul.f32 %v4695_v19, %v6906_v0  ;;  %v7321_v56 = vld [vmem:[#allocation28_spill] sm:$0xff] }
 0x5d2   : > { %v4238_v26 = vpop.f32.mrf.mxu1 }
 0x5d3   : > { %v4438_v17 = vmax.f32 %v4406_v22, 0.0  ;;  %v4404_v24 = vadd.f32 %v4372_v36, %v7312_v49  ;;  %v4375_v43 = vadd.f32 %v6911_v59, %v4336_v35  ;;  %v4334_v1 = vmul.f32 %v6906_v0, %v4238_v26  ;;  %v7322_v22 = vld [vmem:[#allocation26_spill] sm:$0xff] }
 0x5d5   : > { %4470 = vst.msk [vmem:[%s6927_s18 + $0x70] sm:$0xff] %vm280_vm0, %v4438_v17  ;;  %v4436_v54 = vmax.f32 %v4404_v24, 0.0  ;;  %v4407_v6 = vadd.f32 %v4375_v43, %v7313_v20  ;;  %v4373_v32 = vadd.f32 %v6911_v59, %v4334_v1 }
 0x5d7   : > { %4468 = vst.msk [vmem:[%s6927_s18 + $0x60] sm:$0xff] %vm280_vm0, %v4436_v54  ;;  %v4439_v47 = vmax.f32 %v4407_v6, 0.0  ;;  %v4405_v10 = vadd.f32 %v4373_v32, %v7314_v33  ;;  %v7323_v54 = vld [vmem:[#allocation29_spill] sm:$0xff] }
 0x5d9   : > { %4471 = vst.msk [vmem:[%s6927_s18 + $0x78] sm:$0xff] %vm280_vm0, %v4439_v47  ;;  %v4437_v5 = vmax.f32 %v4405_v10, 0.0  ;;  %v7324_v10 = vld [vmem:[#allocation27_spill] sm:$0xff] }
 0x5db   : > { %4469 = vst.msk [vmem:[%s6927_s18 + $0x68] sm:$0xff] %vm280_vm0, %v4437_v5 }
 0x5f4   : > { %v4698_v55 = vpop.f32.mrf.mxu1 }
 0x5f5   : > { %v4339_v58 = vmul.f32 %v4698_v55, %v6906_v0 }
 0x5f6   : > { %v4251_v15 = vpop.f32.mrf.mxu1 }
 0x5f7   : > { %v4378_v40 = vadd.f32 %v6911_v59, %v4339_v58  ;;  %v4337_v45 = vmul.f32 %v6906_v0, %v4251_v15 }
 0x5f8   : > { %v4699_v31 = vpop.f32.mrf.mxu1 }
 0x5f9   : > { %v4410_v28 = vadd.f32 %v4378_v40, %v7315_v3  ;;  %v4376_v41 = vadd.f32 %v6911_v59, %v4337_v45  ;;  %v4340_v51 = vmul.f32 %v4699_v31, %v6906_v0  ;;  %v7325_v40 = vld [vmem:[#allocation32_spill] sm:$0xff] }
 0x5fa   : > { %v4254_v37 = vpop.f32.mrf.mxu1 }
 0x5fb   : > { %v4442_v48 = vmax.f32 %v4410_v28, 0.0  ;;  %v4408_v4 = vadd.f32 %v4376_v41, %v7316_v44  ;;  %v4379_v18 = vadd.f32 %v6911_v59, %v4340_v51  ;;  %v4338_v39 = vmul.f32 %v6906_v0, %v4254_v37  ;;  %v7326_v28 = vld [vmem:[#allocation30_spill] sm:$0xff] }
 0x5fd   : > { %4474 = vst.msk [vmem:[%s6927_s18 + $0x90] sm:$0xff] %vm280_vm0, %v4442_v48  ;;  %v4440_v9 = vmax.f32 %v4408_v4, 0.0  ;;  %v4411_v7 = vadd.f32 %v4379_v18, %v7317_v8  ;;  %v4377_v27 = vadd.f32 %v6911_v59, %v4338_v39 }
 0x5ff   : > { %4472 = vst.msk [vmem:[%s6927_s18 + $0x80] sm:$0xff] %vm280_vm0, %v4440_v9  ;;  %v4443_v61 = vmax.f32 %v4411_v7, 0.0  ;;  %v4409_v63 = vadd.f32 %v4377_v27, %v7318_v52  ;;  %v7327_v9 = vld [vmem:[#allocation34_spill] sm:$0xff] }
 0x601   : > { %4475 = vst.msk [vmem:[%s6927_s18 + $0x98] sm:$0xff] %vm280_vm0, %v4443_v61  ;;  %v4441_v25 = vmax.f32 %v4409_v63, 0.0  ;;  %v7328_v63 = vld [vmem:[#allocation31_spill] sm:$0xff] }
 0x603   : > { %4473 = vst.msk [vmem:[%s6927_s18 + $0x88] sm:$0xff] %vm280_vm0, %v4441_v25 }
 0x61c   : > { %v4702_v62 = vpop.f32.mrf.mxu1 }
 0x61d   : > { %v4343_v34 = vmul.f32 %v4702_v62, %v6906_v0 }
 0x61e   : > { %v4267_v29 = vpop.f32.mrf.mxu1 }
 0x61f   : > { %v4382_v53 = vadd.f32 %v6911_v59, %v4343_v34  ;;  %v4341_v12 = vmul.f32 %v6906_v0, %v4267_v29 }
 0x620   : > { %v4703_v21 = vpop.f32.mrf.mxu1 }
 0x621   : > { %v4414_v13 = vadd.f32 %v4382_v53, %v7319_v11  ;;  %v4380_v23 = vadd.f32 %v6911_v59, %v4341_v12  ;;  %v4344_v46 = vmul.f32 %v4703_v21, %v6906_v0  ;;  %v7329_v53 = vld [vmem:[#allocation37_spill] sm:$0xff] }
 0x622   : > { %v4270_v57 = vpop.f32.mrf.mxu1 }
 0x623   : > { %v4446_v2 = vmax.f32 %v4414_v13, 0.0  ;;  %v4412_v14 = vadd.f32 %v4380_v23, %v7320_v42  ;;  %v4383_v60 = vadd.f32 %v6911_v59, %v4344_v46  ;;  %v4342_v30 = vmul.f32 %v6906_v0, %v4270_v57  ;;  %v7330_v13 = vld [vmem:[#allocation33_spill] sm:$0xff] }
 0x625   : > { %4478 = vst.msk [vmem:[%s6927_s18 + $0xb0] sm:$0xff] %vm280_vm0, %v4446_v2  ;;  %v4444_v38 = vmax.f32 %v4412_v14, 0.0  ;;  %v4415_v50 = vadd.f32 %v4383_v60, %v7321_v56  ;;  %v4381_v19 = vadd.f32 %v6911_v59, %v4342_v30 }
 0x627   : > { %4476 = vst.msk [vmem:[%s6927_s18 + $0xa0] sm:$0xff] %vm280_vm0, %v4444_v38  ;;  %v4447_v16 = vmax.f32 %v4415_v50, 0.0  ;;  %v4413_v36 = vadd.f32 %v4381_v19, %v7322_v22 }
 0x629   : > { %4479 = vst.msk [vmem:[%s6927_s18 + $0xb8] sm:$0xff] %vm280_vm0, %v4447_v16  ;;  %v4445_v35 = vmax.f32 %v4413_v36, 0.0 }
 0x62b   : > { %4477 = vst.msk [vmem:[%s6927_s18 + $0xa8] sm:$0xff] %vm280_vm0, %v4445_v35 }
 0x64c   : > { %v4706_v26 = vpop.f32.mrf.mxu1 }
 0x64d   : > { %v4347_v17 = vmul.f32 %v4706_v26, %v6906_v0 }
 0x64e   : > { %v4283_v49 = vpop.f32.mrf.mxu1 }
 0x64f   : > { %v4386_v24 = vadd.f32 %v6911_v59, %v4347_v17  ;;  %v4345_v43 = vmul.f32 %v6906_v0, %v4283_v49 }
 0x650   : > { %v4707_v1 = vpop.f32.mrf.mxu1 }
 0x651   : > { %v4418_v20 = vadd.f32 %v4386_v24, %v7323_v54  ;;  %v4384_v6 = vadd.f32 %v6911_v59, %v4345_v43  ;;  %v4348_v32 = vmul.f32 %v4707_v1, %v6906_v0 }
 0x652   : > { %v4286_v47 = vpop.f32.mrf.mxu1 }
 0x653   : > { %v4450_v33 = vmax.f32 %v4418_v20, 0.0  ;;  %v4416_v5 = vadd.f32 %v4384_v6, %v7324_v10  ;;  %v4387_v55 = vadd.f32 %v6911_v59, %v4348_v32  ;;  %v4346_v58 = vmul.f32 %v6906_v0, %v4286_v47 }
 0x655   : > { %4482 = vst.msk [vmem:[%s6927_s18 + $0xd0] sm:$0xff] %vm280_vm0, %v4450_v33  ;;  %v4448_v15 = vmax.f32 %v4416_v5, 0.0  ;;  %v4419_v45 = vadd.f32 %v4387_v55, %v7325_v40  ;;  %v4385_v31 = vadd.f32 %v6911_v59, %v4346_v58 }
 0x657   : > { %4480 = vst.msk [vmem:[%s6927_s18 + $0xc0] sm:$0xff] %vm280_vm0, %v4448_v15  ;;  %v4451_v3 = vmax.f32 %v4419_v45, 0.0  ;;  %v4417_v41 = vadd.f32 %v4385_v31, %v7326_v28 }
 0x659   : > { %4483 = vst.msk [vmem:[%s6927_s18 + $0xd8] sm:$0xff] %vm280_vm0, %v4451_v3  ;;  %v4449_v51 = vmax.f32 %v4417_v41, 0.0 }
 0x65b   : > { %4481 = vst.msk [vmem:[%s6927_s18 + $0xc8] sm:$0xff] %vm280_vm0, %v4449_v51 }
 0x67c   : > { %v4710_v37 = vpop.f32.mrf.mxu1 }
 0x67d   : > { %v4351_v48 = vmul.f32 %v4710_v37, %v6906_v0 }
 0x67e   : > { %v4299_v44 = vpop.f32.mrf.mxu1 }
 0x67f   : > { %v4390_v4 = vadd.f32 %v6911_v59, %v4351_v48  ;;  %v4349_v18 = vmul.f32 %v6906_v0, %v4299_v44 }
 0x680   : > { %v4711_v39 = vpop.f32.mrf.mxu1 }
 0x681   : > { %v4422_v8 = vadd.f32 %v4390_v4, %v7327_v9  ;;  %v4388_v7 = vadd.f32 %v6911_v59, %v4349_v18  ;;  %v4352_v27 = vmul.f32 %v4711_v39, %v6906_v0 }
 0x682   : > { %v4302_v61 = vpop.f32.mrf.mxu1 }
 0x683   : > { %v4454_v52 = vmax.f32 %v4422_v8, 0.0  ;;  %v4420_v25 = vadd.f32 %v4388_v7, %v7328_v63  ;;  %v4391_v62 = vadd.f32 %v6911_v59, %v4352_v27  ;;  %v4350_v34 = vmul.f32 %v6906_v0, %v4302_v61 }
 0x685   : > { %4486 = vst.msk [vmem:[%s6927_s18 + $0xf0] sm:$0xff] %vm280_vm0, %v4454_v52  ;;  %v4452_v29 = vmax.f32 %v4420_v25, 0.0  ;;  %v4423_v12 = vadd.f32 %v4391_v62, %v7329_v53  ;;  %v4389_v21 = vadd.f32 %v6911_v59, %v4350_v34 }
 0x687   : > { %4484 = vst.msk [vmem:[%s6927_s18 + $0xe0] sm:$0xff] %vm280_vm0, %v4452_v29  ;;  %v4455_v11 = vmax.f32 %v4423_v12, 0.0  ;;  %v4421_v23 = vadd.f32 %v4389_v21, %v7330_v13 }
 0x689   : > { %4487 = vst.msk [vmem:[%s6927_s18 + $0xf8] sm:$0xff] %vm280_vm0, %v4455_v11  ;;  %v4453_v46 = vmax.f32 %v4421_v23, 0.0 }
 0x68b   : > { %4485 = vst.msk [vmem:[%s6927_s18 + $0xe8] sm:$0xff] %vm280_vm0, %v4453_v46 }
 0x68c PF: > { %s17_s24 = sadd.s32 1, %s4743_s24  }
 0x68d   : > { %p14_p4 = scmp.ge.s32.totalorder %s17_s24, 4  }
 0x68f   :  { %16 = sbr.rel (!%p14_p4) target bundleno = 1 (0x1), region = 80 }

</bundles_post_ra>
